<compile_context>
chip_gen: v7x
topology: tpu7x:2x2x1
jax: 0.10.0
libtpu: 0.0.40
codegen_flags: <defaults>
</compile_context>

<pallas_src>
import functools

import jax
import jax.numpy as jnp
from jax.experimental import pallas as pl
from jax.experimental.pallas import tpu as pltpu


# ---------------------------------------------------------------------------
# Kernel 1: fused biLSTM final-hidden kernel.
# grid axis d in {0, 1}: d == 0 -> forward directions, d == 1 -> backward
# directions (inputs pre-reversed in time caller-side).  Each grid step runs
# the 3 modality recurrences interleaved.
# ---------------------------------------------------------------------------
def _bilstm_kernel(x_ref, wih_ref, whh_ref, b_ref, h_out_ref, *, T, B):
    G = wih_ref.shape[-1]           # 4H
    H = G // 4

    # Hoisted input projection: one (T*B, Dmax) @ (Dmax, 4H) bf16 MXU push per
    # modality (bias pre-added) instead of a tiny matmul + lane-concat per step.
    gx = []
    for m in range(3):
        g = jnp.dot(x_ref[m], wih_ref[m], preferred_element_type=jnp.float32)
        gx.append(g + b_ref[m])                      # (T*B, 4H) f32

    hs = [jnp.zeros((B, H), jnp.float32) for _ in range(3)]
    cs = [jnp.zeros((B, H), jnp.float32) for _ in range(3)]

    # Interleave the 3 independent recurrences; static indices everywhere.
    # TODO(synk): for large T switch to lax.fori_loop(..., unroll=8) to bound
    # instruction count / vreg live ranges; at T=8 full static unroll is right.
    for t in range(T):
        for m in range(3):
            gates = gx[m][t * B:(t + 1) * B] + jnp.dot(
                hs[m].astype(jnp.bfloat16), whh_ref[m],
                preferred_element_type=jnp.float32)          # (B, 4H)
            i_g = jax.nn.sigmoid(gates[:, 0 * H:1 * H])      # torch gate order i|f|g|o
            f_g = jax.nn.sigmoid(gates[:, 1 * H:2 * H])
            g_g = jnp.tanh(gates[:, 2 * H:3 * H])
            o_g = jax.nn.sigmoid(gates[:, 3 * H:4 * H])
            cs[m] = f_g * cs[m] + i_g * g_g
            hs[m] = o_g * jnp.tanh(cs[m])

    for m in range(3):
        h_out_ref[m] = hs[m]


# ---------------------------------------------------------------------------
# Kernel 2: fused capsule projection + dynamic routing + decision MLP.
# ---------------------------------------------------------------------------
def _fusion_kernel(h_ref, wproj_ref, fcb_ref, wdyn_ref,
                   fc1w_ref, fc1b_ref, fc2w_ref, fc2b_ref, out_ref,
                   *, routing, final_tanh, D):
    # h_n.permute(1,0,2).reshape(B, 1, D)  ==  [h_fwd | h_bwd] along lanes.
    tc = jnp.concatenate([h_ref[0], h_ref[3]], axis=-1).astype(jnp.bfloat16)
    ac = jnp.concatenate([h_ref[1], h_ref[4]], axis=-1).astype(jnp.bfloat16)
    vc = jnp.concatenate([h_ref[2], h_ref[5]], axis=-1).astype(jnp.bfloat16)
    B = tc.shape[0]

    # One (B, D)@(D, 8D) matmul per modality.  Lanes [0, 4D): raw capsule
    # projections W[0..3] (needed for the routing-coefficient inner products).
    # Lanes [4D, 8D): pre-composed routing-invariant slot@W_block products
    # (concat(rc_k * slot_k) @ W  ==  sum_k rc_k * (slot_k @ W_k), hoisted).
    tall = jnp.dot(tc, wproj_ref[0], preferred_element_type=jnp.float32)
    aall = jnp.dot(ac, wproj_ref[1], preferred_element_type=jnp.float32)
    vall = jnp.dot(vc, wproj_ref[2], preferred_element_type=jnp.float32)
    tusc = [tall[:, i * D:(i + 1) * D] for i in range(4)]
    ausc = [aall[:, i * D:(i + 1) * D] for i in range(4)]
    vusc = [vall[:, i * D:(i + 1) * D] for i in range(4)]
    pta = [tall[:, 4 * D:5 * D], aall[:, 4 * D:5 * D]]                           # fc_ta
    ptv = [tall[:, 5 * D:6 * D], vall[:, 4 * D:5 * D]]                           # fc_tv
    pav = [aall[:, 5 * D:6 * D], vall[:, 5 * D:6 * D]]                           # fc_av
    ptav = [tall[:, 6 * D:7 * D], aall[:, 6 * D:7 * D], vall[:, 6 * D:7 * D]]    # fc_tav
    pdec = [tall[:, 7 * D:8 * D], aall[:, 7 * D:8 * D], vall[:, 7 * D:8 * D]]    # fc_deci 0..2

    # Raw slot groups used for routing-coefficient updates.
    ta = [tusc[0], ausc[0]]
    tv = [tusc[1], vusc[0]]
    av = [ausc[1], vusc[1]]
    tav = [tusc[2], ausc[2], vusc[2]]

    b_ta = fcb_ref[:, 0 * D:1 * D]
    b_tv = fcb_ref[:, 1 * D:2 * D]
    b_av = fcb_ref[:, 2 * D:3 * D]
    b_tav = fcb_ref[:, 3 * D:4 * D]
    b_dec = fcb_ref[:, 4 * D:5 * D]

    # Routing coefficients as (B, 1) columns: exact — every lane of the PyTorch
    # (B, n, D) rc tensors is identical by construction (ones init + keepdims-
    # style bmm/repeat updates).
    one_col = jnp.ones((B, 1), jnp.float32)
    rc0 = [one_col] * 2
    rc1 = [one_col] * 2
    rc2 = [one_col] * 2
    rc3 = [one_col] * 3
    rc4 = [one_col] * 7

    def softmax_cols(cols):
        m = cols[0]
        for c in cols[1:]:
            m = jnp.maximum(m, c)
        es = [jnp.exp(c - m) for c in cols]
        tot = es[0]
        for e in es[1:]:
            tot = tot + e
        inv = 1.0 / tot            # exact; (B,1) columns -> negligible cost
        return [e * inv for e in es]

    dc = None
    wdyn = wdyn_ref[...]           # (4D, D) bf16, rows [bc_ta|bc_tv|bc_av|tc_tav]
    for r in range(routing + 1):   # static python int -> unrolled
        rc0 = softmax_cols(rc0)
        rc1 = softmax_cols(rc1)
        rc2 = softmax_cols(rc2)
        rc3 = softmax_cols(rc3)
        rc4 = softmax_cols(rc4)

        # Block Linears of the fixed slots: pure VPU weighted sums (hoisted MXU).
        bc_ta = rc0[0] * pta[0] + rc0[1] * pta[1] + b_ta
        bc_tv = rc1[0] * ptv[0] + rc1[1] * ptv[1] + b_tv
        bc_av = rc2[0] * pav[0] + rc2[1] * pav[1] + b_av
        tc_tav = rc3[0] * ptav[0] + rc3[1] * ptav[1] + rc3[2] * ptav[2] + b_tav

        # Only the 4 freshly computed deci slots need an MXU push this iteration.
        dyn = jnp.concatenate([rc4[3] * bc_ta, rc4[4] * bc_tv,
                               rc4[5] * bc_av, rc4[6] * tc_tav],
                              axis=-1).astype(jnp.bfloat16)          # (B, 4D)
        dc = (rc4[0] * pdec[0] + rc4[1] * pdec[1] + rc4[2] * pdec[2]
              + jnp.dot(dyn, wdyn, preferred_element_type=jnp.float32) + b_dec)

        if r < routing:
            # torch.bmm(concat, dc^T).repeat(1,1,D) == per-capsule <slot, dc>,
            # identical across lanes -> keep as (B, 1) columns.
            deci = [tusc[3], ausc[3], vusc[3], bc_ta, bc_tv, bc_av, tc_tav]
            rc4 = [rc4[k] + jnp.sum(deci[k] * dc, axis=-1, keepdims=True) for k in range(7)]
            rc3 = [rc3[k] + jnp.sum(tav[k] * tc_tav, axis=-1, keepdims=True) for k in range(3)]
            rc2 = [rc2[k] + jnp.sum(av[k] * bc_av, axis=-1, keepdims=True) for k in range(2)]
            rc1 = [rc1[k] + jnp.sum(tv[k] * bc_tv, axis=-1, keepdims=True) for k in range(2)]
            rc0 = [rc0[k] + jnp.sum(ta[k] * bc_ta, axis=-1, keepdims=True) for k in range(2)]

    out1 = jnp.tanh(jnp.dot(dc.astype(jnp.bfloat16), fc1w_ref[...],
                            preferred_element_type=jnp.float32) + fc1b_ref[...])
    preds = (jnp.dot(out1.astype(jnp.bfloat16), fc2w_ref[...],
                     preferred_element_type=jnp.float32) + fc2b_ref[...])
    if final_tanh:                 # dataset == 'iemocap' branch
        preds = jnp.tanh(preds)
    out_ref[...] = preds.astype(out_ref.dtype)


# ---------------------------------------------------------------------------
# Wrapper (plain-JAX glue: pad / time-reverse / stack inputs, launch kernels)
# ---------------------------------------------------------------------------
def concat_forward(params, text, audio, video, *, routing, dataset):
    wih = params['lstm_wih']          # (2, 3, Dmax, 4H) bf16
    whh = params['lstm_whh']          # (2, 3, H, 4H)    bf16
    lstm_b = params['lstm_b']         # (2, 3, 1, 4H)    f32   (b_ih + b_hh)
    G = wih.shape[-1]
    H = G // 4
    Dmax = wih.shape[2]
    D = 2 * H
    B, T, _ = text.shape
    Bp = max(8, ((B + 7) // 8) * 8)   # pad batch to full sublane groups

    def prep(x):
        x = x.astype(jnp.float32)
        x = jnp.pad(x, ((0, Bp - B), (0, 0), (0, Dmax - x.shape[-1])))  # zero-pad
        return jnp.transpose(x, (1, 0, 2))                              # (T, Bp, Dmax)

    xs = jnp.stack([prep(text), prep(audio), prep(video)])              # (3, T, Bp, Dmax)
    fwd = xs.reshape(3, T * Bp, Dmax)
    bwd = xs[:, ::-1].reshape(3, T * Bp, Dmax)     # backward dirs: time pre-reversed
    x_stack = jnp.stack([fwd, bwd]).astype(jnp.bfloat16)                # (2, 3, T*Bp, Dmax)
    TB = T * Bp

    h_all = pl.pallas_call(
        functools.partial(_bilstm_kernel, T=T, B=Bp),
        out_shape=jax.ShapeDtypeStruct((2, 3, Bp, H), jnp.float32),
        grid=(2,),
        in_specs=[
            pl.BlockSpec((None, 3, TB, Dmax), lambda d: (d, 0, 0, 0)),
            pl.BlockSpec((None, 3, Dmax, G), lambda d: (d, 0, 0, 0)),
            pl.BlockSpec((None, 3, H, G), lambda d: (d, 0, 0, 0)),
            pl.BlockSpec((None, 3, 1, G), lambda d: (d, 0, 0, 0)),
        ],
        out_specs=pl.BlockSpec((None, 3, Bp, H), lambda d: (d, 0, 0, 0)),
        compiler_params=pltpu.CompilerParams(
            dimension_semantics=("parallel",)),    # fwd/bwd groups -> v7x 2 TCs
    )(x_stack, wih, whh, lstm_b)

    # (2, 3, Bp, H) -> (6, Bp, H): 0..2 = fwd t/a/v, 3..5 = bwd t/a/v.
    h_all = h_all.reshape(6, Bp, H)

    # TODO(synk): on single-TC chips (v5e/v6e) this second launch could be fused
    # into the last grid step of kernel 1 via a persistent VMEM scratch; kept as
    # a separate call so the same code is correct on 2-TC v7x without a
    # cross-core barrier.
    L = params['fc2_b'].shape[-1]
    vspec = pl.BlockSpec(memory_space=pltpu.MemorySpace.VMEM)
    kern = functools.partial(_fusion_kernel, routing=routing,
                             final_tanh=(dataset == 'iemocap'), D=D)
    args = (h_all, params['w_proj'], params['fc_b'], params['w_deci_dyn'],
            params['fc1_w'], params['fc1_b'], params['fc2_w'], params['fc2_b'])
    preds = pl.pallas_call(
        kern,
        out_shape=jax.ShapeDtypeStruct((Bp, L), jnp.float32),
        in_specs=[vspec] * len(args),
        out_specs=vspec,
    )(*args)
    return preds[:B]


def init_params(key, *, t_in, a_in, v_in, dim_capsule, label_dim):
    # Deterministic synthetic init (stands in for xavier_normal / torch defaults),
    # emitted directly in the packed kernel layouts.  When importing real torch
    # weights: transpose the (4H, Din)/(4H, H) LSTM tensors (gate order i|f|g|o),
    # pre-sum b_ih + b_hh, transpose all Linear weights to (in, out), and compose
    # Wm[i] @ W_block_slot for the fixed-product lane pack exactly as below.
    D = dim_capsule
    H = D // 2
    G = 4 * H
    Dmax = max(t_in, a_in, v_in)
    keys = iter(jax.random.split(key, 128))

    def norm(shape, scale=0.1):
        return (scale * jax.random.normal(next(keys), shape)).astype(jnp.float32)

    ins = (t_in, a_in, v_in)
    wih = jnp.stack([jnp.stack([jnp.pad(norm((din, G)), ((0, Dmax - din), (0, 0)))
                                for din in ins]) for _ in range(2)])      # (2,3,Dmax,G)
    whh = jnp.stack([jnp.stack([norm((H, G)) for _ in ins])
                     for _ in range(2)])                                  # (2,3,H,G)
    lstm_b = jnp.stack([jnp.stack([norm((1, G)) for _ in ins])
                        for _ in range(2)])                               # (2,3,1,G)

    # Capsule projections and block-Linear weights (stored as (in, out)).
    Wt = [norm((D, D)) for _ in range(4)]
    Wa = [norm((D, D)) for _ in range(4)]
    Wv = [norm((D, D)) for _ in range(4)]
    Wta = norm((2 * D, D))
    Wtv = norm((2 * D, D))
    Wav = norm((2 * D, D))
    Wtav = norm((3 * D, D))
    Wdec = norm((7 * D, D))
    b_ta, b_tv, b_av, b_tav, b_dec = [norm((1, D)) for _ in range(5)]

    # Lane-packed projection slabs: [raw W[0..3] | composed routing-invariant
    # slot@W_block products] per modality -> (D, 8D).
    t_fixed = [Wt[0] @ Wta[0:D], Wt[1] @ Wtv[0:D],
               Wt[2] @ Wtav[0:D], Wt[3] @ Wdec[0:D]]
    a_fixed = [Wa[0] @ Wta[D:2 * D], Wa[1] @ Wav[0:D],
               Wa[2] @ Wtav[D:2 * D], Wa[3] @ Wdec[D:2 * D]]
    v_fixed = [Wv[0] @ Wtv[D:2 * D], Wv[1] @ Wav[D:2 * D],
               Wv[2] @ Wtav[2 * D:3 * D], Wv[3] @ Wdec[2 * D:3 * D]]
    w_proj = jnp.stack([jnp.concatenate(Wt + t_fixed, axis=1),
                        jnp.concatenate(Wa + a_fixed, axis=1),
                        jnp.concatenate(Wv + v_fixed, axis=1)])           # (3, D, 8D)

    return dict(
        lstm_wih=wih.astype(jnp.bfloat16),
        lstm_whh=whh.astype(jnp.bfloat16),
        lstm_b=lstm_b,
        w_proj=w_proj.astype(jnp.bfloat16),
        fc_b=jnp.concatenate([b_ta, b_tv, b_av, b_tav, b_dec], axis=1),   # (1, 5D)
        w_deci_dyn=Wdec[3 * D:7 * D].astype(jnp.bfloat16),                # (4D, D)
        fc1_w=norm((D, H)).astype(jnp.bfloat16), fc1_b=norm((1, H)),
        fc2_w=norm((H, label_dim)).astype(jnp.bfloat16), fc2_b=norm((1, label_dim)),
    )


if __name__ == "__main__":
    # TODO(synk): self.dropout is stored but never applied in the reference
    # forward; nothing to translate.
    B, T = 2, 8
    t_in, a_in, v_in = 32, 16, 16
    dim_capsule, label_dim, routing = 32, 4, 3
    dataset = "mosi"   # 'mosi'/'mosei_senti' -> no final tanh; 'iemocap' -> tanh

    key = jax.random.PRNGKey(0)
    kp, kt, ka, kv = jax.random.split(key, 4)
    params = init_params(kp, t_in=t_in, a_in=a_in, v_in=v_in,
                         dim_capsule=dim_capsule, label_dim=label_dim)
    text = jax.random.normal(kt, (B, T, t_in), dtype=jnp.float32)
    audio = jax.random.normal(ka, (B, T, a_in), dtype=jnp.float32)
    video = jax.random.normal(kv, (B, T, v_in), dtype=jnp.float32)

    preds = concat_forward(params, text, audio, video,
                           routing=routing, dataset=dataset)
    jax.block_until_ready(preds)
    assert preds.shape == (B, label_dim), preds.shape
    assert bool(jnp.all(jnp.isfinite(preds)))
    print("KERNEL_OK")
</pallas_src>

<mosaic_0001>
module attributes {stable_mosaic.version = 11 : i64} {
  func.func @_bilstm_kernel(%arg0: i32, %arg1: memref<1x3x64x32xbf16, #tpu.memory_space<vmem>>, %arg2: memref<1x3x32x64xbf16, #tpu.memory_space<vmem>>, %arg3: memref<1x3x16x64xbf16, #tpu.memory_space<vmem>>, %arg4: memref<1x3x1x64xf32, #tpu.memory_space<vmem>>, %arg5: memref<1x3x8x16xf32, #tpu.memory_space<vmem>>) attributes {dimension_semantics = [#tpu.dimension_semantics<parallel>], iteration_bounds = array<i64: 2>, scalar_prefetch = 0 : i64, scratch_operands = 0 : i64, tpu.core_type = #tpu.core_type<tc>, window_params = [{transform_indices = @transform_0, window_bounds = array<i64: 1, 3, 64, 32>}, {transform_indices = @transform_1, window_bounds = array<i64: 1, 3, 32, 64>}, {transform_indices = @transform_2, window_bounds = array<i64: 1, 3, 16, 64>}, {transform_indices = @transform_3, window_bounds = array<i64: 1, 3, 1, 64>}, {transform_indices = @transform_4, window_bounds = array<i64: 1, 3, 8, 16>}]} {
    %c0 = arith.constant 0 : index
    %c0_0 = arith.constant 0 : index
    %c0_1 = arith.constant 0 : index
    %c0_2 = arith.constant 0 : index
    %0 = vector.load %arg1[%c0, %c0_0, %c0_1, %c0_2] : memref<1x3x64x32xbf16, #tpu.memory_space<vmem>>, vector<1x1x64x32xbf16>
    %1 = vector.shape_cast %0 : vector<1x1x64x32xbf16> to vector<64x32xbf16>
    %c0_3 = arith.constant 0 : index
    %c0_4 = arith.constant 0 : index
    %c0_5 = arith.constant 0 : index
    %c0_6 = arith.constant 0 : index
    %2 = vector.load %arg2[%c0_3, %c0_4, %c0_5, %c0_6] : memref<1x3x32x64xbf16, #tpu.memory_space<vmem>>, vector<1x1x32x64xbf16>
    %3 = vector.shape_cast %2 : vector<1x1x32x64xbf16> to vector<32x64xbf16>
    %cst = arith.constant dense<0.000000e+00> : vector<64x64xf32>
    %4 = tpu.matmul %1, %3, %cst {dimension_numbers = #tpu.dot_dimension_numbers<[1], [0], [0], [1], [0, 0, 1, 1], [], []>} : vector<64x32xbf16>, vector<32x64xbf16>, vector<64x64xf32> -> vector<64x64xf32>
    %c0_7 = arith.constant 0 : index
    %c0_8 = arith.constant 0 : index
    %c0_9 = arith.constant 0 : index
    %c0_10 = arith.constant 0 : index
    %5 = vector.load %arg4[%c0_7, %c0_8, %c0_9, %c0_10] : memref<1x3x1x64xf32, #tpu.memory_space<vmem>>, vector<1x1x1x64xf32>
    %6 = vector.shape_cast %5 : vector<1x1x1x64xf32> to vector<1x64xf32>
    %7 = vector.broadcast %6 : vector<1x64xf32> to vector<64x64xf32>
    %8 = arith.addf %4, %7 : vector<64x64xf32>
    %c0_11 = arith.constant 0 : index
    %c1 = arith.constant 1 : index
    %c0_12 = arith.constant 0 : index
    %c0_13 = arith.constant 0 : index
    %9 = vector.load %arg1[%c0_11, %c1, %c0_12, %c0_13] : memref<1x3x64x32xbf16, #tpu.memory_space<vmem>>, vector<1x1x64x32xbf16>
    %10 = vector.shape_cast %9 : vector<1x1x64x32xbf16> to vector<64x32xbf16>
    %c0_14 = arith.constant 0 : index
    %c1_15 = arith.constant 1 : index
    %c0_16 = arith.constant 0 : index
    %c0_17 = arith.constant 0 : index
    %11 = vector.load %arg2[%c0_14, %c1_15, %c0_16, %c0_17] : memref<1x3x32x64xbf16, #tpu.memory_space<vmem>>, vector<1x1x32x64xbf16>
    %12 = vector.shape_cast %11 : vector<1x1x32x64xbf16> to vector<32x64xbf16>
    %cst_18 = arith.constant dense<0.000000e+00> : vector<64x64xf32>
    %13 = tpu.matmul %10, %12, %cst_18 {dimension_numbers = #tpu.dot_dimension_numbers<[1], [0], [0], [1], [0, 0, 1, 1], [], []>} : vector<64x32xbf16>, vector<32x64xbf16>, vector<64x64xf32> -> vector<64x64xf32>
    %c0_19 = arith.constant 0 : index
    %c1_20 = arith.constant 1 : index
    %c0_21 = arith.constant 0 : index
    %c0_22 = arith.constant 0 : index
    %14 = vector.load %arg4[%c0_19, %c1_20, %c0_21, %c0_22] : memref<1x3x1x64xf32, #tpu.memory_space<vmem>>, vector<1x1x1x64xf32>
    %15 = vector.shape_cast %14 : vector<1x1x1x64xf32> to vector<1x64xf32>
    %16 = vector.broadcast %15 : vector<1x64xf32> to vector<64x64xf32>
    %17 = arith.addf %13, %16 : vector<64x64xf32>
    %c0_23 = arith.constant 0 : index
    %c2 = arith.constant 2 : index
    %c0_24 = arith.constant 0 : index
    %c0_25 = arith.constant 0 : index
    %18 = vector.load %arg1[%c0_23, %c2, %c0_24, %c0_25] : memref<1x3x64x32xbf16, #tpu.memory_space<vmem>>, vector<1x1x64x32xbf16>
    %19 = vector.shape_cast %18 : vector<1x1x64x32xbf16> to vector<64x32xbf16>
    %c0_26 = arith.constant 0 : index
    %c2_27 = arith.constant 2 : index
    %c0_28 = arith.constant 0 : index
    %c0_29 = arith.constant 0 : index
    %20 = vector.load %arg2[%c0_26, %c2_27, %c0_28, %c0_29] : memref<1x3x32x64xbf16, #tpu.memory_space<vmem>>, vector<1x1x32x64xbf16>
    %21 = vector.shape_cast %20 : vector<1x1x32x64xbf16> to vector<32x64xbf16>
    %cst_30 = arith.constant dense<0.000000e+00> : vector<64x64xf32>
    %22 = tpu.matmul %19, %21, %cst_30 {dimension_numbers = #tpu.dot_dimension_numbers<[1], [0], [0], [1], [0, 0, 1, 1], [], []>} : vector<64x32xbf16>, vector<32x64xbf16>, vector<64x64xf32> -> vector<64x64xf32>
    %c0_31 = arith.constant 0 : index
    %c2_32 = arith.constant 2 : index
    %c0_33 = arith.constant 0 : index
    %c0_34 = arith.constant 0 : index
    %23 = vector.load %arg4[%c0_31, %c2_32, %c0_33, %c0_34] : memref<1x3x1x64xf32, #tpu.memory_space<vmem>>, vector<1x1x1x64xf32>
    %24 = vector.shape_cast %23 : vector<1x1x1x64xf32> to vector<1x64xf32>
    %25 = vector.broadcast %24 : vector<1x64xf32> to vector<64x64xf32>
    %26 = arith.addf %22, %25 : vector<64x64xf32>
    %cst_35 = arith.constant 0.000000e+00 : f32
    %27 = vector.broadcast %cst_35 : f32 to vector<8x16xf32>
    %cst_36 = arith.constant 0.000000e+00 : f32
    %28 = vector.broadcast %cst_36 : f32 to vector<8x16xf32>
    %cst_37 = arith.constant 0.000000e+00 : f32
    %29 = vector.broadcast %cst_37 : f32 to vector<8x16xf32>
    %cst_38 = arith.constant 0.000000e+00 : f32
    %30 = vector.broadcast %cst_38 : f32 to vector<8x16xf32>
    %cst_39 = arith.constant 0.000000e+00 : f32
    %31 = vector.broadcast %cst_39 : f32 to vector<8x16xf32>
    %cst_40 = arith.constant 0.000000e+00 : f32
    %32 = vector.broadcast %cst_40 : f32 to vector<8x16xf32>
    %33 = vector.extract_strided_slice %8 {offsets = [0, 0], sizes = [8, 64], strides = [1, 1]} : vector<64x64xf32> to vector<8x64xf32>
    %34 = arith.truncf %27 : vector<8x16xf32> to vector<8x16xbf16>
    %c0_41 = arith.constant 0 : index
    %c0_42 = arith.constant 0 : index
    %c0_43 = arith.constant 0 : index
    %c0_44 = arith.constant 0 : index
    %35 = vector.load %arg3[%c0_41, %c0_42, %c0_43, %c0_44] : memref<1x3x16x64xbf16, #tpu.memory_space<vmem>>, vector<1x1x16x64xbf16>
    %36 = vector.shape_cast %35 : vector<1x1x16x64xbf16> to vector<16x64xbf16>
    %cst_45 = arith.constant dense<0.000000e+00> : vector<8x64xf32>
    %37 = tpu.matmul %34, %36, %cst_45 {dimension_numbers = #tpu.dot_dimension_numbers<[1], [0], [0], [1], [0, 0, 1, 1], [], []>} : vector<8x16xbf16>, vector<16x64xbf16>, vector<8x64xf32> -> vector<8x64xf32>
    %38 = arith.addf %33, %37 : vector<8x64xf32>
    %39 = vector.extract_strided_slice %38 {offsets = [0, 0], sizes = [8, 16], strides = [1, 1]} : vector<8x64xf32> to vector<8x16xf32>
    %40 = arith.negf %39 : vector<8x16xf32>
    %41 = math.exp %40 : vector<8x16xf32>
    %cst_46 = arith.constant 1.000000e+00 : f32
    %42 = vector.broadcast %cst_46 : f32 to vector<8x16xf32>
    %43 = arith.addf %42, %41 : vector<8x16xf32>
    %44 = arith.divf %42, %43 : vector<8x16xf32>
    %45 = vector.extract_strided_slice %38 {offsets = [0, 16], sizes = [8, 16], strides = [1, 1]} : vector<8x64xf32> to vector<8x16xf32>
    %46 = arith.negf %45 : vector<8x16xf32>
    %47 = math.exp %46 : vector<8x16xf32>
    %cst_47 = arith.constant 1.000000e+00 : f32
    %48 = vector.broadcast %cst_47 : f32 to vector<8x16xf32>
    %49 = arith.addf %48, %47 : vector<8x16xf32>
    %50 = arith.divf %48, %49 : vector<8x16xf32>
    %51 = vector.extract_strided_slice %38 {offsets = [0, 32], sizes = [8, 16], strides = [1, 1]} : vector<8x64xf32> to vector<8x16xf32>
    %52 = math.tanh %51 : vector<8x16xf32>
    %53 = vector.extract_strided_slice %38 {offsets = [0, 48], sizes = [8, 16], strides = [1, 1]} : vector<8x64xf32> to vector<8x16xf32>
    %54 = arith.negf %53 : vector<8x16xf32>
    %55 = math.exp %54 : vector<8x16xf32>
    %cst_48 = arith.constant 1.000000e+00 : f32
    %56 = vector.broadcast %cst_48 : f32 to vector<8x16xf32>
    %57 = arith.addf %56, %55 : vector<8x16xf32>
    %58 = arith.divf %56, %57 : vector<8x16xf32>
    %59 = arith.mulf %50, %30 : vector<8x16xf32>
    %60 = arith.mulf %44, %52 : vector<8x16xf32>
    %61 = arith.addf %59, %60 : vector<8x16xf32>
    %62 = math.tanh %61 : vector<8x16xf32>
    %63 = arith.mulf %58, %62 : vector<8x16xf32>
    %64 = vector.extract_strided_slice %17 {offsets = [0, 0], sizes = [8, 64], strides = [1, 1]} : vector<64x64xf32> to vector<8x64xf32>
    %65 = arith.truncf %28 : vector<8x16xf32> to vector<8x16xbf16>
    %c0_49 = arith.constant 0 : index
    %c1_50 = arith.constant 1 : index
    %c0_51 = arith.constant 0 : index
    %c0_52 = arith.constant 0 : index
    %66 = vector.load %arg3[%c0_49, %c1_50, %c0_51, %c0_52] : memref<1x3x16x64xbf16, #tpu.memory_space<vmem>>, vector<1x1x16x64xbf16>
    %67 = vector.shape_cast %66 : vector<1x1x16x64xbf16> to vector<16x64xbf16>
    %cst_53 = arith.constant dense<0.000000e+00> : vector<8x64xf32>
    %68 = tpu.matmul %65, %67, %cst_53 {dimension_numbers = #tpu.dot_dimension_numbers<[1], [0], [0], [1], [0, 0, 1, 1], [], []>} : vector<8x16xbf16>, vector<16x64xbf16>, vector<8x64xf32> -> vector<8x64xf32>
    %69 = arith.addf %64, %68 : vector<8x64xf32>
    %70 = vector.extract_strided_slice %69 {offsets = [0, 0], sizes = [8, 16], strides = [1, 1]} : vector<8x64xf32> to vector<8x16xf32>
    %71 = arith.negf %70 : vector<8x16xf32>
    %72 = math.exp %71 : vector<8x16xf32>
    %cst_54 = arith.constant 1.000000e+00 : f32
    %73 = vector.broadcast %cst_54 : f32 to vector<8x16xf32>
    %74 = arith.addf %73, %72 : vector<8x16xf32>
    %75 = arith.divf %73, %74 : vector<8x16xf32>
    %76 = vector.extract_strided_slice %69 {offsets = [0, 16], sizes = [8, 16], strides = [1, 1]} : vector<8x64xf32> to vector<8x16xf32>
    %77 = arith.negf %76 : vector<8x16xf32>
    %78 = math.exp %77 : vector<8x16xf32>
    %cst_55 = arith.constant 1.000000e+00 : f32
    %79 = vector.broadcast %cst_55 : f32 to vector<8x16xf32>
    %80 = arith.addf %79, %78 : vector<8x16xf32>
    %81 = arith.divf %79, %80 : vector<8x16xf32>
    %82 = vector.extract_strided_slice %69 {offsets = [0, 32], sizes = [8, 16], strides = [1, 1]} : vector<8x64xf32> to vector<8x16xf32>
    %83 = math.tanh %82 : vector<8x16xf32>
    %84 = vector.extract_strided_slice %69 {offsets = [0, 48], sizes = [8, 16], strides = [1, 1]} : vector<8x64xf32> to vector<8x16xf32>
    %85 = arith.negf %84 : vector<8x16xf32>
    %86 = math.exp %85 : vector<8x16xf32>
    %cst_56 = arith.constant 1.000000e+00 : f32
    %87 = vector.broadcast %cst_56 : f32 to vector<8x16xf32>
    %88 = arith.addf %87, %86 : vector<8x16xf32>
    %89 = arith.divf %87, %88 : vector<8x16xf32>
    %90 = arith.mulf %81, %31 : vector<8x16xf32>
    %91 = arith.mulf %75, %83 : vector<8x16xf32>
    %92 = arith.addf %90, %91 : vector<8x16xf32>
    %93 = math.tanh %92 : vector<8x16xf32>
    %94 = arith.mulf %89, %93 : vector<8x16xf32>
    %95 = vector.extract_strided_slice %26 {offsets = [0, 0], sizes = [8, 64], strides = [1, 1]} : vector<64x64xf32> to vector<8x64xf32>
    %96 = arith.truncf %29 : vector<8x16xf32> to vector<8x16xbf16>
    %c0_57 = arith.constant 0 : index
    %c2_58 = arith.constant 2 : index
    %c0_59 = arith.constant 0 : index
    %c0_60 = arith.constant 0 : index
    %97 = vector.load %arg3[%c0_57, %c2_58, %c0_59, %c0_60] : memref<1x3x16x64xbf16, #tpu.memory_space<vmem>>, vector<1x1x16x64xbf16>
    %98 = vector.shape_cast %97 : vector<1x1x16x64xbf16> to vector<16x64xbf16>
    %cst_61 = arith.constant dense<0.000000e+00> : vector<8x64xf32>
    %99 = tpu.matmul %96, %98, %cst_61 {dimension_numbers = #tpu.dot_dimension_numbers<[1], [0], [0], [1], [0, 0, 1, 1], [], []>} : vector<8x16xbf16>, vector<16x64xbf16>, vector<8x64xf32> -> vector<8x64xf32>
    %100 = arith.addf %95, %99 : vector<8x64xf32>
    %101 = vector.extract_strided_slice %100 {offsets = [0, 0], sizes = [8, 16], strides = [1, 1]} : vector<8x64xf32> to vector<8x16xf32>
    %102 = arith.negf %101 : vector<8x16xf32>
    %103 = math.exp %102 : vector<8x16xf32>
    %cst_62 = arith.constant 1.000000e+00 : f32
    %104 = vector.broadcast %cst_62 : f32 to vector<8x16xf32>
    %105 = arith.addf %104, %103 : vector<8x16xf32>
    %106 = arith.divf %104, %105 : vector<8x16xf32>
    %107 = vector.extract_strided_slice %100 {offsets = [0, 16], sizes = [8, 16], strides = [1, 1]} : vector<8x64xf32> to vector<8x16xf32>
    %108 = arith.negf %107 : vector<8x16xf32>
    %109 = math.exp %108 : vector<8x16xf32>
    %cst_63 = arith.constant 1.000000e+00 : f32
    %110 = vector.broadcast %cst_63 : f32 to vector<8x16xf32>
    %111 = arith.addf %110, %109 : vector<8x16xf32>
    %112 = arith.divf %110, %111 : vector<8x16xf32>
    %113 = vector.extract_strided_slice %100 {offsets = [0, 32], sizes = [8, 16], strides = [1, 1]} : vector<8x64xf32> to vector<8x16xf32>
    %114 = math.tanh %113 : vector<8x16xf32>
    %115 = vector.extract_strided_slice %100 {offsets = [0, 48], sizes = [8, 16], strides = [1, 1]} : vector<8x64xf32> to vector<8x16xf32>
    %116 = arith.negf %115 : vector<8x16xf32>
    %117 = math.exp %116 : vector<8x16xf32>
    %cst_64 = arith.constant 1.000000e+00 : f32
    %118 = vector.broadcast %cst_64 : f32 to vector<8x16xf32>
    %119 = arith.addf %118, %117 : vector<8x16xf32>
    %120 = arith.divf %118, %119 : vector<8x16xf32>
    %121 = arith.mulf %112, %32 : vector<8x16xf32>
    %122 = arith.mulf %106, %114 : vector<8x16xf32>
    %123 = arith.addf %121, %122 : vector<8x16xf32>
    %124 = math.tanh %123 : vector<8x16xf32>
    %125 = arith.mulf %120, %124 : vector<8x16xf32>
    %126 = vector.extract_strided_slice %8 {offsets = [8, 0], sizes = [8, 64], strides = [1, 1]} : vector<64x64xf32> to vector<8x64xf32>
    %127 = arith.truncf %63 : vector<8x16xf32> to vector<8x16xbf16>
    %c0_65 = arith.constant 0 : index
    %c0_66 = arith.constant 0 : index
    %c0_67 = arith.constant 0 : index
    %c0_68 = arith.constant 0 : index
    %128 = vector.load %arg3[%c0_65, %c0_66, %c0_67, %c0_68] : memref<1x3x16x64xbf16, #tpu.memory_space<vmem>>, vector<1x1x16x64xbf16>
    %129 = vector.shape_cast %128 : vector<1x1x16x64xbf16> to vector<16x64xbf16>
    %cst_69 = arith.constant dense<0.000000e+00> : vector<8x64xf32>
    %130 = tpu.matmul %127, %129, %cst_69 {dimension_numbers = #tpu.dot_dimension_numbers<[1], [0], [0], [1], [0, 0, 1, 1], [], []>} : vector<8x16xbf16>, vector<16x64xbf16>, vector<8x64xf32> -> vector<8x64xf32>
    %131 = arith.addf %126, %130 : vector<8x64xf32>
    %132 = vector.extract_strided_slice %131 {offsets = [0, 0], sizes = [8, 16], strides = [1, 1]} : vector<8x64xf32> to vector<8x16xf32>
    %133 = arith.negf %132 : vector<8x16xf32>
    %134 = math.exp %133 : vector<8x16xf32>
    %cst_70 = arith.constant 1.000000e+00 : f32
    %135 = vector.broadcast %cst_70 : f32 to vector<8x16xf32>
    %136 = arith.addf %135, %134 : vector<8x16xf32>
    %137 = arith.divf %135, %136 : vector<8x16xf32>
    %138 = vector.extract_strided_slice %131 {offsets = [0, 16], sizes = [8, 16], strides = [1, 1]} : vector<8x64xf32> to vector<8x16xf32>
    %139 = arith.negf %138 : vector<8x16xf32>
    %140 = math.exp %139 : vector<8x16xf32>
    %cst_71 = arith.constant 1.000000e+00 : f32
    %141 = vector.broadcast %cst_71 : f32 to vector<8x16xf32>
    %142 = arith.addf %141, %140 : vector<8x16xf32>
    %143 = arith.divf %141, %142 : vector<8x16xf32>
    %144 = vector.extract_strided_slice %131 {offsets = [0, 32], sizes = [8, 16], strides = [1, 1]} : vector<8x64xf32> to vector<8x16xf32>
    %145 = math.tanh %144 : vector<8x16xf32>
    %146 = vector.extract_strided_slice %131 {offsets = [0, 48], sizes = [8, 16], strides = [1, 1]} : vector<8x64xf32> to vector<8x16xf32>
    %147 = arith.negf %146 : vector<8x16xf32>
    %148 = math.exp %147 : vector<8x16xf32>
    %cst_72 = arith.constant 1.000000e+00 : f32
    %149 = vector.broadcast %cst_72 : f32 to vector<8x16xf32>
    %150 = arith.addf %149, %148 : vector<8x16xf32>
    %151 = arith.divf %149, %150 : vector<8x16xf32>
    %152 = arith.mulf %143, %61 : vector<8x16xf32>
    %153 = arith.mulf %137, %145 : vector<8x16xf32>
    %154 = arith.addf %152, %153 : vector<8x16xf32>
    %155 = math.tanh %154 : vector<8x16xf32>
    %156 = arith.mulf %151, %155 : vector<8x16xf32>
    %157 = vector.extract_strided_slice %17 {offsets = [8, 0], sizes = [8, 64], strides = [1, 1]} : vector<64x64xf32> to vector<8x64xf32>
    %158 = arith.truncf %94 : vector<8x16xf32> to vector<8x16xbf16>
    %c0_73 = arith.constant 0 : index
    %c1_74 = arith.constant 1 : index
    %c0_75 = arith.constant 0 : index
    %c0_76 = arith.constant 0 : index
    %159 = vector.load %arg3[%c0_73, %c1_74, %c0_75, %c0_76] : memref<1x3x16x64xbf16, #tpu.memory_space<vmem>>, vector<1x1x16x64xbf16>
    %160 = vector.shape_cast %159 : vector<1x1x16x64xbf16> to vector<16x64xbf16>
    %cst_77 = arith.constant dense<0.000000e+00> : vector<8x64xf32>
    %161 = tpu.matmul %158, %160, %cst_77 {dimension_numbers = #tpu.dot_dimension_numbers<[1], [0], [0], [1], [0, 0, 1, 1], [], []>} : vector<8x16xbf16>, vector<16x64xbf16>, vector<8x64xf32> -> vector<8x64xf32>
    %162 = arith.addf %157, %161 : vector<8x64xf32>
    %163 = vector.extract_strided_slice %162 {offsets = [0, 0], sizes = [8, 16], strides = [1, 1]} : vector<8x64xf32> to vector<8x16xf32>
    %164 = arith.negf %163 : vector<8x16xf32>
    %165 = math.exp %164 : vector<8x16xf32>
    %cst_78 = arith.constant 1.000000e+00 : f32
    %166 = vector.broadcast %cst_78 : f32 to vector<8x16xf32>
    %167 = arith.addf %166, %165 : vector<8x16xf32>
    %168 = arith.divf %166, %167 : vector<8x16xf32>
    %169 = vector.extract_strided_slice %162 {offsets = [0, 16], sizes = [8, 16], strides = [1, 1]} : vector<8x64xf32> to vector<8x16xf32>
    %170 = arith.negf %169 : vector<8x16xf32>
    %171 = math.exp %170 : vector<8x16xf32>
    %cst_79 = arith.constant 1.000000e+00 : f32
    %172 = vector.broadcast %cst_79 : f32 to vector<8x16xf32>
    %173 = arith.addf %172, %171 : vector<8x16xf32>
    %174 = arith.divf %172, %173 : vector<8x16xf32>
    %175 = vector.extract_strided_slice %162 {offsets = [0, 32], sizes = [8, 16], strides = [1, 1]} : vector<8x64xf32> to vector<8x16xf32>
    %176 = math.tanh %175 : vector<8x16xf32>
    %177 = vector.extract_strided_slice %162 {offsets = [0, 48], sizes = [8, 16], strides = [1, 1]} : vector<8x64xf32> to vector<8x16xf32>
    %178 = arith.negf %177 : vector<8x16xf32>
    %179 = math.exp %178 : vector<8x16xf32>
    %cst_80 = arith.constant 1.000000e+00 : f32
    %180 = vector.broadcast %cst_80 : f32 to vector<8x16xf32>
    %181 = arith.addf %180, %179 : vector<8x16xf32>
    %182 = arith.divf %180, %181 : vector<8x16xf32>
    %183 = arith.mulf %174, %92 : vector<8x16xf32>
    %184 = arith.mulf %168, %176 : vector<8x16xf32>
    %185 = arith.addf %183, %184 : vector<8x16xf32>
    %186 = math.tanh %185 : vector<8x16xf32>
    %187 = arith.mulf %182, %186 : vector<8x16xf32>
    %188 = vector.extract_strided_slice %26 {offsets = [8, 0], sizes = [8, 64], strides = [1, 1]} : vector<64x64xf32> to vector<8x64xf32>
    %189 = arith.truncf %125 : vector<8x16xf32> to vector<8x16xbf16>
    %c0_81 = arith.constant 0 : index
    %c2_82 = arith.constant 2 : index
    %c0_83 = arith.constant 0 : index
    %c0_84 = arith.constant 0 : index
    %190 = vector.load %arg3[%c0_81, %c2_82, %c0_83, %c0_84] : memref<1x3x16x64xbf16, #tpu.memory_space<vmem>>, vector<1x1x16x64xbf16>
    %191 = vector.shape_cast %190 : vector<1x1x16x64xbf16> to vector<16x64xbf16>
    %cst_85 = arith.constant dense<0.000000e+00> : vector<8x64xf32>
    %192 = tpu.matmul %189, %191, %cst_85 {dimension_numbers = #tpu.dot_dimension_numbers<[1], [0], [0], [1], [0, 0, 1, 1], [], []>} : vector<8x16xbf16>, vector<16x64xbf16>, vector<8x64xf32> -> vector<8x64xf32>
    %193 = arith.addf %188, %192 : vector<8x64xf32>
    %194 = vector.extract_strided_slice %193 {offsets = [0, 0], sizes = [8, 16], strides = [1, 1]} : vector<8x64xf32> to vector<8x16xf32>
    %195 = arith.negf %194 : vector<8x16xf32>
    %196 = math.exp %195 : vector<8x16xf32>
    %cst_86 = arith.constant 1.000000e+00 : f32
    %197 = vector.broadcast %cst_86 : f32 to vector<8x16xf32>
    %198 = arith.addf %197, %196 : vector<8x16xf32>
    %199 = arith.divf %197, %198 : vector<8x16xf32>
    %200 = vector.extract_strided_slice %193 {offsets = [0, 16], sizes = [8, 16], strides = [1, 1]} : vector<8x64xf32> to vector<8x16xf32>
    %201 = arith.negf %200 : vector<8x16xf32>
    %202 = math.exp %201 : vector<8x16xf32>
    %cst_87 = arith.constant 1.000000e+00 : f32
    %203 = vector.broadcast %cst_87 : f32 to vector<8x16xf32>
    %204 = arith.addf %203, %202 : vector<8x16xf32>
    %205 = arith.divf %203, %204 : vector<8x16xf32>
    %206 = vector.extract_strided_slice %193 {offsets = [0, 32], sizes = [8, 16], strides = [1, 1]} : vector<8x64xf32> to vector<8x16xf32>
    %207 = math.tanh %206 : vector<8x16xf32>
    %208 = vector.extract_strided_slice %193 {offsets = [0, 48], sizes = [8, 16], strides = [1, 1]} : vector<8x64xf32> to vector<8x16xf32>
    %209 = arith.negf %208 : vector<8x16xf32>
    %210 = math.exp %209 : vector<8x16xf32>
    %cst_88 = arith.constant 1.000000e+00 : f32
    %211 = vector.broadcast %cst_88 : f32 to vector<8x16xf32>
    %212 = arith.addf %211, %210 : vector<8x16xf32>
    %213 = arith.divf %211, %212 : vector<8x16xf32>
    %214 = arith.mulf %205, %123 : vector<8x16xf32>
    %215 = arith.mulf %199, %207 : vector<8x16xf32>
    %216 = arith.addf %214, %215 : vector<8x16xf32>
    %217 = math.tanh %216 : vector<8x16xf32>
    %218 = arith.mulf %213, %217 : vector<8x16xf32>
    %219 = vector.extract_strided_slice %8 {offsets = [16, 0], sizes = [8, 64], strides = [1, 1]} : vector<64x64xf32> to vector<8x64xf32>
    %220 = arith.truncf %156 : vector<8x16xf32> to vector<8x16xbf16>
    %c0_89 = arith.constant 0 : index
    %c0_90 = arith.constant 0 : index
    %c0_91 = arith.constant 0 : index
    %c0_92 = arith.constant 0 : index
    %221 = vector.load %arg3[%c0_89, %c0_90, %c0_91, %c0_92] : memref<1x3x16x64xbf16, #tpu.memory_space<vmem>>, vector<1x1x16x64xbf16>
    %222 = vector.shape_cast %221 : vector<1x1x16x64xbf16> to vector<16x64xbf16>
    %cst_93 = arith.constant dense<0.000000e+00> : vector<8x64xf32>
    %223 = tpu.matmul %220, %222, %cst_93 {dimension_numbers = #tpu.dot_dimension_numbers<[1], [0], [0], [1], [0, 0, 1, 1], [], []>} : vector<8x16xbf16>, vector<16x64xbf16>, vector<8x64xf32> -> vector<8x64xf32>
    %224 = arith.addf %219, %223 : vector<8x64xf32>
    %225 = vector.extract_strided_slice %224 {offsets = [0, 0], sizes = [8, 16], strides = [1, 1]} : vector<8x64xf32> to vector<8x16xf32>
    %226 = arith.negf %225 : vector<8x16xf32>
    %227 = math.exp %226 : vector<8x16xf32>
    %cst_94 = arith.constant 1.000000e+00 : f32
    %228 = vector.broadcast %cst_94 : f32 to vector<8x16xf32>
    %229 = arith.addf %228, %227 : vector<8x16xf32>
    %230 = arith.divf %228, %229 : vector<8x16xf32>
    %231 = vector.extract_strided_slice %224 {offsets = [0, 16], sizes = [8, 16], strides = [1, 1]} : vector<8x64xf32> to vector<8x16xf32>
    %232 = arith.negf %231 : vector<8x16xf32>
    %233 = math.exp %232 : vector<8x16xf32>
    %cst_95 = arith.constant 1.000000e+00 : f32
    %234 = vector.broadcast %cst_95 : f32 to vector<8x16xf32>
    %235 = arith.addf %234, %233 : vector<8x16xf32>
    %236 = arith.divf %234, %235 : vector<8x16xf32>
    %237 = vector.extract_strided_slice %224 {offsets = [0, 32], sizes = [8, 16], strides = [1, 1]} : vector<8x64xf32> to vector<8x16xf32>
    %238 = math.tanh %237 : vector<8x16xf32>
    %239 = vector.extract_strided_slice %224 {offsets = [0, 48], sizes = [8, 16], strides = [1, 1]} : vector<8x64xf32> to vector<8x16xf32>
    %240 = arith.negf %239 : vector<8x16xf32>
    %241 = math.exp %240 : vector<8x16xf32>
    %cst_96 = arith.constant 1.000000e+00 : f32
    %242 = vector.broadcast %cst_96 : f32 to vector<8x16xf32>
    %243 = arith.addf %242, %241 : vector<8x16xf32>
    %244 = arith.divf %242, %243 : vector<8x16xf32>
    %245 = arith.mulf %236, %154 : vector<8x16xf32>
    %246 = arith.mulf %230, %238 : vector<8x16xf32>
    %247 = arith.addf %245, %246 : vector<8x16xf32>
    %248 = math.tanh %247 : vector<8x16xf32>
    %249 = arith.mulf %244, %248 : vector<8x16xf32>
    %250 = vector.extract_strided_slice %17 {offsets = [16, 0], sizes = [8, 64], strides = [1, 1]} : vector<64x64xf32> to vector<8x64xf32>
    %251 = arith.truncf %187 : vector<8x16xf32> to vector<8x16xbf16>
    %c0_97 = arith.constant 0 : index
    %c1_98 = arith.constant 1 : index
    %c0_99 = arith.constant 0 : index
    %c0_100 = arith.constant 0 : index
    %252 = vector.load %arg3[%c0_97, %c1_98, %c0_99, %c0_100] : memref<1x3x16x64xbf16, #tpu.memory_space<vmem>>, vector<1x1x16x64xbf16>
    %253 = vector.shape_cast %252 : vector<1x1x16x64xbf16> to vector<16x64xbf16>
    %cst_101 = arith.constant dense<0.000000e+00> : vector<8x64xf32>
    %254 = tpu.matmul %251, %253, %cst_101 {dimension_numbers = #tpu.dot_dimension_numbers<[1], [0], [0], [1], [0, 0, 1, 1], [], []>} : vector<8x16xbf16>, vector<16x64xbf16>, vector<8x64xf32> -> vector<8x64xf32>
    %255 = arith.addf %250, %254 : vector<8x64xf32>
    %256 = vector.extract_strided_slice %255 {offsets = [0, 0], sizes = [8, 16], strides = [1, 1]} : vector<8x64xf32> to vector<8x16xf32>
    %257 = arith.negf %256 : vector<8x16xf32>
    %258 = math.exp %257 : vector<8x16xf32>
    %cst_102 = arith.constant 1.000000e+00 : f32
    %259 = vector.broadcast %cst_102 : f32 to vector<8x16xf32>
    %260 = arith.addf %259, %258 : vector<8x16xf32>
    %261 = arith.divf %259, %260 : vector<8x16xf32>
    %262 = vector.extract_strided_slice %255 {offsets = [0, 16], sizes = [8, 16], strides = [1, 1]} : vector<8x64xf32> to vector<8x16xf32>
    %263 = arith.negf %262 : vector<8x16xf32>
    %264 = math.exp %263 : vector<8x16xf32>
    %cst_103 = arith.constant 1.000000e+00 : f32
    %265 = vector.broadcast %cst_103 : f32 to vector<8x16xf32>
    %266 = arith.addf %265, %264 : vector<8x16xf32>
    %267 = arith.divf %265, %266 : vector<8x16xf32>
    %268 = vector.extract_strided_slice %255 {offsets = [0, 32], sizes = [8, 16], strides = [1, 1]} : vector<8x64xf32> to vector<8x16xf32>
    %269 = math.tanh %268 : vector<8x16xf32>
    %270 = vector.extract_strided_slice %255 {offsets = [0, 48], sizes = [8, 16], strides = [1, 1]} : vector<8x64xf32> to vector<8x16xf32>
    %271 = arith.negf %270 : vector<8x16xf32>
    %272 = math.exp %271 : vector<8x16xf32>
    %cst_104 = arith.constant 1.000000e+00 : f32
    %273 = vector.broadcast %cst_104 : f32 to vector<8x16xf32>
    %274 = arith.addf %273, %272 : vector<8x16xf32>
    %275 = arith.divf %273, %274 : vector<8x16xf32>
    %276 = arith.mulf %267, %185 : vector<8x16xf32>
    %277 = arith.mulf %261, %269 : vector<8x16xf32>
    %278 = arith.addf %276, %277 : vector<8x16xf32>
    %279 = math.tanh %278 : vector<8x16xf32>
    %280 = arith.mulf %275, %279 : vector<8x16xf32>
    %281 = vector.extract_strided_slice %26 {offsets = [16, 0], sizes = [8, 64], strides = [1, 1]} : vector<64x64xf32> to vector<8x64xf32>
    %282 = arith.truncf %218 : vector<8x16xf32> to vector<8x16xbf16>
    %c0_105 = arith.constant 0 : index
    %c2_106 = arith.constant 2 : index
    %c0_107 = arith.constant 0 : index
    %c0_108 = arith.constant 0 : index
    %283 = vector.load %arg3[%c0_105, %c2_106, %c0_107, %c0_108] : memref<1x3x16x64xbf16, #tpu.memory_space<vmem>>, vector<1x1x16x64xbf16>
    %284 = vector.shape_cast %283 : vector<1x1x16x64xbf16> to vector<16x64xbf16>
    %cst_109 = arith.constant dense<0.000000e+00> : vector<8x64xf32>
    %285 = tpu.matmul %282, %284, %cst_109 {dimension_numbers = #tpu.dot_dimension_numbers<[1], [0], [0], [1], [0, 0, 1, 1], [], []>} : vector<8x16xbf16>, vector<16x64xbf16>, vector<8x64xf32> -> vector<8x64xf32>
    %286 = arith.addf %281, %285 : vector<8x64xf32>
    %287 = vector.extract_strided_slice %286 {offsets = [0, 0], sizes = [8, 16], strides = [1, 1]} : vector<8x64xf32> to vector<8x16xf32>
    %288 = arith.negf %287 : vector<8x16xf32>
    %289 = math.exp %288 : vector<8x16xf32>
    %cst_110 = arith.constant 1.000000e+00 : f32
    %290 = vector.broadcast %cst_110 : f32 to vector<8x16xf32>
    %291 = arith.addf %290, %289 : vector<8x16xf32>
    %292 = arith.divf %290, %291 : vector<8x16xf32>
    %293 = vector.extract_strided_slice %286 {offsets = [0, 16], sizes = [8, 16], strides = [1, 1]} : vector<8x64xf32> to vector<8x16xf32>
    %294 = arith.negf %293 : vector<8x16xf32>
    %295 = math.exp %294 : vector<8x16xf32>
    %cst_111 = arith.constant 1.000000e+00 : f32
    %296 = vector.broadcast %cst_111 : f32 to vector<8x16xf32>
    %297 = arith.addf %296, %295 : vector<8x16xf32>
    %298 = arith.divf %296, %297 : vector<8x16xf32>
    %299 = vector.extract_strided_slice %286 {offsets = [0, 32], sizes = [8, 16], strides = [1, 1]} : vector<8x64xf32> to vector<8x16xf32>
    %300 = math.tanh %299 : vector<8x16xf32>
    %301 = vector.extract_strided_slice %286 {offsets = [0, 48], sizes = [8, 16], strides = [1, 1]} : vector<8x64xf32> to vector<8x16xf32>
    %302 = arith.negf %301 : vector<8x16xf32>
    %303 = math.exp %302 : vector<8x16xf32>
    %cst_112 = arith.constant 1.000000e+00 : f32
    %304 = vector.broadcast %cst_112 : f32 to vector<8x16xf32>
    %305 = arith.addf %304, %303 : vector<8x16xf32>
    %306 = arith.divf %304, %305 : vector<8x16xf32>
    %307 = arith.mulf %298, %216 : vector<8x16xf32>
    %308 = arith.mulf %292, %300 : vector<8x16xf32>
    %309 = arith.addf %307, %308 : vector<8x16xf32>
    %310 = math.tanh %309 : vector<8x16xf32>
    %311 = arith.mulf %306, %310 : vector<8x16xf32>
    %312 = vector.extract_strided_slice %8 {offsets = [24, 0], sizes = [8, 64], strides = [1, 1]} : vector<64x64xf32> to vector<8x64xf32>
    %313 = arith.truncf %249 : vector<8x16xf32> to vector<8x16xbf16>
    %c0_113 = arith.constant 0 : index
    %c0_114 = arith.constant 0 : index
    %c0_115 = arith.constant 0 : index
    %c0_116 = arith.constant 0 : index
    %314 = vector.load %arg3[%c0_113, %c0_114, %c0_115, %c0_116] : memref<1x3x16x64xbf16, #tpu.memory_space<vmem>>, vector<1x1x16x64xbf16>
    %315 = vector.shape_cast %314 : vector<1x1x16x64xbf16> to vector<16x64xbf16>
    %cst_117 = arith.constant dense<0.000000e+00> : vector<8x64xf32>
    %316 = tpu.matmul %313, %315, %cst_117 {dimension_numbers = #tpu.dot_dimension_numbers<[1], [0], [0], [1], [0, 0, 1, 1], [], []>} : vector<8x16xbf16>, vector<16x64xbf16>, vector<8x64xf32> -> vector<8x64xf32>
    %317 = arith.addf %312, %316 : vector<8x64xf32>
    %318 = vector.extract_strided_slice %317 {offsets = [0, 0], sizes = [8, 16], strides = [1, 1]} : vector<8x64xf32> to vector<8x16xf32>
    %319 = arith.negf %318 : vector<8x16xf32>
    %320 = math.exp %319 : vector<8x16xf32>
    %cst_118 = arith.constant 1.000000e+00 : f32
    %321 = vector.broadcast %cst_118 : f32 to vector<8x16xf32>
    %322 = arith.addf %321, %320 : vector<8x16xf32>
    %323 = arith.divf %321, %322 : vector<8x16xf32>
    %324 = vector.extract_strided_slice %317 {offsets = [0, 16], sizes = [8, 16], strides = [1, 1]} : vector<8x64xf32> to vector<8x16xf32>
    %325 = arith.negf %324 : vector<8x16xf32>
    %326 = math.exp %325 : vector<8x16xf32>
    %cst_119 = arith.constant 1.000000e+00 : f32
    %327 = vector.broadcast %cst_119 : f32 to vector<8x16xf32>
    %328 = arith.addf %327, %326 : vector<8x16xf32>
    %329 = arith.divf %327, %328 : vector<8x16xf32>
    %330 = vector.extract_strided_slice %317 {offsets = [0, 32], sizes = [8, 16], strides = [1, 1]} : vector<8x64xf32> to vector<8x16xf32>
    %331 = math.tanh %330 : vector<8x16xf32>
    %332 = vector.extract_strided_slice %317 {offsets = [0, 48], sizes = [8, 16], strides = [1, 1]} : vector<8x64xf32> to vector<8x16xf32>
    %333 = arith.negf %332 : vector<8x16xf32>
    %334 = math.exp %333 : vector<8x16xf32>
    %cst_120 = arith.constant 1.000000e+00 : f32
    %335 = vector.broadcast %cst_120 : f32 to vector<8x16xf32>
    %336 = arith.addf %335, %334 : vector<8x16xf32>
    %337 = arith.divf %335, %336 : vector<8x16xf32>
    %338 = arith.mulf %329, %247 : vector<8x16xf32>
    %339 = arith.mulf %323, %331 : vector<8x16xf32>
    %340 = arith.addf %338, %339 : vector<8x16xf32>
    %341 = math.tanh %340 : vector<8x16xf32>
    %342 = arith.mulf %337, %341 : vector<8x16xf32>
    %343 = vector.extract_strided_slice %17 {offsets = [24, 0], sizes = [8, 64], strides = [1, 1]} : vector<64x64xf32> to vector<8x64xf32>
    %344 = arith.truncf %280 : vector<8x16xf32> to vector<8x16xbf16>
    %c0_121 = arith.constant 0 : index
    %c1_122 = arith.constant 1 : index
    %c0_123 = arith.constant 0 : index
    %c0_124 = arith.constant 0 : index
    %345 = vector.load %arg3[%c0_121, %c1_122, %c0_123, %c0_124] : memref<1x3x16x64xbf16, #tpu.memory_space<vmem>>, vector<1x1x16x64xbf16>
    %346 = vector.shape_cast %345 : vector<1x1x16x64xbf16> to vector<16x64xbf16>
    %cst_125 = arith.constant dense<0.000000e+00> : vector<8x64xf32>
    %347 = tpu.matmul %344, %346, %cst_125 {dimension_numbers = #tpu.dot_dimension_numbers<[1], [0], [0], [1], [0, 0, 1, 1], [], []>} : vector<8x16xbf16>, vector<16x64xbf16>, vector<8x64xf32> -> vector<8x64xf32>
    %348 = arith.addf %343, %347 : vector<8x64xf32>
    %349 = vector.extract_strided_slice %348 {offsets = [0, 0], sizes = [8, 16], strides = [1, 1]} : vector<8x64xf32> to vector<8x16xf32>
    %350 = arith.negf %349 : vector<8x16xf32>
    %351 = math.exp %350 : vector<8x16xf32>
    %cst_126 = arith.constant 1.000000e+00 : f32
    %352 = vector.broadcast %cst_126 : f32 to vector<8x16xf32>
    %353 = arith.addf %352, %351 : vector<8x16xf32>
    %354 = arith.divf %352, %353 : vector<8x16xf32>
    %355 = vector.extract_strided_slice %348 {offsets = [0, 16], sizes = [8, 16], strides = [1, 1]} : vector<8x64xf32> to vector<8x16xf32>
    %356 = arith.negf %355 : vector<8x16xf32>
    %357 = math.exp %356 : vector<8x16xf32>
    %cst_127 = arith.constant 1.000000e+00 : f32
    %358 = vector.broadcast %cst_127 : f32 to vector<8x16xf32>
    %359 = arith.addf %358, %357 : vector<8x16xf32>
    %360 = arith.divf %358, %359 : vector<8x16xf32>
    %361 = vector.extract_strided_slice %348 {offsets = [0, 32], sizes = [8, 16], strides = [1, 1]} : vector<8x64xf32> to vector<8x16xf32>
    %362 = math.tanh %361 : vector<8x16xf32>
    %363 = vector.extract_strided_slice %348 {offsets = [0, 48], sizes = [8, 16], strides = [1, 1]} : vector<8x64xf32> to vector<8x16xf32>
    %364 = arith.negf %363 : vector<8x16xf32>
    %365 = math.exp %364 : vector<8x16xf32>
    %cst_128 = arith.constant 1.000000e+00 : f32
    %366 = vector.broadcast %cst_128 : f32 to vector<8x16xf32>
    %367 = arith.addf %366, %365 : vector<8x16xf32>
    %368 = arith.divf %366, %367 : vector<8x16xf32>
    %369 = arith.mulf %360, %278 : vector<8x16xf32>
    %370 = arith.mulf %354, %362 : vector<8x16xf32>
    %371 = arith.addf %369, %370 : vector<8x16xf32>
    %372 = math.tanh %371 : vector<8x16xf32>
    %373 = arith.mulf %368, %372 : vector<8x16xf32>
    %374 = vector.extract_strided_slice %26 {offsets = [24, 0], sizes = [8, 64], strides = [1, 1]} : vector<64x64xf32> to vector<8x64xf32>
    %375 = arith.truncf %311 : vector<8x16xf32> to vector<8x16xbf16>
    %c0_129 = arith.constant 0 : index
    %c2_130 = arith.constant 2 : index
    %c0_131 = arith.constant 0 : index
    %c0_132 = arith.constant 0 : index
    %376 = vector.load %arg3[%c0_129, %c2_130, %c0_131, %c0_132] : memref<1x3x16x64xbf16, #tpu.memory_space<vmem>>, vector<1x1x16x64xbf16>
    %377 = vector.shape_cast %376 : vector<1x1x16x64xbf16> to vector<16x64xbf16>
    %cst_133 = arith.constant dense<0.000000e+00> : vector<8x64xf32>
    %378 = tpu.matmul %375, %377, %cst_133 {dimension_numbers = #tpu.dot_dimension_numbers<[1], [0], [0], [1], [0, 0, 1, 1], [], []>} : vector<8x16xbf16>, vector<16x64xbf16>, vector<8x64xf32> -> vector<8x64xf32>
    %379 = arith.addf %374, %378 : vector<8x64xf32>
    %380 = vector.extract_strided_slice %379 {offsets = [0, 0], sizes = [8, 16], strides = [1, 1]} : vector<8x64xf32> to vector<8x16xf32>
    %381 = arith.negf %380 : vector<8x16xf32>
    %382 = math.exp %381 : vector<8x16xf32>
    %cst_134 = arith.constant 1.000000e+00 : f32
    %383 = vector.broadcast %cst_134 : f32 to vector<8x16xf32>
    %384 = arith.addf %383, %382 : vector<8x16xf32>
    %385 = arith.divf %383, %384 : vector<8x16xf32>
    %386 = vector.extract_strided_slice %379 {offsets = [0, 16], sizes = [8, 16], strides = [1, 1]} : vector<8x64xf32> to vector<8x16xf32>
    %387 = arith.negf %386 : vector<8x16xf32>
    %388 = math.exp %387 : vector<8x16xf32>
    %cst_135 = arith.constant 1.000000e+00 : f32
    %389 = vector.broadcast %cst_135 : f32 to vector<8x16xf32>
    %390 = arith.addf %389, %388 : vector<8x16xf32>
    %391 = arith.divf %389, %390 : vector<8x16xf32>
    %392 = vector.extract_strided_slice %379 {offsets = [0, 32], sizes = [8, 16], strides = [1, 1]} : vector<8x64xf32> to vector<8x16xf32>
    %393 = math.tanh %392 : vector<8x16xf32>
    %394 = vector.extract_strided_slice %379 {offsets = [0, 48], sizes = [8, 16], strides = [1, 1]} : vector<8x64xf32> to vector<8x16xf32>
    %395 = arith.negf %394 : vector<8x16xf32>
    %396 = math.exp %395 : vector<8x16xf32>
    %cst_136 = arith.constant 1.000000e+00 : f32
    %397 = vector.broadcast %cst_136 : f32 to vector<8x16xf32>
    %398 = arith.addf %397, %396 : vector<8x16xf32>
    %399 = arith.divf %397, %398 : vector<8x16xf32>
    %400 = arith.mulf %391, %309 : vector<8x16xf32>
    %401 = arith.mulf %385, %393 : vector<8x16xf32>
    %402 = arith.addf %400, %401 : vector<8x16xf32>
    %403 = math.tanh %402 : vector<8x16xf32>
    %404 = arith.mulf %399, %403 : vector<8x16xf32>
    %405 = vector.extract_strided_slice %8 {offsets = [32, 0], sizes = [8, 64], strides = [1, 1]} : vector<64x64xf32> to vector<8x64xf32>
    %406 = arith.truncf %342 : vector<8x16xf32> to vector<8x16xbf16>
    %c0_137 = arith.constant 0 : index
    %c0_138 = arith.constant 0 : index
    %c0_139 = arith.constant 0 : index
    %c0_140 = arith.constant 0 : index
    %407 = vector.load %arg3[%c0_137, %c0_138, %c0_139, %c0_140] : memref<1x3x16x64xbf16, #tpu.memory_space<vmem>>, vector<1x1x16x64xbf16>
    %408 = vector.shape_cast %407 : vector<1x1x16x64xbf16> to vector<16x64xbf16>
    %cst_141 = arith.constant dense<0.000000e+00> : vector<8x64xf32>
    %409 = tpu.matmul %406, %408, %cst_141 {dimension_numbers = #tpu.dot_dimension_numbers<[1], [0], [0], [1], [0, 0, 1, 1], [], []>} : vector<8x16xbf16>, vector<16x64xbf16>, vector<8x64xf32> -> vector<8x64xf32>
    %410 = arith.addf %405, %409 : vector<8x64xf32>
    %411 = vector.extract_strided_slice %410 {offsets = [0, 0], sizes = [8, 16], strides = [1, 1]} : vector<8x64xf32> to vector<8x16xf32>
    %412 = arith.negf %411 : vector<8x16xf32>
    %413 = math.exp %412 : vector<8x16xf32>
    %cst_142 = arith.constant 1.000000e+00 : f32
    %414 = vector.broadcast %cst_142 : f32 to vector<8x16xf32>
    %415 = arith.addf %414, %413 : vector<8x16xf32>
    %416 = arith.divf %414, %415 : vector<8x16xf32>
    %417 = vector.extract_strided_slice %410 {offsets = [0, 16], sizes = [8, 16], strides = [1, 1]} : vector<8x64xf32> to vector<8x16xf32>
    %418 = arith.negf %417 : vector<8x16xf32>
    %419 = math.exp %418 : vector<8x16xf32>
    %cst_143 = arith.constant 1.000000e+00 : f32
    %420 = vector.broadcast %cst_143 : f32 to vector<8x16xf32>
    %421 = arith.addf %420, %419 : vector<8x16xf32>
    %422 = arith.divf %420, %421 : vector<8x16xf32>
    %423 = vector.extract_strided_slice %410 {offsets = [0, 32], sizes = [8, 16], strides = [1, 1]} : vector<8x64xf32> to vector<8x16xf32>
    %424 = math.tanh %423 : vector<8x16xf32>
    %425 = vector.extract_strided_slice %410 {offsets = [0, 48], sizes = [8, 16], strides = [1, 1]} : vector<8x64xf32> to vector<8x16xf32>
    %426 = arith.negf %425 : vector<8x16xf32>
    %427 = math.exp %426 : vector<8x16xf32>
    %cst_144 = arith.constant 1.000000e+00 : f32
    %428 = vector.broadcast %cst_144 : f32 to vector<8x16xf32>
    %429 = arith.addf %428, %427 : vector<8x16xf32>
    %430 = arith.divf %428, %429 : vector<8x16xf32>
    %431 = arith.mulf %422, %340 : vector<8x16xf32>
    %432 = arith.mulf %416, %424 : vector<8x16xf32>
    %433 = arith.addf %431, %432 : vector<8x16xf32>
    %434 = math.tanh %433 : vector<8x16xf32>
    %435 = arith.mulf %430, %434 : vector<8x16xf32>
    %436 = vector.extract_strided_slice %17 {offsets = [32, 0], sizes = [8, 64], strides = [1, 1]} : vector<64x64xf32> to vector<8x64xf32>
    %437 = arith.truncf %373 : vector<8x16xf32> to vector<8x16xbf16>
    %c0_145 = arith.constant 0 : index
    %c1_146 = arith.constant 1 : index
    %c0_147 = arith.constant 0 : index
    %c0_148 = arith.constant 0 : index
    %438 = vector.load %arg3[%c0_145, %c1_146, %c0_147, %c0_148] : memref<1x3x16x64xbf16, #tpu.memory_space<vmem>>, vector<1x1x16x64xbf16>
    %439 = vector.shape_cast %438 : vector<1x1x16x64xbf16> to vector<16x64xbf16>
    %cst_149 = arith.constant dense<0.000000e+00> : vector<8x64xf32>
    %440 = tpu.matmul %437, %439, %cst_149 {dimension_numbers = #tpu.dot_dimension_numbers<[1], [0], [0], [1], [0, 0, 1, 1], [], []>} : vector<8x16xbf16>, vector<16x64xbf16>, vector<8x64xf32> -> vector<8x64xf32>
    %441 = arith.addf %436, %440 : vector<8x64xf32>
    %442 = vector.extract_strided_slice %441 {offsets = [0, 0], sizes = [8, 16], strides = [1, 1]} : vector<8x64xf32> to vector<8x16xf32>
    %443 = arith.negf %442 : vector<8x16xf32>
    %444 = math.exp %443 : vector<8x16xf32>
    %cst_150 = arith.constant 1.000000e+00 : f32
    %445 = vector.broadcast %cst_150 : f32 to vector<8x16xf32>
    %446 = arith.addf %445, %444 : vector<8x16xf32>
    %447 = arith.divf %445, %446 : vector<8x16xf32>
    %448 = vector.extract_strided_slice %441 {offsets = [0, 16], sizes = [8, 16], strides = [1, 1]} : vector<8x64xf32> to vector<8x16xf32>
    %449 = arith.negf %448 : vector<8x16xf32>
    %450 = math.exp %449 : vector<8x16xf32>
    %cst_151 = arith.constant 1.000000e+00 : f32
    %451 = vector.broadcast %cst_151 : f32 to vector<8x16xf32>
    %452 = arith.addf %451, %450 : vector<8x16xf32>
    %453 = arith.divf %451, %452 : vector<8x16xf32>
    %454 = vector.extract_strided_slice %441 {offsets = [0, 32], sizes = [8, 16], strides = [1, 1]} : vector<8x64xf32> to vector<8x16xf32>
    %455 = math.tanh %454 : vector<8x16xf32>
    %456 = vector.extract_strided_slice %441 {offsets = [0, 48], sizes = [8, 16], strides = [1, 1]} : vector<8x64xf32> to vector<8x16xf32>
    %457 = arith.negf %456 : vector<8x16xf32>
    %458 = math.exp %457 : vector<8x16xf32>
    %cst_152 = arith.constant 1.000000e+00 : f32
    %459 = vector.broadcast %cst_152 : f32 to vector<8x16xf32>
    %460 = arith.addf %459, %458 : vector<8x16xf32>
    %461 = arith.divf %459, %460 : vector<8x16xf32>
    %462 = arith.mulf %453, %371 : vector<8x16xf32>
    %463 = arith.mulf %447, %455 : vector<8x16xf32>
    %464 = arith.addf %462, %463 : vector<8x16xf32>
    %465 = math.tanh %464 : vector<8x16xf32>
    %466 = arith.mulf %461, %465 : vector<8x16xf32>
    %467 = vector.extract_strided_slice %26 {offsets = [32, 0], sizes = [8, 64], strides = [1, 1]} : vector<64x64xf32> to vector<8x64xf32>
    %468 = arith.truncf %404 : vector<8x16xf32> to vector<8x16xbf16>
    %c0_153 = arith.constant 0 : index
    %c2_154 = arith.constant 2 : index
    %c0_155 = arith.constant 0 : index
    %c0_156 = arith.constant 0 : index
    %469 = vector.load %arg3[%c0_153, %c2_154, %c0_155, %c0_156] : memref<1x3x16x64xbf16, #tpu.memory_space<vmem>>, vector<1x1x16x64xbf16>
    %470 = vector.shape_cast %469 : vector<1x1x16x64xbf16> to vector<16x64xbf16>
    %cst_157 = arith.constant dense<0.000000e+00> : vector<8x64xf32>
    %471 = tpu.matmul %468, %470, %cst_157 {dimension_numbers = #tpu.dot_dimension_numbers<[1], [0], [0], [1], [0, 0, 1, 1], [], []>} : vector<8x16xbf16>, vector<16x64xbf16>, vector<8x64xf32> -> vector<8x64xf32>
    %472 = arith.addf %467, %471 : vector<8x64xf32>
    %473 = vector.extract_strided_slice %472 {offsets = [0, 0], sizes = [8, 16], strides = [1, 1]} : vector<8x64xf32> to vector<8x16xf32>
    %474 = arith.negf %473 : vector<8x16xf32>
    %475 = math.exp %474 : vector<8x16xf32>
    %cst_158 = arith.constant 1.000000e+00 : f32
    %476 = vector.broadcast %cst_158 : f32 to vector<8x16xf32>
    %477 = arith.addf %476, %475 : vector<8x16xf32>
    %478 = arith.divf %476, %477 : vector<8x16xf32>
    %479 = vector.extract_strided_slice %472 {offsets = [0, 16], sizes = [8, 16], strides = [1, 1]} : vector<8x64xf32> to vector<8x16xf32>
    %480 = arith.negf %479 : vector<8x16xf32>
    %481 = math.exp %480 : vector<8x16xf32>
    %cst_159 = arith.constant 1.000000e+00 : f32
    %482 = vector.broadcast %cst_159 : f32 to vector<8x16xf32>
    %483 = arith.addf %482, %481 : vector<8x16xf32>
    %484 = arith.divf %482, %483 : vector<8x16xf32>
    %485 = vector.extract_strided_slice %472 {offsets = [0, 32], sizes = [8, 16], strides = [1, 1]} : vector<8x64xf32> to vector<8x16xf32>
    %486 = math.tanh %485 : vector<8x16xf32>
    %487 = vector.extract_strided_slice %472 {offsets = [0, 48], sizes = [8, 16], strides = [1, 1]} : vector<8x64xf32> to vector<8x16xf32>
    %488 = arith.negf %487 : vector<8x16xf32>
    %489 = math.exp %488 : vector<8x16xf32>
    %cst_160 = arith.constant 1.000000e+00 : f32
    %490 = vector.broadcast %cst_160 : f32 to vector<8x16xf32>
    %491 = arith.addf %490, %489 : vector<8x16xf32>
    %492 = arith.divf %490, %491 : vector<8x16xf32>
    %493 = arith.mulf %484, %402 : vector<8x16xf32>
    %494 = arith.mulf %478, %486 : vector<8x16xf32>
    %495 = arith.addf %493, %494 : vector<8x16xf32>
    %496 = math.tanh %495 : vector<8x16xf32>
    %497 = arith.mulf %492, %496 : vector<8x16xf32>
    %498 = vector.extract_strided_slice %8 {offsets = [40, 0], sizes = [8, 64], strides = [1, 1]} : vector<64x64xf32> to vector<8x64xf32>
    %499 = arith.truncf %435 : vector<8x16xf32> to vector<8x16xbf16>
    %c0_161 = arith.constant 0 : index
    %c0_162 = arith.constant 0 : index
    %c0_163 = arith.constant 0 : index
    %c0_164 = arith.constant 0 : index
    %500 = vector.load %arg3[%c0_161, %c0_162, %c0_163, %c0_164] : memref<1x3x16x64xbf16, #tpu.memory_space<vmem>>, vector<1x1x16x64xbf16>
    %501 = vector.shape_cast %500 : vector<1x1x16x64xbf16> to vector<16x64xbf16>
    %cst_165 = arith.constant dense<0.000000e+00> : vector<8x64xf32>
    %502 = tpu.matmul %499, %501, %cst_165 {dimension_numbers = #tpu.dot_dimension_numbers<[1], [0], [0], [1], [0, 0, 1, 1], [], []>} : vector<8x16xbf16>, vector<16x64xbf16>, vector<8x64xf32> -> vector<8x64xf32>
    %503 = arith.addf %498, %502 : vector<8x64xf32>
    %504 = vector.extract_strided_slice %503 {offsets = [0, 0], sizes = [8, 16], strides = [1, 1]} : vector<8x64xf32> to vector<8x16xf32>
    %505 = arith.negf %504 : vector<8x16xf32>
    %506 = math.exp %505 : vector<8x16xf32>
    %cst_166 = arith.constant 1.000000e+00 : f32
    %507 = vector.broadcast %cst_166 : f32 to vector<8x16xf32>
    %508 = arith.addf %507, %506 : vector<8x16xf32>
    %509 = arith.divf %507, %508 : vector<8x16xf32>
    %510 = vector.extract_strided_slice %503 {offsets = [0, 16], sizes = [8, 16], strides = [1, 1]} : vector<8x64xf32> to vector<8x16xf32>
    %511 = arith.negf %510 : vector<8x16xf32>
    %512 = math.exp %511 : vector<8x16xf32>
    %cst_167 = arith.constant 1.000000e+00 : f32
    %513 = vector.broadcast %cst_167 : f32 to vector<8x16xf32>
    %514 = arith.addf %513, %512 : vector<8x16xf32>
    %515 = arith.divf %513, %514 : vector<8x16xf32>
    %516 = vector.extract_strided_slice %503 {offsets = [0, 32], sizes = [8, 16], strides = [1, 1]} : vector<8x64xf32> to vector<8x16xf32>
    %517 = math.tanh %516 : vector<8x16xf32>
    %518 = vector.extract_strided_slice %503 {offsets = [0, 48], sizes = [8, 16], strides = [1, 1]} : vector<8x64xf32> to vector<8x16xf32>
    %519 = arith.negf %518 : vector<8x16xf32>
    %520 = math.exp %519 : vector<8x16xf32>
    %cst_168 = arith.constant 1.000000e+00 : f32
    %521 = vector.broadcast %cst_168 : f32 to vector<8x16xf32>
    %522 = arith.addf %521, %520 : vector<8x16xf32>
    %523 = arith.divf %521, %522 : vector<8x16xf32>
    %524 = arith.mulf %515, %433 : vector<8x16xf32>
    %525 = arith.mulf %509, %517 : vector<8x16xf32>
    %526 = arith.addf %524, %525 : vector<8x16xf32>
    %527 = math.tanh %526 : vector<8x16xf32>
    %528 = arith.mulf %523, %527 : vector<8x16xf32>
    %529 = vector.extract_strided_slice %17 {offsets = [40, 0], sizes = [8, 64], strides = [1, 1]} : vector<64x64xf32> to vector<8x64xf32>
    %530 = arith.truncf %466 : vector<8x16xf32> to vector<8x16xbf16>
    %c0_169 = arith.constant 0 : index
    %c1_170 = arith.constant 1 : index
    %c0_171 = arith.constant 0 : index
    %c0_172 = arith.constant 0 : index
    %531 = vector.load %arg3[%c0_169, %c1_170, %c0_171, %c0_172] : memref<1x3x16x64xbf16, #tpu.memory_space<vmem>>, vector<1x1x16x64xbf16>
    %532 = vector.shape_cast %531 : vector<1x1x16x64xbf16> to vector<16x64xbf16>
    %cst_173 = arith.constant dense<0.000000e+00> : vector<8x64xf32>
    %533 = tpu.matmul %530, %532, %cst_173 {dimension_numbers = #tpu.dot_dimension_numbers<[1], [0], [0], [1], [0, 0, 1, 1], [], []>} : vector<8x16xbf16>, vector<16x64xbf16>, vector<8x64xf32> -> vector<8x64xf32>
    %534 = arith.addf %529, %533 : vector<8x64xf32>
    %535 = vector.extract_strided_slice %534 {offsets = [0, 0], sizes = [8, 16], strides = [1, 1]} : vector<8x64xf32> to vector<8x16xf32>
    %536 = arith.negf %535 : vector<8x16xf32>
    %537 = math.exp %536 : vector<8x16xf32>
    %cst_174 = arith.constant 1.000000e+00 : f32
    %538 = vector.broadcast %cst_174 : f32 to vector<8x16xf32>
    %539 = arith.addf %538, %537 : vector<8x16xf32>
    %540 = arith.divf %538, %539 : vector<8x16xf32>
    %541 = vector.extract_strided_slice %534 {offsets = [0, 16], sizes = [8, 16], strides = [1, 1]} : vector<8x64xf32> to vector<8x16xf32>
    %542 = arith.negf %541 : vector<8x16xf32>
    %543 = math.exp %542 : vector<8x16xf32>
    %cst_175 = arith.constant 1.000000e+00 : f32
    %544 = vector.broadcast %cst_175 : f32 to vector<8x16xf32>
    %545 = arith.addf %544, %543 : vector<8x16xf32>
    %546 = arith.divf %544, %545 : vector<8x16xf32>
    %547 = vector.extract_strided_slice %534 {offsets = [0, 32], sizes = [8, 16], strides = [1, 1]} : vector<8x64xf32> to vector<8x16xf32>
    %548 = math.tanh %547 : vector<8x16xf32>
    %549 = vector.extract_strided_slice %534 {offsets = [0, 48], sizes = [8, 16], strides = [1, 1]} : vector<8x64xf32> to vector<8x16xf32>
    %550 = arith.negf %549 : vector<8x16xf32>
    %551 = math.exp %550 : vector<8x16xf32>
    %cst_176 = arith.constant 1.000000e+00 : f32
    %552 = vector.broadcast %cst_176 : f32 to vector<8x16xf32>
    %553 = arith.addf %552, %551 : vector<8x16xf32>
    %554 = arith.divf %552, %553 : vector<8x16xf32>
    %555 = arith.mulf %546, %464 : vector<8x16xf32>
    %556 = arith.mulf %540, %548 : vector<8x16xf32>
    %557 = arith.addf %555, %556 : vector<8x16xf32>
    %558 = math.tanh %557 : vector<8x16xf32>
    %559 = arith.mulf %554, %558 : vector<8x16xf32>
    %560 = vector.extract_strided_slice %26 {offsets = [40, 0], sizes = [8, 64], strides = [1, 1]} : vector<64x64xf32> to vector<8x64xf32>
    %561 = arith.truncf %497 : vector<8x16xf32> to vector<8x16xbf16>
    %c0_177 = arith.constant 0 : index
    %c2_178 = arith.constant 2 : index
    %c0_179 = arith.constant 0 : index
    %c0_180 = arith.constant 0 : index
    %562 = vector.load %arg3[%c0_177, %c2_178, %c0_179, %c0_180] : memref<1x3x16x64xbf16, #tpu.memory_space<vmem>>, vector<1x1x16x64xbf16>
    %563 = vector.shape_cast %562 : vector<1x1x16x64xbf16> to vector<16x64xbf16>
    %cst_181 = arith.constant dense<0.000000e+00> : vector<8x64xf32>
    %564 = tpu.matmul %561, %563, %cst_181 {dimension_numbers = #tpu.dot_dimension_numbers<[1], [0], [0], [1], [0, 0, 1, 1], [], []>} : vector<8x16xbf16>, vector<16x64xbf16>, vector<8x64xf32> -> vector<8x64xf32>
    %565 = arith.addf %560, %564 : vector<8x64xf32>
    %566 = vector.extract_strided_slice %565 {offsets = [0, 0], sizes = [8, 16], strides = [1, 1]} : vector<8x64xf32> to vector<8x16xf32>
    %567 = arith.negf %566 : vector<8x16xf32>
    %568 = math.exp %567 : vector<8x16xf32>
    %cst_182 = arith.constant 1.000000e+00 : f32
    %569 = vector.broadcast %cst_182 : f32 to vector<8x16xf32>
    %570 = arith.addf %569, %568 : vector<8x16xf32>
    %571 = arith.divf %569, %570 : vector<8x16xf32>
    %572 = vector.extract_strided_slice %565 {offsets = [0, 16], sizes = [8, 16], strides = [1, 1]} : vector<8x64xf32> to vector<8x16xf32>
    %573 = arith.negf %572 : vector<8x16xf32>
    %574 = math.exp %573 : vector<8x16xf32>
    %cst_183 = arith.constant 1.000000e+00 : f32
    %575 = vector.broadcast %cst_183 : f32 to vector<8x16xf32>
    %576 = arith.addf %575, %574 : vector<8x16xf32>
    %577 = arith.divf %575, %576 : vector<8x16xf32>
    %578 = vector.extract_strided_slice %565 {offsets = [0, 32], sizes = [8, 16], strides = [1, 1]} : vector<8x64xf32> to vector<8x16xf32>
    %579 = math.tanh %578 : vector<8x16xf32>
    %580 = vector.extract_strided_slice %565 {offsets = [0, 48], sizes = [8, 16], strides = [1, 1]} : vector<8x64xf32> to vector<8x16xf32>
    %581 = arith.negf %580 : vector<8x16xf32>
    %582 = math.exp %581 : vector<8x16xf32>
    %cst_184 = arith.constant 1.000000e+00 : f32
    %583 = vector.broadcast %cst_184 : f32 to vector<8x16xf32>
    %584 = arith.addf %583, %582 : vector<8x16xf32>
    %585 = arith.divf %583, %584 : vector<8x16xf32>
    %586 = arith.mulf %577, %495 : vector<8x16xf32>
    %587 = arith.mulf %571, %579 : vector<8x16xf32>
    %588 = arith.addf %586, %587 : vector<8x16xf32>
    %589 = math.tanh %588 : vector<8x16xf32>
    %590 = arith.mulf %585, %589 : vector<8x16xf32>
    %591 = vector.extract_strided_slice %8 {offsets = [48, 0], sizes = [8, 64], strides = [1, 1]} : vector<64x64xf32> to vector<8x64xf32>
    %592 = arith.truncf %528 : vector<8x16xf32> to vector<8x16xbf16>
    %c0_185 = arith.constant 0 : index
    %c0_186 = arith.constant 0 : index
    %c0_187 = arith.constant 0 : index
    %c0_188 = arith.constant 0 : index
    %593 = vector.load %arg3[%c0_185, %c0_186, %c0_187, %c0_188] : memref<1x3x16x64xbf16, #tpu.memory_space<vmem>>, vector<1x1x16x64xbf16>
    %594 = vector.shape_cast %593 : vector<1x1x16x64xbf16> to vector<16x64xbf16>
    %cst_189 = arith.constant dense<0.000000e+00> : vector<8x64xf32>
    %595 = tpu.matmul %592, %594, %cst_189 {dimension_numbers = #tpu.dot_dimension_numbers<[1], [0], [0], [1], [0, 0, 1, 1], [], []>} : vector<8x16xbf16>, vector<16x64xbf16>, vector<8x64xf32> -> vector<8x64xf32>
    %596 = arith.addf %591, %595 : vector<8x64xf32>
    %597 = vector.extract_strided_slice %596 {offsets = [0, 0], sizes = [8, 16], strides = [1, 1]} : vector<8x64xf32> to vector<8x16xf32>
    %598 = arith.negf %597 : vector<8x16xf32>
    %599 = math.exp %598 : vector<8x16xf32>
    %cst_190 = arith.constant 1.000000e+00 : f32
    %600 = vector.broadcast %cst_190 : f32 to vector<8x16xf32>
    %601 = arith.addf %600, %599 : vector<8x16xf32>
    %602 = arith.divf %600, %601 : vector<8x16xf32>
    %603 = vector.extract_strided_slice %596 {offsets = [0, 16], sizes = [8, 16], strides = [1, 1]} : vector<8x64xf32> to vector<8x16xf32>
    %604 = arith.negf %603 : vector<8x16xf32>
    %605 = math.exp %604 : vector<8x16xf32>
    %cst_191 = arith.constant 1.000000e+00 : f32
    %606 = vector.broadcast %cst_191 : f32 to vector<8x16xf32>
    %607 = arith.addf %606, %605 : vector<8x16xf32>
    %608 = arith.divf %606, %607 : vector<8x16xf32>
    %609 = vector.extract_strided_slice %596 {offsets = [0, 32], sizes = [8, 16], strides = [1, 1]} : vector<8x64xf32> to vector<8x16xf32>
    %610 = math.tanh %609 : vector<8x16xf32>
    %611 = vector.extract_strided_slice %596 {offsets = [0, 48], sizes = [8, 16], strides = [1, 1]} : vector<8x64xf32> to vector<8x16xf32>
    %612 = arith.negf %611 : vector<8x16xf32>
    %613 = math.exp %612 : vector<8x16xf32>
    %cst_192 = arith.constant 1.000000e+00 : f32
    %614 = vector.broadcast %cst_192 : f32 to vector<8x16xf32>
    %615 = arith.addf %614, %613 : vector<8x16xf32>
    %616 = arith.divf %614, %615 : vector<8x16xf32>
    %617 = arith.mulf %608, %526 : vector<8x16xf32>
    %618 = arith.mulf %602, %610 : vector<8x16xf32>
    %619 = arith.addf %617, %618 : vector<8x16xf32>
    %620 = math.tanh %619 : vector<8x16xf32>
    %621 = arith.mulf %616, %620 : vector<8x16xf32>
    %622 = vector.extract_strided_slice %17 {offsets = [48, 0], sizes = [8, 64], strides = [1, 1]} : vector<64x64xf32> to vector<8x64xf32>
    %623 = arith.truncf %559 : vector<8x16xf32> to vector<8x16xbf16>
    %c0_193 = arith.constant 0 : index
    %c1_194 = arith.constant 1 : index
    %c0_195 = arith.constant 0 : index
    %c0_196 = arith.constant 0 : index
    %624 = vector.load %arg3[%c0_193, %c1_194, %c0_195, %c0_196] : memref<1x3x16x64xbf16, #tpu.memory_space<vmem>>, vector<1x1x16x64xbf16>
    %625 = vector.shape_cast %624 : vector<1x1x16x64xbf16> to vector<16x64xbf16>
    %cst_197 = arith.constant dense<0.000000e+00> : vector<8x64xf32>
    %626 = tpu.matmul %623, %625, %cst_197 {dimension_numbers = #tpu.dot_dimension_numbers<[1], [0], [0], [1], [0, 0, 1, 1], [], []>} : vector<8x16xbf16>, vector<16x64xbf16>, vector<8x64xf32> -> vector<8x64xf32>
    %627 = arith.addf %622, %626 : vector<8x64xf32>
    %628 = vector.extract_strided_slice %627 {offsets = [0, 0], sizes = [8, 16], strides = [1, 1]} : vector<8x64xf32> to vector<8x16xf32>
    %629 = arith.negf %628 : vector<8x16xf32>
    %630 = math.exp %629 : vector<8x16xf32>
    %cst_198 = arith.constant 1.000000e+00 : f32
    %631 = vector.broadcast %cst_198 : f32 to vector<8x16xf32>
    %632 = arith.addf %631, %630 : vector<8x16xf32>
    %633 = arith.divf %631, %632 : vector<8x16xf32>
    %634 = vector.extract_strided_slice %627 {offsets = [0, 16], sizes = [8, 16], strides = [1, 1]} : vector<8x64xf32> to vector<8x16xf32>
    %635 = arith.negf %634 : vector<8x16xf32>
    %636 = math.exp %635 : vector<8x16xf32>
    %cst_199 = arith.constant 1.000000e+00 : f32
    %637 = vector.broadcast %cst_199 : f32 to vector<8x16xf32>
    %638 = arith.addf %637, %636 : vector<8x16xf32>
    %639 = arith.divf %637, %638 : vector<8x16xf32>
    %640 = vector.extract_strided_slice %627 {offsets = [0, 32], sizes = [8, 16], strides = [1, 1]} : vector<8x64xf32> to vector<8x16xf32>
    %641 = math.tanh %640 : vector<8x16xf32>
    %642 = vector.extract_strided_slice %627 {offsets = [0, 48], sizes = [8, 16], strides = [1, 1]} : vector<8x64xf32> to vector<8x16xf32>
    %643 = arith.negf %642 : vector<8x16xf32>
    %644 = math.exp %643 : vector<8x16xf32>
    %cst_200 = arith.constant 1.000000e+00 : f32
    %645 = vector.broadcast %cst_200 : f32 to vector<8x16xf32>
    %646 = arith.addf %645, %644 : vector<8x16xf32>
    %647 = arith.divf %645, %646 : vector<8x16xf32>
    %648 = arith.mulf %639, %557 : vector<8x16xf32>
    %649 = arith.mulf %633, %641 : vector<8x16xf32>
    %650 = arith.addf %648, %649 : vector<8x16xf32>
    %651 = math.tanh %650 : vector<8x16xf32>
    %652 = arith.mulf %647, %651 : vector<8x16xf32>
    %653 = vector.extract_strided_slice %26 {offsets = [48, 0], sizes = [8, 64], strides = [1, 1]} : vector<64x64xf32> to vector<8x64xf32>
    %654 = arith.truncf %590 : vector<8x16xf32> to vector<8x16xbf16>
    %c0_201 = arith.constant 0 : index
    %c2_202 = arith.constant 2 : index
    %c0_203 = arith.constant 0 : index
    %c0_204 = arith.constant 0 : index
    %655 = vector.load %arg3[%c0_201, %c2_202, %c0_203, %c0_204] : memref<1x3x16x64xbf16, #tpu.memory_space<vmem>>, vector<1x1x16x64xbf16>
    %656 = vector.shape_cast %655 : vector<1x1x16x64xbf16> to vector<16x64xbf16>
    %cst_205 = arith.constant dense<0.000000e+00> : vector<8x64xf32>
    %657 = tpu.matmul %654, %656, %cst_205 {dimension_numbers = #tpu.dot_dimension_numbers<[1], [0], [0], [1], [0, 0, 1, 1], [], []>} : vector<8x16xbf16>, vector<16x64xbf16>, vector<8x64xf32> -> vector<8x64xf32>
    %658 = arith.addf %653, %657 : vector<8x64xf32>
    %659 = vector.extract_strided_slice %658 {offsets = [0, 0], sizes = [8, 16], strides = [1, 1]} : vector<8x64xf32> to vector<8x16xf32>
    %660 = arith.negf %659 : vector<8x16xf32>
    %661 = math.exp %660 : vector<8x16xf32>
    %cst_206 = arith.constant 1.000000e+00 : f32
    %662 = vector.broadcast %cst_206 : f32 to vector<8x16xf32>
    %663 = arith.addf %662, %661 : vector<8x16xf32>
    %664 = arith.divf %662, %663 : vector<8x16xf32>
    %665 = vector.extract_strided_slice %658 {offsets = [0, 16], sizes = [8, 16], strides = [1, 1]} : vector<8x64xf32> to vector<8x16xf32>
    %666 = arith.negf %665 : vector<8x16xf32>
    %667 = math.exp %666 : vector<8x16xf32>
    %cst_207 = arith.constant 1.000000e+00 : f32
    %668 = vector.broadcast %cst_207 : f32 to vector<8x16xf32>
    %669 = arith.addf %668, %667 : vector<8x16xf32>
    %670 = arith.divf %668, %669 : vector<8x16xf32>
    %671 = vector.extract_strided_slice %658 {offsets = [0, 32], sizes = [8, 16], strides = [1, 1]} : vector<8x64xf32> to vector<8x16xf32>
    %672 = math.tanh %671 : vector<8x16xf32>
    %673 = vector.extract_strided_slice %658 {offsets = [0, 48], sizes = [8, 16], strides = [1, 1]} : vector<8x64xf32> to vector<8x16xf32>
    %674 = arith.negf %673 : vector<8x16xf32>
    %675 = math.exp %674 : vector<8x16xf32>
    %cst_208 = arith.constant 1.000000e+00 : f32
    %676 = vector.broadcast %cst_208 : f32 to vector<8x16xf32>
    %677 = arith.addf %676, %675 : vector<8x16xf32>
    %678 = arith.divf %676, %677 : vector<8x16xf32>
    %679 = arith.mulf %670, %588 : vector<8x16xf32>
    %680 = arith.mulf %664, %672 : vector<8x16xf32>
    %681 = arith.addf %679, %680 : vector<8x16xf32>
    %682 = math.tanh %681 : vector<8x16xf32>
    %683 = arith.mulf %678, %682 : vector<8x16xf32>
    %684 = vector.extract_strided_slice %8 {offsets = [56, 0], sizes = [8, 64], strides = [1, 1]} : vector<64x64xf32> to vector<8x64xf32>
    %685 = arith.truncf %621 : vector<8x16xf32> to vector<8x16xbf16>
    %c0_209 = arith.constant 0 : index
    %c0_210 = arith.constant 0 : index
    %c0_211 = arith.constant 0 : index
    %c0_212 = arith.constant 0 : index
    %686 = vector.load %arg3[%c0_209, %c0_210, %c0_211, %c0_212] : memref<1x3x16x64xbf16, #tpu.memory_space<vmem>>, vector<1x1x16x64xbf16>
    %687 = vector.shape_cast %686 : vector<1x1x16x64xbf16> to vector<16x64xbf16>
    %cst_213 = arith.constant dense<0.000000e+00> : vector<8x64xf32>
    %688 = tpu.matmul %685, %687, %cst_213 {dimension_numbers = #tpu.dot_dimension_numbers<[1], [0], [0], [1], [0, 0, 1, 1], [], []>} : vector<8x16xbf16>, vector<16x64xbf16>, vector<8x64xf32> -> vector<8x64xf32>
    %689 = arith.addf %684, %688 : vector<8x64xf32>
    %690 = vector.extract_strided_slice %689 {offsets = [0, 0], sizes = [8, 16], strides = [1, 1]} : vector<8x64xf32> to vector<8x16xf32>
    %691 = arith.negf %690 : vector<8x16xf32>
    %692 = math.exp %691 : vector<8x16xf32>
    %cst_214 = arith.constant 1.000000e+00 : f32
    %693 = vector.broadcast %cst_214 : f32 to vector<8x16xf32>
    %694 = arith.addf %693, %692 : vector<8x16xf32>
    %695 = arith.divf %693, %694 : vector<8x16xf32>
    %696 = vector.extract_strided_slice %689 {offsets = [0, 16], sizes = [8, 16], strides = [1, 1]} : vector<8x64xf32> to vector<8x16xf32>
    %697 = arith.negf %696 : vector<8x16xf32>
    %698 = math.exp %697 : vector<8x16xf32>
    %cst_215 = arith.constant 1.000000e+00 : f32
    %699 = vector.broadcast %cst_215 : f32 to vector<8x16xf32>
    %700 = arith.addf %699, %698 : vector<8x16xf32>
    %701 = arith.divf %699, %700 : vector<8x16xf32>
    %702 = vector.extract_strided_slice %689 {offsets = [0, 32], sizes = [8, 16], strides = [1, 1]} : vector<8x64xf32> to vector<8x16xf32>
    %703 = math.tanh %702 : vector<8x16xf32>
    %704 = vector.extract_strided_slice %689 {offsets = [0, 48], sizes = [8, 16], strides = [1, 1]} : vector<8x64xf32> to vector<8x16xf32>
    %705 = arith.negf %704 : vector<8x16xf32>
    %706 = math.exp %705 : vector<8x16xf32>
    %cst_216 = arith.constant 1.000000e+00 : f32
    %707 = vector.broadcast %cst_216 : f32 to vector<8x16xf32>
    %708 = arith.addf %707, %706 : vector<8x16xf32>
    %709 = arith.divf %707, %708 : vector<8x16xf32>
    %710 = arith.mulf %701, %619 : vector<8x16xf32>
    %711 = arith.mulf %695, %703 : vector<8x16xf32>
    %712 = arith.addf %710, %711 : vector<8x16xf32>
    %713 = math.tanh %712 : vector<8x16xf32>
    %714 = arith.mulf %709, %713 : vector<8x16xf32>
    %715 = vector.extract_strided_slice %17 {offsets = [56, 0], sizes = [8, 64], strides = [1, 1]} : vector<64x64xf32> to vector<8x64xf32>
    %716 = arith.truncf %652 : vector<8x16xf32> to vector<8x16xbf16>
    %c0_217 = arith.constant 0 : index
    %c1_218 = arith.constant 1 : index
    %c0_219 = arith.constant 0 : index
    %c0_220 = arith.constant 0 : index
    %717 = vector.load %arg3[%c0_217, %c1_218, %c0_219, %c0_220] : memref<1x3x16x64xbf16, #tpu.memory_space<vmem>>, vector<1x1x16x64xbf16>
    %718 = vector.shape_cast %717 : vector<1x1x16x64xbf16> to vector<16x64xbf16>
    %cst_221 = arith.constant dense<0.000000e+00> : vector<8x64xf32>
    %719 = tpu.matmul %716, %718, %cst_221 {dimension_numbers = #tpu.dot_dimension_numbers<[1], [0], [0], [1], [0, 0, 1, 1], [], []>} : vector<8x16xbf16>, vector<16x64xbf16>, vector<8x64xf32> -> vector<8x64xf32>
    %720 = arith.addf %715, %719 : vector<8x64xf32>
    %721 = vector.extract_strided_slice %720 {offsets = [0, 0], sizes = [8, 16], strides = [1, 1]} : vector<8x64xf32> to vector<8x16xf32>
    %722 = arith.negf %721 : vector<8x16xf32>
    %723 = math.exp %722 : vector<8x16xf32>
    %cst_222 = arith.constant 1.000000e+00 : f32
    %724 = vector.broadcast %cst_222 : f32 to vector<8x16xf32>
    %725 = arith.addf %724, %723 : vector<8x16xf32>
    %726 = arith.divf %724, %725 : vector<8x16xf32>
    %727 = vector.extract_strided_slice %720 {offsets = [0, 16], sizes = [8, 16], strides = [1, 1]} : vector<8x64xf32> to vector<8x16xf32>
    %728 = arith.negf %727 : vector<8x16xf32>
    %729 = math.exp %728 : vector<8x16xf32>
    %cst_223 = arith.constant 1.000000e+00 : f32
    %730 = vector.broadcast %cst_223 : f32 to vector<8x16xf32>
    %731 = arith.addf %730, %729 : vector<8x16xf32>
    %732 = arith.divf %730, %731 : vector<8x16xf32>
    %733 = vector.extract_strided_slice %720 {offsets = [0, 32], sizes = [8, 16], strides = [1, 1]} : vector<8x64xf32> to vector<8x16xf32>
    %734 = math.tanh %733 : vector<8x16xf32>
    %735 = vector.extract_strided_slice %720 {offsets = [0, 48], sizes = [8, 16], strides = [1, 1]} : vector<8x64xf32> to vector<8x16xf32>
    %736 = arith.negf %735 : vector<8x16xf32>
    %737 = math.exp %736 : vector<8x16xf32>
    %cst_224 = arith.constant 1.000000e+00 : f32
    %738 = vector.broadcast %cst_224 : f32 to vector<8x16xf32>
    %739 = arith.addf %738, %737 : vector<8x16xf32>
    %740 = arith.divf %738, %739 : vector<8x16xf32>
    %741 = arith.mulf %732, %650 : vector<8x16xf32>
    %742 = arith.mulf %726, %734 : vector<8x16xf32>
    %743 = arith.addf %741, %742 : vector<8x16xf32>
    %744 = math.tanh %743 : vector<8x16xf32>
    %745 = arith.mulf %740, %744 : vector<8x16xf32>
    %746 = vector.extract_strided_slice %26 {offsets = [56, 0], sizes = [8, 64], strides = [1, 1]} : vector<64x64xf32> to vector<8x64xf32>
    %747 = arith.truncf %683 : vector<8x16xf32> to vector<8x16xbf16>
    %c0_225 = arith.constant 0 : index
    %c2_226 = arith.constant 2 : index
    %c0_227 = arith.constant 0 : index
    %c0_228 = arith.constant 0 : index
    %748 = vector.load %arg3[%c0_225, %c2_226, %c0_227, %c0_228] : memref<1x3x16x64xbf16, #tpu.memory_space<vmem>>, vector<1x1x16x64xbf16>
    %749 = vector.shape_cast %748 : vector<1x1x16x64xbf16> to vector<16x64xbf16>
    %cst_229 = arith.constant dense<0.000000e+00> : vector<8x64xf32>
    %750 = tpu.matmul %747, %749, %cst_229 {dimension_numbers = #tpu.dot_dimension_numbers<[1], [0], [0], [1], [0, 0, 1, 1], [], []>} : vector<8x16xbf16>, vector<16x64xbf16>, vector<8x64xf32> -> vector<8x64xf32>
    %751 = arith.addf %746, %750 : vector<8x64xf32>
    %752 = vector.extract_strided_slice %751 {offsets = [0, 0], sizes = [8, 16], strides = [1, 1]} : vector<8x64xf32> to vector<8x16xf32>
    %753 = arith.negf %752 : vector<8x16xf32>
    %754 = math.exp %753 : vector<8x16xf32>
    %cst_230 = arith.constant 1.000000e+00 : f32
    %755 = vector.broadcast %cst_230 : f32 to vector<8x16xf32>
    %756 = arith.addf %755, %754 : vector<8x16xf32>
    %757 = arith.divf %755, %756 : vector<8x16xf32>
    %758 = vector.extract_strided_slice %751 {offsets = [0, 16], sizes = [8, 16], strides = [1, 1]} : vector<8x64xf32> to vector<8x16xf32>
    %759 = arith.negf %758 : vector<8x16xf32>
    %760 = math.exp %759 : vector<8x16xf32>
    %cst_231 = arith.constant 1.000000e+00 : f32
    %761 = vector.broadcast %cst_231 : f32 to vector<8x16xf32>
    %762 = arith.addf %761, %760 : vector<8x16xf32>
    %763 = arith.divf %761, %762 : vector<8x16xf32>
    %764 = vector.extract_strided_slice %751 {offsets = [0, 32], sizes = [8, 16], strides = [1, 1]} : vector<8x64xf32> to vector<8x16xf32>
    %765 = math.tanh %764 : vector<8x16xf32>
    %766 = vector.extract_strided_slice %751 {offsets = [0, 48], sizes = [8, 16], strides = [1, 1]} : vector<8x64xf32> to vector<8x16xf32>
    %767 = arith.negf %766 : vector<8x16xf32>
    %768 = math.exp %767 : vector<8x16xf32>
    %cst_232 = arith.constant 1.000000e+00 : f32
    %769 = vector.broadcast %cst_232 : f32 to vector<8x16xf32>
    %770 = arith.addf %769, %768 : vector<8x16xf32>
    %771 = arith.divf %769, %770 : vector<8x16xf32>
    %772 = arith.mulf %763, %681 : vector<8x16xf32>
    %773 = arith.mulf %757, %765 : vector<8x16xf32>
    %774 = arith.addf %772, %773 : vector<8x16xf32>
    %775 = math.tanh %774 : vector<8x16xf32>
    %776 = arith.mulf %771, %775 : vector<8x16xf32>
    %c0_233 = arith.constant 0 : index
    %c0_234 = arith.constant 0 : index
    %c0_235 = arith.constant 0 : index
    %c0_236 = arith.constant 0 : index
    %777 = vector.load %arg5[%c0_233, %c0_234, %c0_235, %c0_236] : memref<1x3x8x16xf32, #tpu.memory_space<vmem>>, vector<1x1x8x16xf32>
    %778 = vector.shape_cast %777 : vector<1x1x8x16xf32> to vector<8x16xf32>
    %779 = vector.shape_cast %714 : vector<8x16xf32> to vector<1x1x8x16xf32>
    tpu.vector_store %arg5[%c0_233, %c0_234, %c0_235, %c0_236], %779 {strides = array<i32>} : memref<1x3x8x16xf32, #tpu.memory_space<vmem>>, vector<1x1x8x16xf32>,
    %c0_237 = arith.constant 0 : index
    %c1_238 = arith.constant 1 : index
    %c0_239 = arith.constant 0 : index
    %c0_240 = arith.constant 0 : index
    %780 = vector.load %arg5[%c0_237, %c1_238, %c0_239, %c0_240] : memref<1x3x8x16xf32, #tpu.memory_space<vmem>>, vector<1x1x8x16xf32>
    %781 = vector.shape_cast %780 : vector<1x1x8x16xf32> to vector<8x16xf32>
    %782 = vector.shape_cast %745 : vector<8x16xf32> to vector<1x1x8x16xf32>
    tpu.vector_store %arg5[%c0_237, %c1_238, %c0_239, %c0_240], %782 {strides = array<i32>} : memref<1x3x8x16xf32, #tpu.memory_space<vmem>>, vector<1x1x8x16xf32>,
    %c0_241 = arith.constant 0 : index
    %c2_242 = arith.constant 2 : index
    %c0_243 = arith.constant 0 : index
    %c0_244 = arith.constant 0 : index
    %783 = vector.load %arg5[%c0_241, %c2_242, %c0_243, %c0_244] : memref<1x3x8x16xf32, #tpu.memory_space<vmem>>, vector<1x1x8x16xf32>
    %784 = vector.shape_cast %783 : vector<1x1x8x16xf32> to vector<8x16xf32>
    %785 = vector.shape_cast %776 : vector<8x16xf32> to vector<1x1x8x16xf32>
    tpu.vector_store %arg5[%c0_241, %c2_242, %c0_243, %c0_244], %785 {strides = array<i32>} : memref<1x3x8x16xf32, #tpu.memory_space<vmem>>, vector<1x1x8x16xf32>,
    return
  }
  func.func @transform_0(%arg0: i32) -> (i32, i32, i32, i32) {
    %c0_i32 = arith.constant 0 : i32
    %c0_i32_0 = arith.constant 0 : i32
    %c0_i32_1 = arith.constant 0 : i32
    %c0_i32_2 = arith.constant 0 : i32
    return %arg0, %c0_i32, %c0_i32_0, %c0_i32_1 : i32, i32, i32, i32
  }
  func.func @transform_1(%arg0: i32) -> (i32, i32, i32, i32) {
    %c0_i32 = arith.constant 0 : i32
    %c0_i32_0 = arith.constant 0 : i32
    %c0_i32_1 = arith.constant 0 : i32
    %c0_i32_2 = arith.constant 0 : i32
    return %arg0, %c0_i32, %c0_i32_0, %c0_i32_1 : i32, i32, i32, i32
  }
  func.func @transform_2(%arg0: i32) -> (i32, i32, i32, i32) {
    %c0_i32 = arith.constant 0 : i32
    %c0_i32_0 = arith.constant 0 : i32
    %c0_i32_1 = arith.constant 0 : i32
    %c0_i32_2 = arith.constant 0 : i32
    return %arg0, %c0_i32, %c0_i32_0, %c0_i32_1 : i32, i32, i32, i32
  }
  func.func @transform_3(%arg0: i32) -> (i32, i32, i32, i32) {
    %c0_i32 = arith.constant 0 : i32
    %c0_i32_0 = arith.constant 0 : i32
    %c0_i32_1 = arith.constant 0 : i32
    %c0_i32_2 = arith.constant 0 : i32
    return %arg0, %c0_i32, %c0_i32_0, %c0_i32_1 : i32, i32, i32, i32
  }
  func.func @transform_4(%arg0: i32) -> (i32, i32, i32, i32) {
    %c0_i32 = arith.constant 0 : i32
    %c0_i32_0 = arith.constant 0 : i32
    %c0_i32_1 = arith.constant 0 : i32
    %c0_i32_2 = arith.constant 0 : i32
    return %arg0, %c0_i32, %c0_i32_0, %c0_i32_1 : i32, i32, i32, i32
  }
}

</mosaic_0001>

<bundles_post_ra>
// kernel: tpu_custom_call.1
= control target key start
LH: loop header
LB: loop body
LE: loop exit
PB: predicated region body
PF: predicated region fallthrough
CT: control target
= control target key end

     0   :  { %9 = vsyncpa [#allocation3], 0  ;;  %s3789_s0 = inlined_call_operand.vmem [shape: bf16[2,3,64,32], index: 0, kind: input, shape index: {}]   ;;  %s3790_s1 = inlined_call_operand.vmem [shape: bf16[2,3,32,64], index: 1, kind: input, shape index: {}]   ;;  %s3791_s2 = inlined_call_operand.vmem [shape: bf16[2,3,16,64], index: 2, kind: input, shape index: {}]   ;;  %s3792_s3 = inlined_call_operand.vmem [shape: f32[2,3,1,64], index: 3, kind: input, shape index: {}]   ;;  %s3793_s4 = inlined_call_operand.hbm [shape: f32[2,3,8,16], index: 4, kind: output, shape index: {}]  }
   0x1   :  { %11 = vsyncpa [#allocation3 + $0x1], 0  ;;  %s3249_s15 = smov 0   ;;  %s3251_s16 = smov 0  }
   0x2   :  { %s3253_s17 = smov 0   ;;  %s3255_s18 = smov 0  }
   0x3 LB: > { %s3270_s19 = sadd.s32 4294967295, %s3212_s18   ;;  %s2511_s20 = sadd.s32 4294967294, %s3212_s18   ;;  %s3212_s18 = sphi %s3255_s18, %s3799_s18   ;;  %s3208_s17 = sphi %s3253_s17, %s3798_s17   ;;  %s3204_s16 = sphi %s3251_s16, %s3797_s16   ;;  %s3200_s15 = sphi %s3249_s15, %s3796_s15  }
   0x4   : > { %s3274_s21 = sadd.s32 1, %s3212_s18   ;;  %s128_s22 = sadd.s32 1, %s3208_s17 }
   0x5   : > { %s125_s23 = ssub.s32 %s3212_s18, %s3274_s21  ;;  %p138_p0 = scmp.ne.s32.totalorder %s3208_s17, %s3204_s16 }
   0x6   : > { %p126_p1 = scmp.eq.s32.totalorder %s125_s23, 0  ;;  %p139_p2 = scmp.eq.s32.totalorder %s3270_s19, 1 }
   0x7   : > { %p144_p3 = scmp.ne.s32.totalorder %s3204_s16, %s3200_s15  ;;  %p145_p4 = scmp.eq.s32.totalorder %s2511_s20, 1 }
   0x8   : > { %s3285_s24 = scalar_select %p126_p1, %s3208_s17, %s128_s22  }
   0x9   : > { %p3287_p5 = por %p139_p2, %p138_p0  ;;  %p3291_p6 = por %p145_p4, %p144_p3 }
   0xa   : > { %p2514_p7 = scmp.ge.s32.totalorder %s3212_s18, 1  ;;  %p194_p8 = scmp.lt.s32.totalorder %s3212_s18, 3 }
   0xc   : > { %p195_p9 = pnand %p2514_p7, %p194_p8 }
   0xd   : > { %p234_p10 = scmp.lt.s32.totalorder (!%p195_p9), %s3270_s19, 1  ;;  %vm305_vm0 = vcmask (!%p195_p9), 261120   ;;  %v3214_v11 = vmov (!%p195_p9), 0.0   ;;  %vm3215_vm1 = vmmov (!%p195_p9), 0   ;;  %v3216_v21 = vmov (!%p195_p9), 0   ;;  %s3220_s30 = smov (!%p195_p9), 80  }
   0xe   : > { %198 = sbr.rel (%p195_p9) target bundleno = 5713 (0x1651), region = 36  ;;  %vm653_vm2 = vcmask (!%p195_p9), 130048   ;;  %s231_s5 = sand.u32 (!%p195_p9), 1, %s3204_s16  }
   0xf   : > { %s2885_s8 = smul.u32 (!%p195_p9), 384, %s3270_s19 }
  0x11   : > { %s3745_s12 = scalar_lea.hbm (!%p195_p9), %s3793_s4, %s2885_s8 }
  0x15   : > { %s3299_s27 = scalar_select %p234_p10, %s3270_s19, 1 }
  0x16   : > { %s3221_s19 = smov [#allocation2]  }
  0x17   : > { %s2881_s28 = smul.u32 96, %s3299_s27  ;;  %s3154_s20 = sshll.u32 %s3221_s19, 4  ;;  %s3155_s20 = int_to_ptr.vmem [resolvable:$false] %s3154_s20 }
  0x18   : > { %s2882_s29 = smul.u32 48, %s3299_s27  ;;  %s3156_s22 = scalar_lea.vmem %s3155_s20, 768 }
  0x19   : > { %s3306_s6 = scalar_lea.vmem %s3789_s0, %s2881_s28  ;;  %s2883_s10 = smul.u32 24, %s3299_s27 }
  0x1a   : > { %s3311_s9 = scalar_lea.vmem %s3790_s1, %s2882_s29  ;;  %v2938_v0 = vld [vmem:[%s3306_s6] sm:$0xff]   ;;  %v2940_v6 = vld [vmem:[%s3306_s6 + $0x8] sm:$0xff]   ;;  %v2943_v9 = vld [vmem:[%s3306_s6 + $0x10] sm:$0xff]   ;;  %s2884_s14 = smul.u32 3, %s3299_s27 }
  0x1b   : > { %v2934_v1 = vld [vmem:[%s3311_s9] sm:$0xff]   ;;  %v2935_v2 = vld [vmem:[%s3311_s9 + $0x10] sm:$0xff]   ;;  %2704 = vmatprep.mubr.msk.bf16.mxu0 %vm305_vm0, %v2938_v0  ;;  %v2936_v3 = vld [vmem:[%s3311_s9 + $0x8] sm:$0xff]   ;;  %s3332_s13 = scalar_lea.vmem %s3791_s2, %s2883_s10  ;;  %s3217_s27 = smov 96  }
  0x1c   : > { %2700 = vmatprep.subr.bf16.mxu0 %v2934_v1  ;;  %2712 = vmatprep.subr.bf16.mxu1 %v2935_v2  ;;  %v2937_v4 = vld [vmem:[%s3311_s9 + $0x18] sm:$0xff]   ;;  %v2939_v5 = vld [vmem:[%s3306_s6 + $0x20] sm:$0xff]   ;;  %v2941_v7 = vld [vmem:[%s3306_s6 + $0x28] sm:$0xff]   ;;  %s3384_s23 = scalar_lea.vmem %s3792_s3, %s2884_s14  ;;  %s3218_s28 = smov 16  }
  0x1d   : > { %2701 = vmatpush3.bf16.msra.mxu0 %v2934_v1  ;;  %2713 = vmatpush3.bf16.msra.mxu1 %v2935_v2  ;;  %v2942_v8 = vld [vmem:[%s3311_s9 + $0x20] sm:$0xff]   ;;  %v2944_v10 = vld [vmem:[%s3306_s6 + $0x30] sm:$0xff]   ;;  %v2945_v12 = vld [vmem:[%s3306_s6 + $0x18] sm:$0xff]   ;;  %s3219_s29 = smov 32  }
  0x1e   : > { %2702 = vmatprep.subr.bf16.mxu0 %v2936_v3  ;;  %2714 = vmatprep.subr.bf16.mxu1 %v2937_v4  ;;  %v2947_v13 = vld [vmem:[%s3311_s9 + $0x28] sm:$0xff]   ;;  %v3340_v14 = vld [vmem:[%s3332_s13] sm:$0xff]   ;;  %v2946_v15 = vld [vmem:[%s3306_s6 + $0x38] sm:$0xff]  }
  0x1f   : > { %2716 = vmatprep.mubr.msk.bf16.mxu1 %vm305_vm0, %v2939_v5  ;;  %v2949_v16 = vld [vmem:[%s3306_s6 + $0x40] sm:$0xff]   ;;  %v2950_v17 = vld [vmem:[%s3306_s6 + $0x48] sm:$0xff]   ;;  %v3354_v18 = vld [vmem:[%s3332_s13 + $0x10] sm:$0xff]  }
  0x20   : > { %v3357_v19 = vld [vmem:[%s3332_s13 + $0x8] sm:$0xff]   ;;  %v2953_v20 = vld [vmem:[%s3306_s6 + $0x50] sm:$0xff]   ;;  %v2954_v22 = vld [vmem:[%s3306_s6 + $0x58] sm:$0xff]   ;;  %s2880_s6 = smul.u32 24, %s231_s5 }
  0x21   : > { %2703 = vmatpush3.bf16.msra.mxu0 %v2936_v3  ;;  %2715 = vmatpush3.bf16.msra.mxu1 %v2937_v4  ;;  %v2518_v23 = vld [vmem:[%s3384_s23] ss:$0 sm:$0xff]  ;;  %v2542_v24 = vld [vmem:[%s3384_s23 + $0x1] ss:$0 sm:$0xff]  ;;  %v2566_v57 = vld [vmem:[%s3384_s23 + $0x2] ss:$0 sm:$0xff] }
  0x22   : > { %2724 = vmatprep.subr.bf16.mxu0 %v2942_v8  ;;  %2736 = vmatprep.subr.bf16.mxu1 %v3214_v11  ;;  %s233_s7 = scalar_lea.vmem [#allocation2], %s2880_s6 }
  0x23   : > { %s2413_s9 = sshll.u32 %s233_s7, 4  ;;  %s3740_s9 = int_to_ptr.vmem [resolvable:$true] %s2413_s9 }
  0x24   : > { %2705 = vmatmul.mubr.msk.bf16.vlgmr.msra.gmra.mrb[0].mxu0 %vm305_vm0, %v2940_v6  ;;  %2717 = vmatmul.mubr.msk.bf16.vlgmr.msra.gmra.mrb[0].mxu1 %vm305_vm0, %v2941_v7  ;;  %s3150_s14 = scalar_lea.vmem %s3740_s9, 384  ;;  %p3157_p0 = scmp.lt.s32.totalorder %s3740_s9, %s3155_s20 }
  0x25   : > { %2725 = vmatpush3.bf16.msra.mxu0 %v2942_v8  ;;  %2708 = vmatprep.mubr.msk.bf16.mxu0 %vm305_vm0, %v2943_v9  ;;  %p3151_p11 = scmp.ne.s32.totalorder %s3740_s9, %s3150_s14  ;;  %p3158_p1 = scmp.lt.s32.totalorder %s3156_s22, %s3150_s14 }
  0x26   : > { %2720 = vmatprep.mubr.msk.bf16.mxu1 %vm305_vm0, %v2944_v10  ;;  %2726 = vmatprep.subr.bf16.mxu0 %v2947_v13 }
  0x27   : > { %2737 = vmatpush3.bf16.msra.mxu1 %v3340_v14  ;;  %p3152_p12 = pnand %p3151_p11, %p3287_p5  ;;  %p3159_p2 = por %p3158_p1, %p3157_p0 }
  0x28   : > { %2742 = vmatprep.subr.bf16.mxu1 %v3214_v11 }
  0x29   : > { %2727 = vmatpush3.bf16.msra.mxu0 %v2947_v13  ;;  %p3153_p13 = pneg %p3152_p12 }
  0x2a   : > { %2748 = vmatprep.subr.bf16.mxu0 %v3214_v11 }
  0x2b   : > { %p3160_p3 = pnand %p3159_p2, %p3153_p13 }
  0x2c   : > { %2709 = vmatmul.mubr.msk.bf16.gmra.mrb[4].mxu0 %vm305_vm0, %v2945_v12  ;;  %2721 = vmatmul.mubr.msk.bf16.gmra.mrb[4].mxu1 %vm305_vm0, %v2946_v15 }
  0x2d   : > { %2728 = vmatprep.mubr.msk.bf16.mxu0 %vm305_vm0, %v2949_v16  ;;  %2738 = vmatprep.mubr.msk.bf16.mxu1 %vm3215_vm1, %v3214_v11 }
  0x34   : > { %2729 = vmatmul.mubr.msk.bf16.vlgmr.msra.gmra.mrb[8].mxu0 %vm305_vm0, %v2950_v17  ;;  %2739 = vmatmul.mubr.bf16.vlgmr.msra.gmra.mrb[8].mxu1 %v3216_v21 }
  0x35   : > { %2749 = vmatpush3.bf16.msra.mxu0 %v3354_v18  ;;  %2743 = vmatpush3.bf16.msra.mxu1 %v3357_v19 }
  0x36   : > { %2732 = vmatprep.mubr.msk.bf16.mxu0 %vm305_vm0, %v2953_v20  ;;  %2744 = vmatprep.mubr.msk.bf16.mxu1 %vm3215_vm1, %v3214_v11 }
  0x37   : > { %2754 = vmatprep.subr.bf16.mxu1 %v3214_v11  ;;  %2760 = vmatprep.subr.bf16.mxu0 %v3214_v11 }
  0x3c   : > { %2733 = vmatmul.mubr.msk.bf16.gmra.mrb[12].mxu0 %vm305_vm0, %v2954_v22  ;;  %2745 = vmatmul.mubr.bf16.vlgmr.msra.gmra.mrb[12].mxu1 %v3216_v21 }
  0x3d   : > { %2750 = vmatprep.mubr.msk.bf16.mxu0 %vm3215_vm1, %v3214_v11  ;;  %2755 = vmatpush3.bf16.msra.mxu1 %v3340_v14 }
  0x3e   : > { %2756 = vmatprep.mubr.msk.bf16.mxu1 %vm3215_vm1, %v3214_v11  ;;  %2766 = vmatprep.subr.bf16.mxu1 %v3214_v11 }
  0x44   : > { %2751 = vmatmul.mubr.bf16.vlgmr.msra.gmra.mrb[16].mxu0 %v3216_v21 }
  0x45   : > { %2761 = vmatpush3.bf16.msra.mxu0 %v3357_v19  ;;  %2762 = vmatprep.mubr.msk.bf16.mxu0 %vm3215_vm1, %v3214_v11 }
  0x46   : > { %2772 = vmatprep.subr.bf16.mxu0 %v3214_v11 }
  0xf7   : > { %v2706_v25 = vpop.f32.mrb[0].mxu0  ;;  %v2718_v28 = vpop.f32.mrb[0].mxu1 }
  0xf8   : > { %v3388_v26 = vadd.f32 %v2706_v25, %v2518_v23  ;;  %v352_v27 = vpop.f32.mrb[1].mxu0  ;;  %v3390_v31 = vadd.f32 %v2718_v28, %v2542_v24  ;;  %v483_v32 = vpop.f32.mrb[1].mxu1 }
  0xf9   : > { %v353_v29 = vadd.f32 %v2518_v23, %v352_v27  ;;  %v2707_v30 = vpop.f32.mrb[2].mxu0  ;;  %v484_v35 = vadd.f32 %v2542_v24, %v483_v32  ;;  %v2719_v36 = vpop.f32.mrb[2].mxu1 }
  0xfa   : > { %v3392_v33 = vadd.f32 %v2707_v30, %v2518_v23  ;;  %v355_v34 = vpop.f32.mrb[3].mxu0  ;;  %v3396_v38 = vadd.f32 %v2719_v36, %v2542_v24  ;;  %v486_v39 = vpop.f32.mrb[3].mxu1 }
  0xfb   : > { %v3394_v37 = vadd.f32 %v2518_v23, %v355_v34  ;;  %v3398_v40 = vadd.f32 %v2542_v24, %v486_v39 }
  0xff   : > { %v2710_v41 = vpop.f32.mrb[4].mxu0  ;;  %v2722_v44 = vpop.f32.mrb[4].mxu1 }
 0x100   : > { %v3400_v42 = vadd.f32 %v2710_v41, %v2518_v23  ;;  %v368_v43 = vpop.f32.mrb[5].mxu0  ;;  %v3404_v47 = vadd.f32 %v2722_v44, %v2542_v24  ;;  %v499_v48 = vpop.f32.mrb[5].mxu1 }
 0x101   : > { %v3402_v45 = vadd.f32 %v2518_v23, %v368_v43  ;;  %v2711_v46 = vpop.f32.mrb[6].mxu0  ;;  %v3408_v51 = vadd.f32 %v2542_v24, %v499_v48  ;;  %v2723_v52 = vpop.f32.mrb[6].mxu1 }
 0x102   : > { %v3406_v49 = vadd.f32 %v2711_v46, %v2518_v23  ;;  %v371_v50 = vpop.f32.mrb[7].mxu0  ;;  %v3412_v54 = vadd.f32 %v2723_v52, %v2542_v24  ;;  %v502_v55 = vpop.f32.mrb[7].mxu1 }
 0x103   : > { %v3410_v53 = vadd.f32 %v2518_v23, %v371_v50  ;;  %v3414_v56 = vadd.f32 %v2542_v24, %v502_v55 }
 0x107   : > { %v2730_v58 = vpop.f32.mrb[8].mxu0  ;;  %v691_v60 = vpop.f32.mrb[8].mxu1 }
 0x108   : > { %v3417_v59 = vadd.f32 %v2730_v58, %v2566_v57  ;;  %v614_v61 = vpop.f32.mrb[9].mxu0  ;;  %v697_v62 = vadd.f32 %v691_v60, %v353_v29  ;;  %v2740_v1 = vpop.f32.mrb[9].mxu1 }
 0x109   : > { %v615_v63 = vadd.f32 %v2566_v57, %v614_v61  ;;  %v2731_v0 = vpop.f32.mrb[10].mxu0  ;;  %v694_v4 = vpop.f32.mrb[10].mxu1 }
 0x10a   : > { %v3419_v2 = vadd.f32 %v2731_v0, %v2566_v57  ;;  %v617_v3 = vpop.f32.mrb[11].mxu0  ;;  %2955 = vtanh.f32 %v697_v62  ;;  %v2741_v6 = vpop.f32.mrb[11].mxu1 }
 0x10b   : > { %v3421_v5 = vadd.f32 %v2566_v57, %v617_v3 }
 0x10f   : > { %v2734_v7 = vpop.f32.mrb[12].mxu0  ;;  %v765_v9 = vpop.f32.mrb[12].mxu1 }
 0x110   : > { %v3423_v8 = vadd.f32 %v2734_v7, %v2566_v57  ;;  %v630_v10 = vpop.f32.mrb[13].mxu0  ;;  %v771_v12 = vadd.f32 %v765_v9, %v484_v35  ;;  %v2746_v16 = vpop.f32.mrb[13].mxu1  ;;  %v2578_v35 = vmul.f32 -1.442695, %v697_v62 }
 0x111   : > { %v3425_v13 = vadd.f32 %v2566_v57, %v630_v10  ;;  %v2735_v15 = vpop.f32.mrb[14].mxu0  ;;  %v768_v21 = vpop.f32.mrb[14].mxu1 }
 0x112   : > { %v3427_v17 = vadd.f32 %v2735_v15, %v2566_v57  ;;  %v633_v20 = vpop.f32.mrb[15].mxu0  ;;  %2957 = vtanh.f32 %v771_v12  ;;  %v2747_v23 = vpop.f32.mrb[15].mxu1  ;;  %v2582_v36 = vmul.f32 -1.442695, %v771_v12 }
 0x113   : > { %v3429_v22 = vadd.f32 %v2566_v57, %v633_v20 }
 0x114   : > { %v2956_v24 = vpop.eup %2955 }
 0x115   : > { %707 = vrot.lane.b32.xlu0 %v2956_v24, %s3217_s27 }
 0x117   : > { %v839_v25 = vpop.f32.mrb[16].mxu0 }
 0x118   : > { %v845_v27 = vadd.f32 %v839_v25, %v615_v63  ;;  %v2752_v28 = vpop.f32.mrb[17].mxu0 }
 0x119   : > { %v842_v29 = vpop.f32.mrb[18].mxu0 }
 0x11a   : > { %v2753_v30 = vpop.f32.mrb[19].mxu0  ;;  %2959 = vtanh.f32 %v845_v27  ;;  %v2586_v41 = vmul.f32 -1.442695, %v845_v27 }
 0x11b   : > { %2961 = vpow2.f32 %v2578_v35 }
 0x11c   : > { %v2958_v32 = vpop.eup %2957  ;;  %2963 = vpow2.f32 %v2582_v36 }
 0x11d   : > { %781 = vrot.lane.b32.xlu0 %v2958_v32, %s3217_s27  ;;  %2965 = vpow2.f32 %v2586_v41 }
 0x124   : > { %v2960_v34 = vpop.eup %2959 }
 0x125   : > { %855 = vrot.lane.b32.xlu1 %v2960_v34, %s3217_s27  ;;  %v2962_v39 = vpop.eup %2961 }
 0x126   : > { %v701_v43 = vadd.f32 1.0, %v2962_v39  ;;  %v2964_v44 = vpop.eup %2963 }
 0x127   : > { %v775_v46 = vadd.f32 1.0, %v2964_v44  ;;  %v2966_v48 = vpop.eup %2965 }
 0x128   : > { %2967 = vrcp.f32 %v701_v43  ;;  %v849_v57 = vadd.f32 1.0, %v2966_v48 }
 0x129   : > { %2969 = vrcp.f32 %v775_v46 }
 0x12a   : > { %2971 = vrcp.f32 %v849_v57 }
 0x132   : > { %v2968_v50 = vpop.eup %2967 }
 0x133   : > { %v2970_v58 = vpop.eup %2969  ;;  %v705_v1 = vmul.f32 0.0, %v2968_v50 }
 0x134   : > { %v2972_v62 = vpop.eup %2971  ;;  %v779_v6 = vmul.f32 0.0, %v2970_v58 }
 0x135   : > { %v853_v12 = vmul.f32 0.0, %v2972_v62 }
 0x187   : > { %v708_v52 = vpop.permute.xlu0 %707 }
 0x188   : > { %v710_v55 = vmul.f32 %v2968_v50, %v708_v52 }
 0x18a   : > { %712 = vrot.lane.b32.xlu1 %v710_v55, %s3218_s28 }
 0x18f   : > { %v782_v60 = vpop.permute.xlu0 %781 }
 0x190   : > { %v784_v61 = vmul.f32 %v2970_v58, %v782_v60 }
 0x192   : > { %786 = vrot.lane.b32.xlu0 %v784_v61, %s3218_s28 }
 0x197   : > { %v856_v63 = vpop.permute.xlu1 %855 }
 0x198   : > { %v858_v0 = vmul.f32 %v2972_v62, %v856_v63 }
 0x19a   : > { %860 = vrot.lane.b32.xlu1 %v858_v0, %s3218_s28 }
 0x1fc   : > { %v713_v3 = vpop.permute.xlu1 %712 }
 0x1fd   : > { %v3437_v4 = vadd.f32 %v713_v3, %v705_v1 }
 0x1ff   : > { %2973 = vtanh.f32 %v3437_v4 }
 0x204   : > { %v787_v7 = vpop.permute.xlu0 %786 }
 0x205   : > { %v3440_v9 = vadd.f32 %v787_v7, %v779_v6 }
 0x207   : > { %2975 = vtanh.f32 %v3440_v9 }
 0x209   : > { %v2974_v10 = vpop.eup %2973 }
 0x20a   : > { %718 = vrot.lane.b32.xlu0 %v2974_v10, %s3219_s29 }
 0x20c   : > { %v861_v15 = vpop.permute.xlu1 %860 }
 0x20d   : > { %v3444_v16 = vadd.f32 %v861_v15, %v853_v12 }
 0x20f   : > { %2977 = vtanh.f32 %v3444_v16 }
 0x211   : > { %v2976_v20 = vpop.eup %2975 }
 0x212   : > { %792 = vrot.lane.b32.xlu1 %v2976_v20, %s3219_s29 }
 0x219   : > { %v2978_v21 = vpop.eup %2977 }
 0x21a   : > { %866 = vrot.lane.b32.xlu0 %v2978_v21, %s3219_s29 }
 0x27c   : > { %v719_v23 = vpop.permute.xlu0 %718 }
 0x27d   : > { %v721_v24 = vmul.f32 %v2968_v50, %v719_v23 }
 0x27f   : > { %v870_v25 = vpack.c.bf16 %v721_v24, %v721_v24 }
 0x281   : > { %872 = vrot.lane.b32.xlu1 %v870_v25, %s3220_s30 }
 0x284   : > { %v793_v27 = vpop.permute.xlu1 %792 }
 0x285   : > { %v795_v28 = vmul.f32 %v2970_v58, %v793_v27 }
 0x287   : > { %v942_v29 = vpack.c.bf16 %v795_v28, %v795_v28 }
 0x289   : > { %944 = vrot.lane.b32.xlu0 %v942_v29, %s3220_s30 }
 0x28c   : > { %v867_v30 = vpop.permute.xlu0 %866 }
 0x28d   : > { %v869_v32 = vmul.f32 %v2972_v62, %v867_v30 }
 0x28f   : > { %v1014_v34 = vpack.c.bf16 %v869_v32, %v869_v32 }
 0x291   : > { %1016 = vrot.lane.b32.xlu1 %v1014_v34, %s3220_s30 }
 0x2f3   : > { %v873_v35 = vpop.permute.xlu1 %872 }
 0x2f4   : > { %2757 = vmatmul.mubr.msk.bf16.vlgmr.msra.gmra.mrb[16].mxu1 %vm653_vm2, %v873_v35 }
 0x2f5   : > { %2767 = vmatpush3.bf16.msra.mxu1 %v3354_v18  ;;  %2768 = vmatprep.mubr.msk.bf16.mxu1 %vm3215_vm1, %v3214_v11 }
 0x2f6   : > { %2778 = vmatprep.subr.bf16.mxu1 %v3214_v11 }
 0x2fb   : > { %v945_v36 = vpop.permute.xlu0 %944 }
 0x2fc   : > { %2763 = vmatmul.mubr.msk.bf16.vlgmr.msra.gmra.mrb[20].mxu0 %vm653_vm2, %v945_v36 }
 0x2fd   : > { %2773 = vmatpush3.bf16.msra.mxu0 %v3340_v14  ;;  %2774 = vmatprep.mubr.msk.bf16.mxu0 %vm3215_vm1, %v3214_v11 }
 0x2fe   : > { %2784 = vmatprep.subr.bf16.mxu0 %v3214_v11 }
 0x303   : > { %v1017_v39 = vpop.permute.xlu1 %1016 }
 0x304   : > { %2769 = vmatmul.mubr.msk.bf16.vlgmr.msra.gmra.mrb[20].mxu1 %vm653_vm2, %v1017_v39 }
 0x305   : > { %2779 = vmatpush3.bf16.msra.mxu1 %v3357_v19  ;;  %2780 = vmatprep.mubr.msk.bf16.mxu1 %vm3215_vm1, %v3214_v11 }
 0x306   : > { %2790 = vmatprep.subr.bf16.mxu1 %v3214_v11 }
 0x3c7   : > { %v911_v41 = vpop.f32.mrb[16].mxu1 }
 0x3c8   : > { %v917_v43 = vadd.f32 %v911_v41, %v3394_v37  ;;  %v2758_v44 = vpop.f32.mrb[17].mxu1 }
 0x3c9   : > { %v914_v46 = vpop.f32.mrb[18].mxu1 }
 0x3ca   : > { %2979 = vtanh.f32 %v917_v43  ;;  %v2759_v48 = vpop.f32.mrb[19].mxu1 }
 0x3cf   : > { %v983_v50 = vpop.f32.mrb[20].mxu0 }
 0x3d0   : > { %v989_v52 = vadd.f32 %v983_v50, %v3398_v40  ;;  %v2764_v55 = vpop.f32.mrb[21].mxu0  ;;  %v2588_v40 = vmul.f32 -1.442695, %v917_v43 }
 0x3d1   : > { %v986_v57 = vpop.f32.mrb[22].mxu0 }
 0x3d2   : > { %2981 = vtanh.f32 %v989_v52  ;;  %v2765_v58 = vpop.f32.mrb[23].mxu0  ;;  %v2590_v6 = vmul.f32 -1.442695, %v989_v52 }
 0x3d4   : > { %v2980_v60 = vpop.eup %2979 }
 0x3d5   : > { %927 = vrot.lane.b32.xlu0 %v2980_v60, %s3217_s27 }
 0x3d7   : > { %v1055_v61 = vpop.f32.mrb[20].mxu1 }
 0x3d8   : > { %v1061_v62 = vadd.f32 %v1055_v61, %v3421_v5  ;;  %v2770_v63 = vpop.f32.mrb[21].mxu1 }
 0x3d9   : > { %v1058_v0 = vpop.f32.mrb[22].mxu1 }
 0x3da   : > { %2983 = vtanh.f32 %v1061_v62  ;;  %v2771_v37 = vpop.f32.mrb[23].mxu1  ;;  %v2592_v10 = vmul.f32 -1.442695, %v1061_v62 }
 0x3db   : > { %2985 = vpow2.f32 %v2588_v40 }
 0x3dc   : > { %v2982_v1 = vpop.eup %2981  ;;  %2987 = vpow2.f32 %v2590_v6 }
 0x3dd   : > { %999 = vrot.lane.b32.xlu1 %v2982_v1, %s3217_s27  ;;  %2989 = vpow2.f32 %v2592_v10 }
 0x3e4   : > { %v2984_v3 = vpop.eup %2983 }
 0x3e5   : > { %1071 = vrot.lane.b32.xlu0 %v2984_v3, %s3217_s27  ;;  %v2986_v7 = vpop.eup %2985 }
 0x3e6   : > { %v921_v12 = vadd.f32 1.0, %v2986_v7  ;;  %v2988_v5 = vpop.eup %2987 }
 0x3e7   : > { %v993_v15 = vadd.f32 1.0, %v2988_v5  ;;  %v2990_v20 = vpop.eup %2989 }
 0x3e8   : > { %2991 = vrcp.f32 %v921_v12  ;;  %v1065_v25 = vadd.f32 1.0, %v2990_v20 }
 0x3e9   : > { %2993 = vrcp.f32 %v993_v15 }
 0x3ea   : > { %2995 = vrcp.f32 %v1065_v25 }
 0x3f2   : > { %v2992_v21 = vpop.eup %2991 }
 0x3f3   : > { %v2994_v27 = vpop.eup %2993  ;;  %v925_v35 = vmul.f32 %v2992_v21, %v3437_v4 }
 0x3f4   : > { %v2996_v30 = vpop.eup %2995  ;;  %v997_v41 = vmul.f32 %v2994_v27, %v3440_v9 }
 0x3f5   : > { %v1069_v48 = vmul.f32 %v2996_v30, %v3444_v16 }
 0x447   : > { %v928_v23 = vpop.permute.xlu0 %927 }
 0x448   : > { %v930_v24 = vmul.f32 %v2992_v21, %v928_v23 }
 0x44a   : > { %932 = vrot.lane.b32.xlu1 %v930_v24, %s3218_s28 }
 0x44f   : > { %v1000_v28 = vpop.permute.xlu1 %999 }
 0x450   : > { %v1002_v29 = vmul.f32 %v2994_v27, %v1000_v28 }
 0x452   : > { %1004 = vrot.lane.b32.xlu0 %v1002_v29, %s3218_s28 }
 0x457   : > { %v1072_v32 = vpop.permute.xlu0 %1071 }
 0x458   : > { %v1074_v34 = vmul.f32 %v2996_v30, %v1072_v32 }
 0x45a   : > { %1076 = vrot.lane.b32.xlu1 %v1074_v34, %s3218_s28 }
 0x4bc   : > { %v933_v36 = vpop.permute.xlu1 %932 }
 0x4bd   : > { %v3477_v39 = vadd.f32 %v933_v36, %v925_v35 }
 0x4bf   : > { %2997 = vtanh.f32 %v3477_v39 }
 0x4c4   : > { %v1005_v43 = vpop.permute.xlu0 %1004 }
 0x4c5   : > { %v3481_v44 = vadd.f32 %v1005_v43, %v997_v41 }
 0x4c7   : > { %2999 = vtanh.f32 %v3481_v44 }
 0x4c9   : > { %v2998_v46 = vpop.eup %2997 }
 0x4ca   : > { %938 = vrot.lane.b32.xlu0 %v2998_v46, %s3219_s29 }
 0x4cc   : > { %v1077_v50 = vpop.permute.xlu1 %1076 }
 0x4cd   : > { %v3486_v52 = vadd.f32 %v1077_v50, %v1069_v48 }
 0x4cf   : > { %3001 = vtanh.f32 %v3486_v52 }
 0x4d1   : > { %v3000_v4 = vpop.eup %2999 }
 0x4d2   : > { %1010 = vrot.lane.b32.xlu1 %v3000_v4, %s3219_s29 }
 0x4d9   : > { %v3002_v55 = vpop.eup %3001 }
 0x4da   : > { %1082 = vrot.lane.b32.xlu0 %v3002_v55, %s3219_s29 }
 0x53c   : > { %v939_v9 = vpop.permute.xlu0 %938 }
 0x53d   : > { %v941_v57 = vmul.f32 %v2992_v21, %v939_v9 }
 0x53f   : > { %v1086_v58 = vpack.c.bf16 %v941_v57, %v941_v57 }
 0x541   : > { %1088 = vrot.lane.b32.xlu1 %v1086_v58, %s3220_s30 }
 0x544   : > { %v1011_v60 = vpop.permute.xlu1 %1010 }
 0x545   : > { %v1013_v61 = vmul.f32 %v2994_v27, %v1011_v60 }
 0x547   : > { %v1158_v62 = vpack.c.bf16 %v1013_v61, %v1013_v61 }
 0x549   : > { %1160 = vrot.lane.b32.xlu0 %v1158_v62, %s3220_s30 }
 0x54c   : > { %v1083_v16 = vpop.permute.xlu0 %1082 }
 0x54d   : > { %v1085_v63 = vmul.f32 %v2996_v30, %v1083_v16 }
 0x54f   : > { %v1230_v0 = vpack.c.bf16 %v1085_v63, %v1085_v63 }
 0x551   : > { %1232 = vrot.lane.b32.xlu1 %v1230_v0, %s3220_s30 }
 0x5b3   : > { %v1089_v37 = vpop.permute.xlu1 %1088 }
 0x5b4   : > { %2775 = vmatmul.mubr.msk.bf16.vlgmr.msra.gmra.mrb[24].mxu0 %vm653_vm2, %v1089_v37 }
 0x5b5   : > { %2785 = vmatpush3.bf16.msra.mxu0 %v3354_v18  ;;  %2786 = vmatprep.mubr.msk.bf16.mxu0 %vm3215_vm1, %v3214_v11 }
 0x5b6   : > { %2796 = vmatprep.subr.bf16.mxu0 %v3214_v11 }
 0x5bb   : > { %v1161_v1 = vpop.permute.xlu0 %1160 }
 0x5bc   : > { %2781 = vmatmul.mubr.msk.bf16.vlgmr.msra.gmra.mrb[24].mxu1 %vm653_vm2, %v1161_v1 }
 0x5bd   : > { %2791 = vmatpush3.bf16.msra.mxu1 %v3340_v14  ;;  %2792 = vmatprep.mubr.msk.bf16.mxu1 %vm3215_vm1, %v3214_v11 }
 0x5be   : > { %2802 = vmatprep.subr.bf16.mxu1 %v3214_v11 }
 0x5c3   : > { %v1233_v3 = vpop.permute.xlu1 %1232 }
 0x5c4   : > { %2787 = vmatmul.mubr.msk.bf16.vlgmr.msra.gmra.mrb[28].mxu0 %vm653_vm2, %v1233_v3 }
 0x5c5   : > { %2797 = vmatpush3.bf16.msra.mxu0 %v3357_v19  ;;  %2798 = vmatprep.mubr.msk.bf16.mxu0 %vm3215_vm1, %v3214_v11 }
 0x5c6   : > { %2808 = vmatprep.subr.bf16.mxu0 %v3214_v11 }
 0x687   : > { %v1127_v40 = vpop.f32.mrb[24].mxu0 }
 0x688   : > { %v1133_v6 = vadd.f32 %v1127_v40, %v3388_v26  ;;  %v2776_v7 = vpop.f32.mrb[25].mxu0 }
 0x689   : > { %v1130_v10 = vpop.f32.mrb[26].mxu0 }
 0x68a   : > { %3003 = vtanh.f32 %v1133_v6  ;;  %v2777_v12 = vpop.f32.mrb[27].mxu0 }
 0x68f   : > { %v1199_v5 = vpop.f32.mrb[24].mxu1 }
 0x690   : > { %v1205_v15 = vadd.f32 %v1199_v5, %v3390_v31  ;;  %v2782_v20 = vpop.f32.mrb[25].mxu1  ;;  %v2594_v31 = vmul.f32 -1.442695, %v1133_v6 }
 0x691   : > { %v1202_v21 = vpop.f32.mrb[26].mxu1 }
 0x692   : > { %3005 = vtanh.f32 %v1205_v15  ;;  %v2783_v23 = vpop.f32.mrb[27].mxu1  ;;  %v2596_v34 = vmul.f32 -1.442695, %v1205_v15 }
 0x694   : > { %v3004_v24 = vpop.eup %3003 }
 0x695   : > { %1143 = vrot.lane.b32.xlu0 %v3004_v24, %s3217_s27 }
 0x697   : > { %v1271_v25 = vpop.f32.mrb[28].mxu0 }
 0x698   : > { %v1277_v27 = vadd.f32 %v1271_v25, %v3417_v59  ;;  %v2788_v28 = vpop.f32.mrb[29].mxu0 }
 0x699   : > { %v1274_v29 = vpop.f32.mrb[30].mxu0 }
 0x69a   : > { %3007 = vtanh.f32 %v1277_v27  ;;  %v2789_v26 = vpop.f32.mrb[31].mxu0  ;;  %v2598_v36 = vmul.f32 -1.442695, %v1277_v27 }
 0x69b   : > { %3009 = vpow2.f32 %v2594_v31 }
 0x69c   : > { %v3006_v30 = vpop.eup %3005  ;;  %3011 = vpow2.f32 %v2596_v34 }
 0x69d   : > { %1215 = vrot.lane.b32.xlu1 %v3006_v30, %s3217_s27  ;;  %3013 = vpow2.f32 %v2598_v36 }
 0x6a4   : > { %v3008_v32 = vpop.eup %3007 }
 0x6a5   : > { %1287 = vrot.lane.b32.xlu0 %v3008_v32, %s3217_s27  ;;  %v3010_v35 = vpop.eup %3009 }
 0x6a6   : > { %v1137_v41 = vadd.f32 1.0, %v3010_v35  ;;  %v3012_v59 = vpop.eup %3011 }
 0x6a7   : > { %v1209_v43 = vadd.f32 1.0, %v3012_v59  ;;  %v3014_v46 = vpop.eup %3013 }
 0x6a8   : > { %3015 = vrcp.f32 %v1137_v41  ;;  %v1281_v55 = vadd.f32 1.0, %v3014_v46 }
 0x6a9   : > { %3017 = vrcp.f32 %v1209_v43 }
 0x6aa   : > { %3019 = vrcp.f32 %v1281_v55 }
 0x6b2   : > { %v3016_v48 = vpop.eup %3015 }
 0x6b3   : > { %v3018_v9 = vpop.eup %3017  ;;  %v1141_v16 = vmul.f32 %v3016_v48, %v3477_v39 }
 0x6b4   : > { %v3020_v60 = vpop.eup %3019  ;;  %v1213_v37 = vmul.f32 %v3018_v9, %v3481_v44 }
 0x6b5   : > { %v1285_v6 = vmul.f32 %v3020_v60, %v3486_v52 }
 0x707   : > { %v1144_v50 = vpop.permute.xlu0 %1143 }
 0x708   : > { %v1146_v4 = vmul.f32 %v3016_v48, %v1144_v50 }
 0x70a   : > { %1148 = vrot.lane.b32.xlu1 %v1146_v4, %s3218_s28 }
 0x70f   : > { %v1216_v57 = vpop.permute.xlu1 %1215 }
 0x710   : > { %v1218_v58 = vmul.f32 %v3018_v9, %v1216_v57 }
 0x712   : > { %1220 = vrot.lane.b32.xlu0 %v1218_v58, %s3218_s28 }
 0x717   : > { %v1288_v61 = vpop.permute.xlu0 %1287 }
 0x718   : > { %v1290_v62 = vmul.f32 %v3020_v60, %v1288_v61 }
 0x71a   : > { %1292 = vrot.lane.b32.xlu1 %v1290_v62, %s3218_s28 }
 0x77c   : > { %v1149_v63 = vpop.permute.xlu1 %1148 }
 0x77d   : > { %v3519_v0 = vadd.f32 %v1149_v63, %v1141_v16 }
 0x77f   : > { %3021 = vtanh.f32 %v3519_v0 }
 0x784   : > { %v1221_v1 = vpop.permute.xlu0 %1220 }
 0x785   : > { %v3523_v3 = vadd.f32 %v1221_v1, %v1213_v37 }
 0x787   : > { %3023 = vtanh.f32 %v3523_v3 }
 0x789   : > { %v3022_v40 = vpop.eup %3021 }
 0x78a   : > { %1154 = vrot.lane.b32.xlu0 %v3022_v40, %s3219_s29 }
 0x78c   : > { %v1293_v7 = vpop.permute.xlu1 %1292 }
 0x78d   : > { %v3528_v10 = vadd.f32 %v1293_v7, %v1285_v6 }
 0x78f   : > { %3025 = vtanh.f32 %v3528_v10 }
 0x791   : > { %v3024_v39 = vpop.eup %3023 }
 0x792   : > { %1226 = vrot.lane.b32.xlu1 %v3024_v39, %s3219_s29 }
 0x799   : > { %v3026_v12 = vpop.eup %3025 }
 0x79a   : > { %1298 = vrot.lane.b32.xlu0 %v3026_v12, %s3219_s29 }
 0x7fc   : > { %v1155_v44 = vpop.permute.xlu0 %1154 }
 0x7fd   : > { %v1157_v5 = vmul.f32 %v3016_v48, %v1155_v44 }
 0x7ff   : > { %v1302_v15 = vpack.c.bf16 %v1157_v5, %v1157_v5 }
 0x801   : > { %1304 = vrot.lane.b32.xlu1 %v1302_v15, %s3220_s30 }
 0x804   : > { %v1227_v20 = vpop.permute.xlu1 %1226 }
 0x805   : > { %v1229_v21 = vmul.f32 %v3018_v9, %v1227_v20 }
 0x807   : > { %v1374_v23 = vpack.c.bf16 %v1229_v21, %v1229_v21 }
 0x809   : > { %1376 = vrot.lane.b32.xlu0 %v1374_v23, %s3220_s30 }
 0x80c   : > { %v1299_v52 = vpop.permute.xlu0 %1298 }
 0x80d   : > { %v1301_v24 = vmul.f32 %v3020_v60, %v1299_v52 }
 0x80f   : > { %v1446_v25 = vpack.c.bf16 %v1301_v24, %v1301_v24 }
 0x811   : > { %1448 = vrot.lane.b32.xlu1 %v1446_v25, %s3220_s30 }
 0x873   : > { %v1305_v27 = vpop.permute.xlu1 %1304 }
 0x874   : > { %2793 = vmatmul.mubr.msk.bf16.vlgmr.msra.gmra.mrb[28].mxu1 %vm653_vm2, %v1305_v27 }
 0x875   : > { %2803 = vmatpush3.bf16.msra.mxu1 %v3354_v18  ;;  %2804 = vmatprep.mubr.msk.bf16.mxu1 %vm3215_vm1, %v3214_v11 }
 0x876   : > { %2814 = vmatprep.subr.bf16.mxu1 %v3214_v11 }
 0x87b   : > { %v1377_v28 = vpop.permute.xlu0 %1376 }
 0x87c   : > { %2799 = vmatmul.mubr.msk.bf16.vlgmr.msra.gmra.mrb[32].mxu0 %vm653_vm2, %v1377_v28 }
 0x87d   : > { %2809 = vmatpush3.bf16.msra.mxu0 %v3340_v14  ;;  %2810 = vmatprep.mubr.msk.bf16.mxu0 %vm3215_vm1, %v3214_v11 }
 0x87e   : > { %2820 = vmatprep.subr.bf16.mxu0 %v3214_v11 }
 0x883   : > { %v1449_v29 = vpop.permute.xlu1 %1448 }
 0x884   : > { %2805 = vmatmul.mubr.msk.bf16.vlgmr.msra.gmra.mrb[32].mxu1 %vm653_vm2, %v1449_v29 }
 0x885   : > { %2815 = vmatpush3.bf16.msra.mxu1 %v3357_v19  ;;  %2816 = vmatprep.mubr.msk.bf16.mxu1 %vm3215_vm1, %v3214_v11 }
 0x886   : > { %2826 = vmatprep.subr.bf16.mxu1 %v3214_v11 }
 0x947   : > { %v1343_v26 = vpop.f32.mrb[28].mxu1 }
 0x948   : > { %v1349_v30 = vadd.f32 %v1343_v26, %v3392_v33  ;;  %v2794_v32 = vpop.f32.mrb[29].mxu1 }
 0x949   : > { %v1346_v31 = vpop.f32.mrb[30].mxu1 }
 0x94a   : > { %3027 = vtanh.f32 %v1349_v30  ;;  %v2795_v34 = vpop.f32.mrb[31].mxu1 }
 0x94f   : > { %v1415_v35 = vpop.f32.mrb[32].mxu0 }
 0x950   : > { %v1421_v36 = vadd.f32 %v1415_v35, %v3396_v38  ;;  %v2800_v41 = vpop.f32.mrb[33].mxu0  ;;  %v2600_v38 = vmul.f32 -1.442695, %v1349_v30 }
 0x951   : > { %v1418_v59 = vpop.f32.mrb[34].mxu0 }
 0x952   : > { %3029 = vtanh.f32 %v1421_v36  ;;  %v2801_v43 = vpop.f32.mrb[35].mxu0  ;;  %v2602_v58 = vmul.f32 -1.442695, %v1421_v36 }
 0x954   : > { %v3028_v46 = vpop.eup %3027 }
 0x955   : > { %1359 = vrot.lane.b32.xlu0 %v3028_v46, %s3217_s27 }
 0x957   : > { %v1487_v48 = vpop.f32.mrb[32].mxu1 }
 0x958   : > { %v1493_v50 = vadd.f32 %v1487_v48, %v3419_v2  ;;  %v2806_v4 = vpop.f32.mrb[33].mxu1 }
 0x959   : > { %v1490_v55 = vpop.f32.mrb[34].mxu1 }
 0x95a   : > { %3031 = vtanh.f32 %v1493_v50  ;;  %v2807_v33 = vpop.f32.mrb[35].mxu1  ;;  %v2604_v61 = vmul.f32 -1.442695, %v1493_v50 }
 0x95b   : > { %3033 = vpow2.f32 %v2600_v38 }
 0x95c   : > { %v3030_v9 = vpop.eup %3029  ;;  %3035 = vpow2.f32 %v2602_v58 }
 0x95d   : > { %1431 = vrot.lane.b32.xlu1 %v3030_v9, %s3217_s27  ;;  %3037 = vpow2.f32 %v2604_v61 }
 0x964   : > { %v3032_v57 = vpop.eup %3031 }
 0x965   : > { %1503 = vrot.lane.b32.xlu0 %v3032_v57, %s3217_s27  ;;  %v3034_v60 = vpop.eup %3033 }
 0x966   : > { %v1353_v62 = vadd.f32 1.0, %v3034_v60  ;;  %v3036_v2 = vpop.eup %3035 }
 0x967   : > { %v1425_v16 = vadd.f32 1.0, %v3036_v2  ;;  %v3038_v63 = vpop.eup %3037 }
 0x968   : > { %3039 = vrcp.f32 %v1353_v62  ;;  %v1497_v6 = vadd.f32 1.0, %v3038_v63 }
 0x969   : > { %3041 = vrcp.f32 %v1425_v16 }
 0x96a   : > { %3043 = vrcp.f32 %v1497_v6 }
 0x972   : > { %v3040_v37 = vpop.eup %3039 }
 0x973   : > { %v3042_v7 = vpop.eup %3041  ;;  %v1357_v20 = vmul.f32 %v3040_v37, %v3519_v0 }
 0x974   : > { %v3044_v44 = vpop.eup %3043  ;;  %v1429_v52 = vmul.f32 %v3042_v7, %v3523_v3 }
 0x975   : > { %v1501_v28 = vmul.f32 %v3044_v44, %v3528_v10 }
 0x9c7   : > { %v1360_v1 = vpop.permute.xlu0 %1359 }
 0x9c8   : > { %v1362_v40 = vmul.f32 %v3040_v37, %v1360_v1 }
 0x9ca   : > { %1364 = vrot.lane.b32.xlu1 %v1362_v40, %s3218_s28 }
 0x9cf   : > { %v1432_v39 = vpop.permute.xlu1 %1431 }
 0x9d0   : > { %v1434_v12 = vmul.f32 %v3042_v7, %v1432_v39 }
 0x9d2   : > { %1436 = vrot.lane.b32.xlu0 %v1434_v12, %s3218_s28 }
 0x9d7   : > { %v1504_v5 = vpop.permute.xlu0 %1503 }
 0x9d8   : > { %v1506_v15 = vmul.f32 %v3044_v44, %v1504_v5 }
 0x9da   : > { %1508 = vrot.lane.b32.xlu1 %v1506_v15, %s3218_s28 }
 0xa3c   : > { %v1365_v21 = vpop.permute.xlu1 %1364 }
 0xa3d   : > { %v3561_v23 = vadd.f32 %v1365_v21, %v1357_v20 }
 0xa3f   : > { %3045 = vtanh.f32 %v3561_v23 }
 0xa44   : > { %v1437_v24 = vpop.permute.xlu0 %1436 }
 0xa45   : > { %v3565_v25 = vadd.f32 %v1437_v24, %v1429_v52 }
 0xa47   : > { %3047 = vtanh.f32 %v3565_v25 }
 0xa49   : > { %v3046_v27 = vpop.eup %3045 }
 0xa4a   : > { %1370 = vrot.lane.b32.xlu0 %v3046_v27, %s3219_s29 }
 0xa4c   : > { %v1509_v29 = vpop.permute.xlu1 %1508 }
 0xa4d   : > { %v3570_v26 = vadd.f32 %v1509_v29, %v1501_v28 }
 0xa4f   : > { %3049 = vtanh.f32 %v3570_v26 }
 0xa51   : > { %v3048_v0 = vpop.eup %3047 }
 0xa52   : > { %1442 = vrot.lane.b32.xlu1 %v3048_v0, %s3219_s29 }
 0xa59   : > { %v3050_v30 = vpop.eup %3049 }
 0xa5a   : > { %1514 = vrot.lane.b32.xlu0 %v3050_v30, %s3219_s29 }
 0xabc   : > { %v1371_v3 = vpop.permute.xlu0 %1370 }
 0xabd   : > { %v1373_v32 = vmul.f32 %v3040_v37, %v1371_v3 }
 0xabf   : > { %v1518_v31 = vpack.c.bf16 %v1373_v32, %v1373_v32 }
 0xac1   : > { %1520 = vrot.lane.b32.xlu1 %v1518_v31, %s3220_s30 }
 0xac4   : > { %v1443_v34 = vpop.permute.xlu1 %1442 }
 0xac5   : > { %v1445_v35 = vmul.f32 %v3042_v7, %v1443_v34 }
 0xac7   : > { %v1590_v36 = vpack.c.bf16 %v1445_v35, %v1445_v35 }
 0xac9   : > { %1592 = vrot.lane.b32.xlu0 %v1590_v36, %s3220_s30 }
 0xacc   : > { %v1515_v10 = vpop.permute.xlu0 %1514 }
 0xacd   : > { %v1517_v41 = vmul.f32 %v3044_v44, %v1515_v10 }
 0xacf   : > { %v1662_v59 = vpack.c.bf16 %v1517_v41, %v1517_v41 }
 0xad1   : > { %1664 = vrot.lane.b32.xlu1 %v1662_v59, %s3220_s30 }
 0xb33   : > { %v1521_v43 = vpop.permute.xlu1 %1520 }
 0xb34   : > { %2811 = vmatmul.mubr.msk.bf16.vlgmr.msra.gmra.mrb[36].mxu0 %vm653_vm2, %v1521_v43 }
 0xb35   : > { %2821 = vmatpush3.bf16.msra.mxu0 %v3354_v18  ;;  %2822 = vmatprep.mubr.msk.bf16.mxu0 %vm3215_vm1, %v3214_v11 }
 0xb36   : > { %2832 = vmatprep.subr.bf16.mxu0 %v3214_v11 }
 0xb3b   : > { %v1593_v46 = vpop.permute.xlu0 %1592 }
 0xb3c   : > { %2817 = vmatmul.mubr.msk.bf16.vlgmr.msra.gmra.mrb[36].mxu1 %vm653_vm2, %v1593_v46 }
 0xb3d   : > { %2827 = vmatpush3.bf16.msra.mxu1 %v3340_v14  ;;  %2828 = vmatprep.mubr.msk.bf16.mxu1 %vm3215_vm1, %v3214_v11 }
 0xb3e   : > { %2838 = vmatprep.subr.bf16.mxu1 %v3214_v11 }
 0xb43   : > { %v1665_v48 = vpop.permute.xlu1 %1664 }
 0xb44   : > { %2823 = vmatmul.mubr.msk.bf16.vlgmr.msra.gmra.mrb[40].mxu0 %vm653_vm2, %v1665_v48 }
 0xb45   : > { %2833 = vmatpush3.bf16.msra.mxu0 %v3357_v19  ;;  %2834 = vmatprep.mubr.msk.bf16.mxu0 %vm3215_vm1, %v3214_v11 }
 0xb46   : > { %2844 = vmatprep.subr.bf16.mxu0 %v3214_v11 }
 0xc07   : > { %v1559_v18 = vpop.f32.mrb[36].mxu0 }
 0xc08   : > { %v1565_v50 = vadd.f32 %v1559_v18, %v3402_v45  ;;  %v2812_v4 = vpop.f32.mrb[37].mxu0 }
 0xc09   : > { %v1562_v14 = vpop.f32.mrb[38].mxu0 }
 0xc0a   : > { %3051 = vtanh.f32 %v1565_v50  ;;  %v2813_v55 = vpop.f32.mrb[39].mxu0 }
 0xc0b   : > { %v3622_v55 = vld [vmem:[%s3332_s13 + $0x10] sm:$0xff]  }
 0xc0f   : > { %v1631_v33 = vpop.f32.mrb[36].mxu1 }
 0xc10   : > { %v1637_v9 = vadd.f32 %v1631_v33, %v3408_v51  ;;  %v2818_v57 = vpop.f32.mrb[37].mxu1  ;;  %v2606_v51 = vmul.f32 -1.442695, %v1565_v50 }
 0xc11   : > { %v1634_v38 = vpop.f32.mrb[38].mxu1 }
 0xc12   : > { %3053 = vtanh.f32 %v1637_v9  ;;  %v2819_v58 = vpop.f32.mrb[39].mxu1  ;;  %v2608_v37 = vmul.f32 -1.442695, %v1637_v9  ;;  %v3630_v9 = vld [vmem:[%s3332_s13] sm:$0xff]   ;;  %v3638_v38 = vld [vmem:[%s3332_s13 + $0x8] sm:$0xff]   ;;  %s3748_s13 = scalar_lea.sflag [#allocation3], %s231_s5 }
 0xc14   : > { %v3052_v19 = vpop.eup %3051 }
 0xc15   : > { %1575 = vrot.lane.b32.xlu0 %v3052_v19, %s3217_s27 }
 0xc17   : > { %v1703_v60 = vpop.f32.mrb[40].mxu0 }
 0xc18   : > { %v1709_v61 = vadd.f32 %v1703_v60, %v3425_v13  ;;  %v2824_v62 = vpop.f32.mrb[41].mxu0 }
 0xc19   : > { %v1706_v2 = vpop.f32.mrb[42].mxu0 }
 0xc1a   : > { %3055 = vtanh.f32 %v1709_v61  ;;  %v2825_v45 = vpop.f32.mrb[43].mxu0  ;;  %v2610_v40 = vmul.f32 -1.442695, %v1709_v61 }
 0xc1b   : > { %3057 = vpow2.f32 %v2606_v51 }
 0xc1c   : > { %v3054_v16 = vpop.eup %3053  ;;  %3059 = vpow2.f32 %v2608_v37 }
 0xc1d   : > { %1647 = vrot.lane.b32.xlu1 %v3054_v16, %s3217_s27  ;;  %3061 = vpow2.f32 %v2610_v40 }
 0xc24   : > { %v3056_v63 = vpop.eup %3055 }
 0xc25   : > { %1719 = vrot.lane.b32.xlu0 %v3056_v63, %s3217_s27  ;;  %v3058_v1 = vpop.eup %3057 }
 0xc26   : > { %v1569_v6 = vadd.f32 1.0, %v3058_v1  ;;  %v3060_v13 = vpop.eup %3059 }
 0xc27   : > { %v1641_v7 = vadd.f32 1.0, %v3060_v13  ;;  %v3062_v39 = vpop.eup %3061 }
 0xc28   : > { %3063 = vrcp.f32 %v1569_v6  ;;  %v1713_v15 = vadd.f32 1.0, %v3062_v39 }
 0xc29   : > { %3065 = vrcp.f32 %v1641_v7 }
 0xc2a   : > { %3067 = vrcp.f32 %v1713_v15 }
 0xc32   : > { %v3064_v12 = vpop.eup %3063 }
 0xc33   : > { %v3066_v20 = vpop.eup %3065  ;;  %v1573_v29 = vmul.f32 %v3064_v12, %v3561_v23 }
 0xc34   : > { %v3068_v24 = vpop.eup %3067  ;;  %v1645_v3 = vmul.f32 %v3066_v20, %v3565_v25 }
 0xc35   : > { %v1717_v35 = vmul.f32 %v3068_v24, %v3570_v26 }
 0xc87   : > { %v1576_v44 = vpop.permute.xlu0 %1575 }
 0xc88   : > { %v1578_v5 = vmul.f32 %v3064_v12, %v1576_v44 }
 0xc8a   : > { %1580 = vrot.lane.b32.xlu1 %v1578_v5, %s3218_s28 }
 0xc8f   : > { %v1648_v21 = vpop.permute.xlu1 %1647 }
 0xc90   : > { %v1650_v52 = vmul.f32 %v3066_v20, %v1648_v21 }
 0xc92   : > { %1652 = vrot.lane.b32.xlu0 %v1650_v52, %s3218_s28 }
 0xc97   : > { %v1720_v27 = vpop.permute.xlu0 %1719 }
 0xc98   : > { %v1722_v28 = vmul.f32 %v3068_v24, %v1720_v27 }
 0xc9a   : > { %1724 = vrot.lane.b32.xlu1 %v1722_v28, %s3218_s28 }
 0xcfc   : > { %v1581_v0 = vpop.permute.xlu1 %1580 }
 0xcfd   : > { %v3603_v30 = vadd.f32 %v1581_v0, %v1573_v29 }
 0xcff   : > { %3069 = vtanh.f32 %v3603_v30 }
 0xd04   : > { %v1653_v32 = vpop.permute.xlu0 %1652 }
 0xd05   : > { %v3607_v31 = vadd.f32 %v1653_v32, %v1645_v3 }
 0xd07   : > { %3071 = vtanh.f32 %v3607_v31 }
 0xd09   : > { %v3070_v34 = vpop.eup %3069 }
 0xd0a   : > { %1586 = vrot.lane.b32.xlu0 %v3070_v34, %s3219_s29 }
 0xd0c   : > { %v1725_v36 = vpop.permute.xlu1 %1724 }
 0xd0d   : > { %v3612_v10 = vadd.f32 %v1725_v36, %v1717_v35 }
 0xd0f   : > { %3073 = vtanh.f32 %v3612_v10 }
 0xd11   : > { %v3072_v23 = vpop.eup %3071 }
 0xd12   : > { %1658 = vrot.lane.b32.xlu1 %v3072_v23, %s3219_s29 }
 0xd19   : > { %v3074_v41 = vpop.eup %3073 }
 0xd1a   : > { %1730 = vrot.lane.b32.xlu0 %v3074_v41, %s3219_s29 }
 0xd7c   : > { %v1587_v25 = vpop.permute.xlu0 %1586 }
 0xd7d   : > { %v1589_v59 = vmul.f32 %v3064_v12, %v1587_v25 }
 0xd7f   : > { %v1734_v43 = vpack.c.bf16 %v1589_v59, %v1589_v59 }
 0xd81   : > { %1736 = vrot.lane.b32.xlu1 %v1734_v43, %s3220_s30 }
 0xd84   : > { %v1659_v46 = vpop.permute.xlu1 %1658 }
 0xd85   : > { %v1661_v26 = vmul.f32 %v3066_v20, %v1659_v46 }
 0xd87   : > { %v1806_v48 = vpack.c.bf16 %v1661_v26, %v1661_v26 }
 0xd89   : > { %1808 = vrot.lane.b32.xlu0 %v1806_v48, %s3220_s30 }
 0xd8c   : > { %v1731_v18 = vpop.permute.xlu0 %1730 }
 0xd8d   : > { %v1733_v50 = vmul.f32 %v3068_v24, %v1731_v18 }
 0xd8f   : > { %v1878_v4 = vpack.c.bf16 %v1733_v50, %v1733_v50 }
 0xd91   : > { %1880 = vrot.lane.b32.xlu1 %v1878_v4, %s3220_s30 }
 0xdf3   : > { %v1737_v14 = vpop.permute.xlu1 %1736 }
 0xdf4   : > { %2829 = vmatmul.mubr.msk.bf16.vlgmr.msra.gmra.mrb[40].mxu1 %vm653_vm2, %v1737_v14 }
 0xdf5   : > { %2839 = vmatpush3.bf16.msra.mxu1 %v3622_v55  ;;  %2840 = vmatprep.mubr.msk.bf16.mxu1 %vm3215_vm1, %v3214_v11 }
 0xdf6   : > { %2850 = vmatprep.subr.bf16.mxu1 %v3214_v11 }
 0xdfb   : > { %v1809_v33 = vpop.permute.xlu0 %1808 }
 0xdfc   : > { %2835 = vmatmul.mubr.msk.bf16.vlgmr.msra.gmra.mrb[44].mxu0 %vm653_vm2, %v1809_v33 }
 0xdfd   : > { %2845 = vmatpush3.bf16.msra.mxu0 %v3630_v9  ;;  %2846 = vmatprep.mubr.msk.bf16.mxu0 %vm3215_vm1, %v3214_v11 }
 0xdfe   : > { %2856 = vmatprep.subr.bf16.mxu0 %v3214_v11 }
 0xe03   : > { %v1881_v57 = vpop.permute.xlu1 %1880 }
 0xe04   : > { %2841 = vmatmul.mubr.msk.bf16.vlgmr.msra.gmra.mrb[44].mxu1 %vm653_vm2, %v1881_v57 }
 0xe05   : > { %2851 = vmatpush3.bf16.msra.mxu1 %v3638_v38  ;;  %2852 = vmatprep.mubr.msk.bf16.mxu1 %vm3215_vm1, %v3214_v11 }
 0xe06   : > { %2862 = vmatprep.subr.bf16.mxu1 %v3214_v11 }
 0xec7   : > { %v1775_v58 = vpop.f32.mrb[40].mxu1 }
 0xec8   : > { %v1781_v19 = vadd.f32 %v1775_v58, %v3410_v53  ;;  %v2830_v60 = vpop.f32.mrb[41].mxu1 }
 0xec9   : > { %v1778_v61 = vpop.f32.mrb[42].mxu1 }
 0xeca   : > { %3075 = vtanh.f32 %v1781_v19  ;;  %v2831_v62 = vpop.f32.mrb[43].mxu1 }
 0xecf   : > { %v1847_v2 = vpop.f32.mrb[44].mxu0 }
 0xed0   : > { %v1853_v45 = vadd.f32 %v1847_v2, %v3414_v56  ;;  %v2836_v16 = vpop.f32.mrb[45].mxu0  ;;  %v2612_v56 = vmul.f32 -1.442695, %v1781_v19 }
 0xed1   : > { %v1850_v63 = vpop.f32.mrb[46].mxu0 }
 0xed2   : > { %3077 = vtanh.f32 %v1853_v45  ;;  %v2837_v51 = vpop.f32.mrb[47].mxu0  ;;  %v2614_v12 = vmul.f32 -1.442695, %v1853_v45 }
 0xed4   : > { %v3076_v37 = vpop.eup %3075 }
 0xed5   : > { %1791 = vrot.lane.b32.xlu0 %v3076_v37, %s3217_s27 }
 0xed7   : > { %v1919_v1 = vpop.f32.mrb[44].mxu1 }
 0xed8   : > { %v1925_v40 = vadd.f32 %v1919_v1, %v3429_v22  ;;  %v2842_v6 = vpop.f32.mrb[45].mxu1 }
 0xed9   : > { %v1922_v13 = vpop.f32.mrb[46].mxu1 }
 0xeda   : > { %3079 = vtanh.f32 %v1925_v40  ;;  %v2843_v53 = vpop.f32.mrb[47].mxu1  ;;  %v2616_v5 = vmul.f32 -1.442695, %v1925_v40 }
 0xedb   : > { %3081 = vpow2.f32 %v2612_v56 }
 0xedc   : > { %v3078_v7 = vpop.eup %3077  ;;  %3083 = vpow2.f32 %v2614_v12 }
 0xedd   : > { %1863 = vrot.lane.b32.xlu1 %v3078_v7, %s3217_s27  ;;  %3085 = vpow2.f32 %v2616_v5 }
 0xee4   : > { %v3080_v39 = vpop.eup %3079 }
 0xee5   : > { %1935 = vrot.lane.b32.xlu0 %v3080_v39, %s3217_s27  ;;  %v3082_v44 = vpop.eup %3081 }
 0xee6   : > { %v1785_v15 = vadd.f32 1.0, %v3082_v44  ;;  %v3084_v22 = vpop.eup %3083 }
 0xee7   : > { %v1857_v20 = vadd.f32 1.0, %v3084_v22  ;;  %v3086_v21 = vpop.eup %3085 }
 0xee8   : > { %3087 = vrcp.f32 %v1785_v15  ;;  %v1929_v28 = vadd.f32 1.0, %v3086_v21 }
 0xee9   : > { %3089 = vrcp.f32 %v1857_v20 }
 0xeea   : > { %3091 = vrcp.f32 %v1929_v28 }
 0xef2   : > { %v3088_v52 = vpop.eup %3087 }
 0xef3   : > { %v3090_v29 = vpop.eup %3089  ;;  %v1789_v36 = vmul.f32 %v3088_v52, %v3603_v30 }
 0xef4   : > { %v3092_v32 = vpop.eup %3091  ;;  %v1861_v25 = vmul.f32 %v3090_v29, %v3607_v31 }
 0xef5   : > { %v1933_v26 = vmul.f32 %v3092_v32, %v3612_v10 }
 0xf47   : > { %v1792_v24 = vpop.permute.xlu0 %1791 }
 0xf48   : > { %v1794_v27 = vmul.f32 %v3088_v52, %v1792_v24 }
 0xf4a   : > { %1796 = vrot.lane.b32.xlu1 %v1794_v27, %s3218_s28 }
 0xf4f   : > { %v1864_v0 = vpop.permute.xlu1 %1863 }
 0xf50   : > { %v1866_v3 = vmul.f32 %v3090_v29, %v1864_v0 }
 0xf52   : > { %1868 = vrot.lane.b32.xlu0 %v1866_v3, %s3218_s28 }
 0xf57   : > { %v1936_v34 = vpop.permute.xlu0 %1935 }
 0xf58   : > { %v1938_v35 = vmul.f32 %v3092_v32, %v1936_v34 }
 0xf5a   : > { %1940 = vrot.lane.b32.xlu1 %v1938_v35, %s3218_s28 }
 0xfbc   : > { %v1797_v23 = vpop.permute.xlu1 %1796 }
 0xfbd   : > { %v3654_v41 = vadd.f32 %v1797_v23, %v1789_v36 }
 0xfbf   : > { %3093 = vtanh.f32 %v3654_v41 }
 0xfc4   : > { %v1869_v59 = vpop.permute.xlu0 %1868 }
 0xfc5   : > { %v3658_v43 = vadd.f32 %v1869_v59, %v1861_v25 }
 0xfc7   : > { %3095 = vtanh.f32 %v3658_v43 }
 0xfc9   : > { %v3094_v46 = vpop.eup %3093 }
 0xfca   : > { %1802 = vrot.lane.b32.xlu0 %v3094_v46, %s3219_s29 }
 0xfcc   : > { %v1941_v48 = vpop.permute.xlu1 %1940 }
 0xfcd   : > { %v3663_v18 = vadd.f32 %v1941_v48, %v1933_v26 }
 0xfcf   : > { %3097 = vtanh.f32 %v3663_v18 }
 0xfd1   : > { %v3096_v30 = vpop.eup %3095 }
 0xfd2   : > { %1874 = vrot.lane.b32.xlu1 %v3096_v30, %s3219_s29 }
 0xfd9   : > { %v3098_v50 = vpop.eup %3097 }
 0xfda   : > { %1946 = vrot.lane.b32.xlu0 %v3098_v50, %s3219_s29 }
0x103c   : > { %v1803_v31 = vpop.permute.xlu0 %1802 }
0x103d   : > { %v1805_v4 = vmul.f32 %v3088_v52, %v1803_v31 }
0x103f   : > { %v1950_v14 = vpack.c.bf16 %v1805_v4, %v1805_v4 }
0x1041   : > { %1952 = vrot.lane.b32.xlu1 %v1950_v14, %s3220_s30 }
0x1044   : > { %v1875_v33 = vpop.permute.xlu1 %1874 }
0x1045   : > { %v1877_v57 = vmul.f32 %v3090_v29, %v1875_v33 }
0x1047   : > { %v2022_v58 = vpack.c.bf16 %v1877_v57, %v1877_v57 }
0x1049   : > { %2024 = vrot.lane.b32.xlu0 %v2022_v58, %s3220_s30 }
0x104c   : > { %v1947_v10 = vpop.permute.xlu0 %1946 }
0x104d   : > { %v1949_v19 = vmul.f32 %v3092_v32, %v1947_v10 }
0x104f   : > { %v2094_v60 = vpack.c.bf16 %v1949_v19, %v1949_v19 }
0x1051   : > { %2096 = vrot.lane.b32.xlu1 %v2094_v60, %s3220_s30 }
0x10b3   : > { %v1953_v61 = vpop.permute.xlu1 %1952 }
0x10b4   : > { %2847 = vmatmul.mubr.msk.bf16.vlgmr.msra.gmra.mrb[48].mxu0 %vm653_vm2, %v1953_v61 }
0x10b5   : > { %2857 = vmatpush3.bf16.msra.mxu0 %v3622_v55  ;;  %2858 = vmatprep.mubr.msk.bf16.mxu0 %vm3215_vm1, %v3214_v11 }
0x10b6   : > { %2868 = vmatprep.subr.bf16.mxu0 %v3214_v11 }
0x10bb   : > { %v2025_v62 = vpop.permute.xlu0 %2024 }
0x10bc   : > { %2853 = vmatmul.mubr.msk.bf16.vlgmr.msra.gmra.mrb[48].mxu1 %vm653_vm2, %v2025_v62 }
0x10bd   : > { %2863 = vmatpush3.bf16.msra.mxu1 %v3630_v9  ;;  %2864 = vmatprep.mubr.msk.bf16.mxu1 %vm3215_vm1, %v3214_v11 }
0x10be   : > { %2874 = vmatprep.subr.bf16.mxu1 %v3214_v11 }
0x10c3   : > { %v2097_v2 = vpop.permute.xlu1 %2096 }
0x10c4   : > { %2859 = vmatmul.mubr.msk.bf16.vlgmr.msra.gmra.mrb[52].mxu0 %vm653_vm2, %v2097_v2 }
0x10c5   : > { %2869 = vmatpush3.bf16.msra.mxu0 %v3638_v38  ;;  %2870 = vmatprep.mubr.msk.bf16.mxu0 %vm3215_vm1, %v3214_v11 }
0x1187   : > { %v1991_v45 = vpop.f32.mrb[48].mxu0 }
0x1188   : > { %v1997_v16 = vadd.f32 %v1991_v45, %v3400_v42  ;;  %v2848_v63 = vpop.f32.mrb[49].mxu0 }
0x1189   : > { %v1994_v51 = vpop.f32.mrb[50].mxu0 }
0x118a   : > { %3099 = vtanh.f32 %v1997_v16  ;;  %v2849_v9 = vpop.f32.mrb[51].mxu0 }
0x118f   : > { %v2063_v37 = vpop.f32.mrb[48].mxu1 }
0x1190   : > { %v2069_v1 = vadd.f32 %v2063_v37, %v3404_v47  ;;  %v2854_v40 = vpop.f32.mrb[49].mxu1  ;;  %v2618_v47 = vmul.f32 -1.442695, %v1997_v16 }
0x1191   : > { %v2066_v6 = vpop.f32.mrb[50].mxu1 }
0x1192   : > { %3101 = vtanh.f32 %v2069_v1  ;;  %v2855_v13 = vpop.f32.mrb[51].mxu1  ;;  %v2620_v5 = vmul.f32 -1.442695, %v2069_v1 }
0x1194   : > { %v3100_v53 = vpop.eup %3099 }
0x1195   : > { %2007 = vrot.lane.b32.xlu0 %v3100_v53, %s3217_s27 }
0x1197   : > { %v2135_v38 = vpop.f32.mrb[52].mxu0 }
0x1198   : > { %v2141_v7 = vadd.f32 %v2135_v38, %v3423_v8  ;;  %v2860_v39 = vpop.f32.mrb[53].mxu0 }
0x1199   : > { %v2138_v56 = vpop.f32.mrb[54].mxu0 }
0x119a   : > { %3103 = vtanh.f32 %v2141_v7  ;;  %v2861_v42 = vpop.f32.mrb[55].mxu0  ;;  %v2622_v22 = vmul.f32 -1.442695, %v2141_v7 }
0x119b   : > { %3105 = vpow2.f32 %v2618_v47 }
0x119c   : > { %v3102_v12 = vpop.eup %3101  ;;  %3107 = vpow2.f32 %v2620_v5 }
0x119d   : > { %2079 = vrot.lane.b32.xlu1 %v3102_v12, %s3217_s27  ;;  %3109 = vpow2.f32 %v2622_v22 }
0x11a4   : > { %v3104_v44 = vpop.eup %3103 }
0x11a5   : > { %2151 = vrot.lane.b32.xlu0 %v3104_v44, %s3217_s27  ;;  %v3106_v15 = vpop.eup %3105 }
0x11a6   : > { %v2001_v20 = vadd.f32 1.0, %v3106_v15  ;;  %v3108_v8 = vpop.eup %3107 }
0x11a7   : > { %v2073_v21 = vadd.f32 1.0, %v3108_v8  ;;  %v3110_v52 = vpop.eup %3109 }
0x11a8   : > { %3111 = vrcp.f32 %v2001_v20  ;;  %v2145_v29 = vadd.f32 1.0, %v3110_v52 }
0x11a9   : > { %3113 = vrcp.f32 %v2073_v21 }
0x11aa   : > { %3115 = vrcp.f32 %v2145_v29 }
0x11b2   : > { %v3112_v24 = vpop.eup %3111 }
0x11b3   : > { %v3114_v0 = vpop.eup %3113  ;;  %v2005_v23 = vmul.f32 %v3112_v24, %v3654_v41 }
0x11b4   : > { %v3116_v34 = vpop.eup %3115  ;;  %v2077_v46 = vmul.f32 %v3114_v0, %v3658_v43 }
0x11b5   : > { %v2149_v50 = vmul.f32 %v3116_v34, %v3663_v18 }
0x1207   : > { %v2008_v27 = vpop.permute.xlu0 %2007 }
0x1208   : > { %v2010_v28 = vmul.f32 %v3112_v24, %v2008_v27 }
0x120a   : > { %2012 = vrot.lane.b32.xlu1 %v2010_v28, %s3218_s28 }
0x120f   : > { %v2080_v3 = vpop.permute.xlu1 %2079 }
0x1210   : > { %v2082_v32 = vmul.f32 %v3114_v0, %v2080_v3 }
0x1212   : > { %2084 = vrot.lane.b32.xlu0 %v2082_v32, %s3218_s28 }
0x1217   : > { %v2152_v35 = vpop.permute.xlu0 %2151 }
0x1218   : > { %v2154_v36 = vmul.f32 %v3116_v34, %v2152_v35 }
0x121a   : > { %2156 = vrot.lane.b32.xlu1 %v2154_v36, %s3218_s28 }
0x127c   : > { %v2013_v25 = vpop.permute.xlu1 %2012 }
0x127d   : > { %v3695_v59 = vadd.f32 %v2013_v25, %v2005_v23 }
0x127f   : > { %3117 = vtanh.f32 %v3695_v59 }
0x1284   : > { %v2085_v26 = vpop.permute.xlu0 %2084 }
0x1285   : > { %v3699_v48 = vadd.f32 %v2085_v26, %v2077_v46 }
0x1287   : > { %3119 = vtanh.f32 %v3699_v48 }
0x1289   : > { %v3118_v30 = vpop.eup %3117 }
0x128a   : > { %2018 = vrot.lane.b32.xlu0 %v3118_v30, %s3219_s29 }
0x128c   : > { %v2157_v31 = vpop.permute.xlu1 %2156 }
0x128d   : > { %v3704_v4 = vadd.f32 %v2157_v31, %v2149_v50 }
0x128f   : > { %3121 = vtanh.f32 %v3704_v4 }
0x1291   : > { %v3120_v41 = vpop.eup %3119 }
0x1292   : > { %2090 = vrot.lane.b32.xlu1 %v3120_v41, %s3219_s29 }
0x1299   : > { %v3122_v14 = vpop.eup %3121 }
0x129a   : > { %2162 = vrot.lane.b32.xlu0 %v3122_v14, %s3219_s29 }
0x12fc   : > { %v2019_v43 = vpop.permute.xlu0 %2018 }
0x12fd   : > { %v2021_v33 = vmul.f32 %v3112_v24, %v2019_v43 }
0x12ff   : > { %v2166_v57 = vpack.c.bf16 %v2021_v33, %v2021_v33 }
0x1301   : > { %2168 = vrot.lane.b32.xlu1 %v2166_v57, %s3220_s30 }
0x1304   : > { %v2091_v58 = vpop.permute.xlu1 %2090 }
0x1305   : > { %v2093_v10 = vmul.f32 %v3114_v0, %v2091_v58 }
0x1307   : > { %v2238_v19 = vpack.c.bf16 %v2093_v10, %v2093_v10 }
0x1309   : > { %2240 = vrot.lane.b32.xlu0 %v2238_v19, %s3220_s30 }
0x130c   : > { %v2163_v18 = vpop.permute.xlu0 %2162 }
0x130d   : > { %v2165_v60 = vmul.f32 %v3116_v34, %v2163_v18 }
0x130f   : > { %v2310_v61 = vpack.c.bf16 %v2165_v60, %v2165_v60 }
0x1311   : > { %2312 = vrot.lane.b32.xlu1 %v2310_v61, %s3220_s30 }
0x1373   : > { %v2169_v62 = vpop.permute.xlu1 %2168 }
0x1374   : > { %2865 = vmatmul.mubr.msk.bf16.vlgmr.msra.gmra.mrb[52].mxu1 %vm653_vm2, %v2169_v62 }
0x1375   : > { %2875 = vmatpush3.bf16.msra.mxu1 %v3622_v55  ;;  %2876 = vmatprep.mubr.msk.bf16.mxu1 %vm3215_vm1, %v3214_v11 }
0x137b   : > { %v2241_v2 = vpop.permute.xlu0 %2240 }
0x137c   : > { %2871 = vmatmul.mubr.msk.bf16.vlgmr.msra.gmra.mrb[56].mxu0 %vm653_vm2, %v2241_v2 }
0x1383   : > { %v2313_v45 = vpop.permute.xlu1 %2312 }
0x1384   : > { %2877 = vmatmul.mubr.msk.bf16.vlgmr.msra.gmra.mrb[56].mxu1 %vm653_vm2, %v2313_v45 }
0x1447   : > { %v2207_v16 = vpop.f32.mrb[52].mxu1 }
0x1448   : > { %v2213_v63 = vadd.f32 %v2207_v16, %v3406_v49  ;;  %v2866_v51 = vpop.f32.mrb[53].mxu1 }
0x1449   : > { %v2210_v9 = vpop.f32.mrb[54].mxu1 }
0x144a   : > { %3123 = vtanh.f32 %v2213_v63  ;;  %v2867_v37 = vpop.f32.mrb[55].mxu1 }
0x144f   : > { %v2279_v1 = vpop.f32.mrb[56].mxu0 }
0x1450   : > { %v2285_v40 = vadd.f32 %v2279_v1, %v3412_v54  ;;  %v2872_v55 = vpop.f32.mrb[57].mxu0  ;;  %v2624_v54 = vmul.f32 -1.442695, %v2213_v63 }
0x1451   : > { %v2282_v6 = vpop.f32.mrb[58].mxu0 }
0x1452   : > { %3125 = vtanh.f32 %v2285_v40  ;;  %v2873_v11 = vpop.f32.mrb[59].mxu0  ;;  %v2626_v12 = vmul.f32 -1.442695, %v2285_v40 }
0x1454   : > { %v3124_v13 = vpop.eup %3123 }
0x1455   : > { %2223 = vrot.lane.b32.xlu0 %v3124_v13, %s3217_s27 }
0x1457   : > { %v2351_v53 = vpop.f32.mrb[56].mxu1 }
0x1458   : > { %v2357_v38 = vadd.f32 %v2351_v53, %v3427_v17  ;;  %v2878_v7 = vpop.f32.mrb[57].mxu1 }
0x1459   : > { %v2354_v39 = vpop.f32.mrb[58].mxu1 }
0x145a   : > { %3127 = vtanh.f32 %v2357_v38  ;;  %v2879_v49 = vpop.f32.mrb[59].mxu1  ;;  %v2628_v47 = vmul.f32 -1.442695, %v2357_v38 }
0x145b   : > { %3129 = vpow2.f32 %v2624_v54 }
0x145c   : > { %v3126_v56 = vpop.eup %3125  ;;  %3131 = vpow2.f32 %v2626_v12 }
0x145d   : > { %2295 = vrot.lane.b32.xlu1 %v3126_v56, %s3217_s27  ;;  %3133 = vpow2.f32 %v2628_v47 }
0x1464   : > { %v3128_v42 = vpop.eup %3127 }
0x1465   : > { %2367 = vrot.lane.b32.xlu0 %v3128_v42, %s3217_s27  ;;  %v3130_v44 = vpop.eup %3129 }
0x1466   : > { %v2217_v5 = vadd.f32 1.0, %v3130_v44  ;;  %v3132_v17 = vpop.eup %3131 }
0x1467   : > { %v2289_v15 = vadd.f32 1.0, %v3132_v17  ;;  %v3134_v22 = vpop.eup %3133 }
0x1468   : > { %3135 = vrcp.f32 %v2217_v5  ;;  %v2361_v52 = vadd.f32 1.0, %v3134_v22 }
0x1469   : > { %3137 = vrcp.f32 %v2289_v15 }
0x146a   : > { %3139 = vrcp.f32 %v2361_v52 }
0x1472   : > { %v3136_v20 = vpop.eup %3135 }
0x1473   : > { %v3138_v24 = vpop.eup %3137  ;;  %v2221_v32 = vmul.f32 %v3136_v20, %v3695_v59 }
0x1474   : > { %v3140_v29 = vpop.eup %3139  ;;  %v2293_v36 = vmul.f32 %v3138_v24, %v3699_v48 }
0x1475   : > { %v2365_v26 = vmul.f32 %v3140_v29, %v3704_v4 }
0x14c7   : > { %v2224_v8 = vpop.permute.xlu0 %2223 }
0x14c8   : > { %v2226_v21 = vmul.f32 %v3136_v20, %v2224_v8 }
0x14ca   : > { %2228 = vrot.lane.b32.xlu1 %v2226_v21, %s3218_s28 }
0x14cf   : > { %v2296_v27 = vpop.permute.xlu1 %2295 }
0x14d0   : > { %v2298_v28 = vmul.f32 %v3138_v24, %v2296_v27 }
0x14d2   : > { %2300 = vrot.lane.b32.xlu0 %v2298_v28, %s3218_s28 }
0x14d7   : > { %v2368_v0 = vpop.permute.xlu0 %2367 }
0x14d8   : > { %v2370_v3 = vmul.f32 %v3140_v29, %v2368_v0 }
0x14da   : > { %2372 = vrot.lane.b32.xlu1 %v2370_v3, %s3218_s28 }
0x153c   : > { %v2229_v34 = vpop.permute.xlu1 %2228 }
0x153d   : > { %v2231_v35 = vadd.f32 %v2229_v34, %v2221_v32 }
0x153f   : > { %3141 = vtanh.f32 %v2231_v35 }
0x1544   : > { %v2301_v23 = vpop.permute.xlu0 %2300 }
0x1545   : > { %v2303_v25 = vadd.f32 %v2301_v23, %v2293_v36 }
0x1547   : > { %3143 = vtanh.f32 %v2303_v25 }
0x1549   : > { %v3142_v46 = vpop.eup %3141 }
0x154a   : > { %2234 = vrot.lane.b32.xlu0 %v3142_v46, %s3219_s29 }
0x154c   : > { %v2373_v30 = vpop.permute.xlu1 %2372 }
0x154d   : > { %v2375_v50 = vadd.f32 %v2373_v30, %v2365_v26 }
0x154f   : > { %3145 = vtanh.f32 %v2375_v50 }
0x1551   : > { %v3144_v31 = vpop.eup %3143 }
0x1552   : > { %2306 = vrot.lane.b32.xlu1 %v3144_v31, %s3219_s29 }
0x1559   : > { %v3146_v59 = vpop.eup %3145 }
0x155a   : > { %2378 = vrot.lane.b32.xlu0 %v3146_v59, %s3219_s29 }
0x15bc   : > { %v2235_v41 = vpop.permute.xlu0 %2234 }
0x15bd   : > { %v2237_v48 = vmul.f32 %v3136_v20, %v2235_v41 }
0x15bf   : > { %2383 = vrot.lane.b32.xlu1 %v2237_v48, %s3220_s30 }
0x15c4   : > { %v2307_v14 = vpop.permute.xlu1 %2306 }
0x15c5   : > { %v2309_v43 = vmul.f32 %v3138_v24, %v2307_v14 }
0x15c7   : > { %2388 = vrot.lane.b32.xlu0 %v2309_v43, %s3220_s30 }
0x15cc   : > { %v2379_v4 = vpop.permute.xlu0 %2378 }
0x15cd   : > { %v2381_v33 = vmul.f32 %v3140_v29, %v2379_v4 }
0x15cf   : > { %2394 = vrot.lane.b32.xlu1 %v2381_v33, %s3220_s30 }
0x1631   : > { %v2384_v57 = vpop.permute.xlu1 %2383 }
0x1632   : > { %2386 = vst.msk [vmem:[%s233_s7] sm:$0xff] %vm653_vm2, %v2384_v57 }
0x1639   : > { %v2389_v58 = vpop.permute.xlu0 %2388 }
0x163a   : > { %2629 = vst.msk [vmem:[%s233_s7 + $0x8] sm:$0xff] %vm653_vm2, %v2389_v58 }
0x1641   : > { %v2395_v10 = vpop.permute.xlu1 %2394 }
0x1642   : > { %2630 = vst.msk [vmem:[%s233_s7 + $0x10] sm:$0xff] %vm653_vm2, %v2395_v10 }
0x1643   : > { %3163 = shalt.err (!%p3160_p3)
}
0x1644   : > { %s3164_s23 = scalar_lea.hbm %s3745_s12, 384  ;;  %s3168_s29 = scalar_lea.hbm %s3793_s4, 768 }
0x1645   : > { %p3165_p4 = scmp.ne.s32.totalorder %s3745_s12, %s3164_s23  ;;  %p3169_p9 = scmp.lt.u32.totalorder %s3745_s12, %s3793_s4 }
0x1646   : > { %p3170_p10 = scmp.lt.u32.totalorder %s3168_s29, %s3164_s23  ;;  %p3172_p12 = scmp.lt.u32.totalorder %s3164_s23, %s3745_s12 }
0x1647   : > { %p3166_p7 = pnand %p3165_p4, %p3287_p5 }
0x1648   : > { %p3171_p11 = por %p3170_p10, %p3169_p9 }
0x1649   : > { %p3167_p8 = pneg %p3166_p7 }
0x164a   : > { %p3173_p13 = por %p3172_p12, %p3171_p11 }
0x164c   : > { %p3174_p0 = pnand %p3173_p13, %p3167_p8 }
0x164e   : > { %3177 = shalt.err (!%p3174_p0)
}
0x164f   : > { %s3222_s6 = smov 128   ;;  %s3223_s7 = smov 8  }
0x1650   : > { %2886 = dma.vmem_to_hbm [thread:$0]  (%p3287_p5), %s3740_s9, 384, %s3745_s12, %s3748_s13, %s3222_s6, %s3222_s6, %s3223_s7  }
0x1651 PF: > { %p2892_p1 = scmp.ge.s32.totalorder %s3212_s18, 2  ;;  %s2428_s8 = sand.u32 1, %s3200_s15  }
0x1652   : > { %s2429_s10 = scalar_lea.sflag [#allocation3], %s2428_s8 }
0x1653   : > { %p2889_p2 = pnand %p2892_p1, %p3291_p6 }
0x1655   : > { %3195 = dma.done.wait (!%p2889_p2), %s2429_s10, 384  }
0x1656   : > { %3197 = vsyncadd (!%p2889_p2), %s2429_s10, 4294966912  ;;  %p14_p3 = scmp.ge.s32.totalorder %s3274_s21, 4   ;;  %s3796_s15 = smov %s3204_s16 }
0x1657   : > { %s3797_s16 = smov %s3208_s17  ;;  %s3798_s17 = smov %s3285_s24 }
0x1658   : > { %s3799_s18 = smov %s3274_s21  ;;  %16 = sbr.rel (!%p14_p3) target bundleno = 3 (0x3), region = 90 }
0x165f   :  { %2434 = vsyncpa [#allocation3], 1 }
0x1660   :  { %2436 = vsyncpa [#allocation3 + $0x1], 1 }

</bundles_post_ra>
